<compile_context>
chip_gen: v6e
topology: v6e:2x2x1
jax: 0.10.0
libtpu: 0.0.40
codegen_flags: <defaults>
</compile_context>

<pallas_src>
import math
from functools import partial

import jax
import jax.numpy as jnp
from jax.experimental import pallas as pl
from jax.experimental.pallas import tpu as pltpu  # noqa: F401  (TPU backend)


# ----------------------------------------------------------------------------
# In-kernel helpers (traced inside the single Pallas body)
# ----------------------------------------------------------------------------

def _layer_norm(x, g, b, eps=1e-5):
    mu = jnp.mean(x, axis=-1, keepdims=True)
    var = jnp.mean((x - mu) ** 2, axis=-1, keepdims=True)
    return (x - mu) * jax.lax.rsqrt(var + eps) * g + b


def _gelu(x):
    # tanh-approx GELU.  # TODO(synk): erf-exact GELU if Mosaic erf is available.
    return 0.5 * x * (1.0 + jnp.tanh(0.7978845608028654 * (x + 0.044715 * x * x * x)))


def _mha(q, k, v, *, B, Lq, Lk, H, dh, causal):
    """Multi-head attention batched over all (batch, head) pairs.

    q: (B*Lq, H*dh), k/v: (B*Lk, H*dh). Head split/merge is done with cheap
    static slices + concats; the score and PV matmuls are single leading-batch
    dot_generals over B*H, followed by one softmax. Returns (B*Lq, H*dh)."""
    scale = 1.0 / math.sqrt(dh)
    q3 = jnp.stack([q[b * Lq:(b + 1) * Lq, h * dh:(h + 1) * dh]
                    for b in range(B) for h in range(H)], axis=0)      # (B*H, Lq, dh)
    k3 = jnp.stack([k[b * Lk:(b + 1) * Lk, h * dh:(h + 1) * dh]
                    for b in range(B) for h in range(H)], axis=0)      # (B*H, Lk, dh)
    v3 = jnp.stack([v[b * Lk:(b + 1) * Lk, h * dh:(h + 1) * dh]
                    for b in range(B) for h in range(H)], axis=0)      # (B*H, Lk, dh)

    s = jnp.einsum('bqd,bkd->bqk', q3, k3,
                   preferred_element_type=jnp.float32) * scale         # (B*H, Lq, Lk)
    if causal:
        rows = jax.lax.broadcasted_iota(jnp.int32, s.shape, 1)
        cols = jax.lax.broadcasted_iota(jnp.int32, s.shape, 2)
        s = jnp.where(cols > rows, jnp.float32(-1e30), s)
    m = jnp.max(s, axis=-1, keepdims=True)
    p = jnp.exp(s - m)
    p = p / jnp.sum(p, axis=-1, keepdims=True)          # exact softmax normalization
    o3 = jnp.einsum('bqk,bkd->bqd', p, v3,
                    preferred_element_type=jnp.float32)                # (B*H, Lq, dh)

    outs = [jnp.concatenate([o3[b * H + h] for h in range(H)], axis=-1)   # (Lq, D)
            for b in range(B)]
    return jnp.concatenate(outs, axis=0) if B > 1 else outs[0]         # (B*Lq, D)


# ----------------------------------------------------------------------------
# The single fused kernel (grid=(), everything VMEM-resident)
# ----------------------------------------------------------------------------

def fused_forward_kernel(*refs, B, Le, Ld, H, dh, e_layers, d_layers, pred_len):
    o_ref = refs[-1]
    it = iter(refs[:-1])

    def rd():
        return next(it)[...].astype(jnp.float32)

    D = H * dh

    # --- DataEmbedding (enc & dec): circular conv as matmul + timeF linear + PE ---
    xe_cat, xm_e, pe_e = rd(), rd(), rd()
    xd_cat, xm_d, pe_d = rd(), rd(), rd()
    e_cw, e_tw, d_cw, d_tw = rd(), rd(), rd(), rd()

    enc = (jnp.dot(xe_cat, e_cw, preferred_element_type=jnp.float32)
           + jnp.dot(xm_e, e_tw, preferred_element_type=jnp.float32) + pe_e)
    dec = (jnp.dot(xd_cat, d_cw, preferred_element_type=jnp.float32)
           + jnp.dot(xm_d, d_tw, preferred_element_type=jnp.float32) + pe_d)
    # dropout = identity (eval)

    # --- Encoder layers ---
    for _ in range(e_layers):
        wqkv, bqkv, wo, bo = rd(), rd(), rd(), rd()
        g1, be1 = rd(), rd()
        w1, bf1, w2, bf2 = rd(), rd(), rd(), rd()
        g2, be2 = rd(), rd()

        qkv = jnp.dot(enc, wqkv, preferred_element_type=jnp.float32) + bqkv
        a = _mha(qkv[:, :D], qkv[:, D:2 * D], qkv[:, 2 * D:],
                 B=B, Lq=Le, Lk=Le, H=H, dh=dh, causal=False)
        a = jnp.dot(a, wo, preferred_element_type=jnp.float32) + bo
        x1 = _layer_norm(enc + a, g1, be1)
        hdn = _gelu(jnp.dot(x1, w1, preferred_element_type=jnp.float32) + bf1)
        y = jnp.dot(hdn, w2, preferred_element_type=jnp.float32) + bf2
        enc = _layer_norm(x1 + y, g2, be2)

    # encoder final LayerNorm
    eng, enb = rd(), rd()
    enc = _layer_norm(enc, eng, enb)

    # --- Decoder layers ---
    for _ in range(d_layers):
        s_wqkv, s_bqkv, s_wo, s_bo = rd(), rd(), rd(), rd()
        c_wq, c_bq, c_wkv, c_bkv, c_wo, c_bo = rd(), rd(), rd(), rd(), rd(), rd()
        g1, be1, g2, be2, g3, be3 = rd(), rd(), rd(), rd(), rd(), rd()
        w1, bf1, w2, bf2 = rd(), rd(), rd(), rd()

        # masked (causal) self-attention
        qkv = jnp.dot(dec, s_wqkv, preferred_element_type=jnp.float32) + s_bqkv
        a = _mha(qkv[:, :D], qkv[:, D:2 * D], qkv[:, 2 * D:],
                 B=B, Lq=Ld, Lk=Ld, H=H, dh=dh, causal=True)
        a = jnp.dot(a, s_wo, preferred_element_type=jnp.float32) + s_bo
        x1 = _layer_norm(dec + a, g1, be1)

        # cross attention (no mask)
        qc = jnp.dot(x1, c_wq, preferred_element_type=jnp.float32) + c_bq
        kv = jnp.dot(enc, c_wkv, preferred_element_type=jnp.float32) + c_bkv
        a2 = _mha(qc, kv[:, :D], kv[:, D:],
                  B=B, Lq=Ld, Lk=Le, H=H, dh=dh, causal=False)
        a2 = jnp.dot(a2, c_wo, preferred_element_type=jnp.float32) + c_bo
        x2 = _layer_norm(x1 + a2, g2, be2)

        # position-wise FFN
        hdn = _gelu(jnp.dot(x2, w1, preferred_element_type=jnp.float32) + bf1)
        y = jnp.dot(hdn, w2, preferred_element_type=jnp.float32) + bf2
        dec = _layer_norm(x2 + y, g3, be3)

    # --- Final norm + projection, only on the last pred_len rows per batch ---
    dng, dnb, pw, pb = rd(), rd(), rd(), rd()
    tails = [dec[b_ * Ld + Ld - pred_len: b_ * Ld + Ld, :] for b_ in range(B)]
    xp = jnp.concatenate(tails, axis=0) if B > 1 else tails[0]     # (B*pred_len, D)
    xp = _layer_norm(xp, dng, dnb)
    o_ref[...] = (jnp.dot(xp, pw, preferred_element_type=jnp.float32) + pb
                  ).astype(o_ref.dtype)


# ----------------------------------------------------------------------------
# Forward pass wrapper: one pallas_call for the whole model
# ----------------------------------------------------------------------------

def positional_encoding(max_len, d_model):
    position = jnp.arange(max_len, dtype=jnp.float32)[:, None]
    div_term = jnp.exp(jnp.arange(0, d_model, 2, dtype=jnp.float32)
                       * (-math.log(10000.0) / d_model))
    pe = jnp.zeros((max_len, d_model), jnp.float32)
    pe = pe.at[:, 0::2].set(jnp.sin(position * div_term))
    pe = pe.at[:, 1::2].set(jnp.cos(position * div_term))
    return pe


def transformer_forecast(params, x_enc, x_mark_enc, x_dec, x_mark_dec,
                         *, n_heads, pred_len):
    B, Le, Ce = x_enc.shape
    Ld, Cd = x_dec.shape[1], x_dec.shape[2]
    D = params['proj_w'].shape[0]
    c_out = params['proj_w'].shape[1]
    pe = params['pe']

    def circ_cat(x):
        # circular padding=1, kernel=3 -> stack [x_{t-1}, x_t, x_{t+1}] on features
        # (tiny XLA layout op outside the kernel; < 1 KB of HBM traffic)
        return jnp.concatenate(
            [jnp.roll(x, 1, axis=1), x, jnp.roll(x, -1, axis=1)], axis=-1)

    xe_cat = circ_cat(x_enc).reshape(B * Le, 3 * Ce)
    xd_cat = circ_cat(x_dec).reshape(B * Ld, 3 * Cd)
    xm_e = x_mark_enc.reshape(B * Le, -1)
    xm_d = x_mark_dec.reshape(B * Ld, -1)
    pe_e = jnp.tile(pe[:Le], (B, 1))                  # pre-tiled once, no in-kernel concat
    pe_d = jnp.tile(pe[:Ld], (B, 1))

    flat = [xe_cat, xm_e, pe_e, xd_cat, xm_d, pe_d,
            params['enc_emb']['conv_w'], params['enc_emb']['time_w'],
            params['dec_emb']['conv_w'], params['dec_emb']['time_w']]
    for p in params['enc_layers']:
        flat += [p['wqkv'], p['bqkv'], p['wo'], p['bo'],
                 p['ln1_g'], p['ln1_b'], p['w1'], p['b1'], p['w2'], p['b2'],
                 p['ln2_g'], p['ln2_b']]
    flat += [params['enc_norm_g'], params['enc_norm_b']]
    for p in params['dec_layers']:
        sa, ca = p['self_attn'], p['cross_attn']
        flat += [sa['wqkv'], sa['bqkv'], sa['wo'], sa['bo'],
                 ca['wq'], ca['bq'], ca['wkv'], ca['bkv'], ca['wo'], ca['bo'],
                 p['ln1_g'], p['ln1_b'], p['ln2_g'], p['ln2_b'],
                 p['ln3_g'], p['ln3_b'],
                 p['w1'], p['b1'], p['w2'], p['b2']]
    flat += [params['dec_norm_g'], params['dec_norm_b'],
             params['proj_w'], params['proj_b']]

    out = pl.pallas_call(
        partial(fused_forward_kernel, B=B, Le=Le, Ld=Ld,
                H=n_heads, dh=D // n_heads,
                e_layers=len(params['enc_layers']),
                d_layers=len(params['dec_layers']),
                pred_len=pred_len),
        out_shape=jax.ShapeDtypeStruct((B * pred_len, c_out), x_enc.dtype),
    )(*flat)
    return out.reshape(B, pred_len, c_out)


# ----------------------------------------------------------------------------
# Deterministic parameter init (weights pre-fused: Wq|Wk|Wv and Wk|Wv)
# ----------------------------------------------------------------------------

def init_params(key, enc_in, dec_in, c_out, d_model, d_ff,
                e_layers, d_layers, mark_dim, max_len=64):
    keys = iter(jax.random.split(key, 512))

    def w(shape, scale=0.05):
        return scale * jax.random.normal(next(keys), shape, jnp.float32)

    def zeros(n):
        return jnp.zeros((1, n), jnp.float32)

    def ln():
        return jnp.ones((1, d_model), jnp.float32), jnp.zeros((1, d_model), jnp.float32)

    def self_attn_p():
        wq, wk, wv = (w((d_model, d_model)) for _ in range(3))
        return dict(wqkv=jnp.concatenate([wq, wk, wv], axis=1),
                    bqkv=zeros(3 * d_model),
                    wo=w((d_model, d_model)), bo=zeros(d_model))

    def cross_attn_p():
        wq, wk, wv = (w((d_model, d_model)) for _ in range(3))
        return dict(wq=wq, bq=zeros(d_model),
                    wkv=jnp.concatenate([wk, wv], axis=1), bkv=zeros(2 * d_model),
                    wo=w((d_model, d_model)), bo=zeros(d_model))

    enc_layers = []
    for _ in range(e_layers):
        g1, b1 = ln(); g2, b2 = ln()
        sa = self_attn_p()
        enc_layers.append(dict(
            wqkv=sa['wqkv'], bqkv=sa['bqkv'], wo=sa['wo'], bo=sa['bo'],
            ln1_g=g1, ln1_b=b1, ln2_g=g2, ln2_b=b2,
            w1=w((d_model, d_ff)), b1=zeros(d_ff),
            w2=w((d_ff, d_model)), b2=zeros(d_model)))

    dec_layers = []
    for _ in range(d_layers):
        g1, b1 = ln(); g2, b2 = ln(); g3, b3 = ln()
        dec_layers.append(dict(
            self_attn=self_attn_p(), cross_attn=cross_attn_p(),
            ln1_g=g1, ln1_b=b1, ln2_g=g2, ln2_b=b2, ln3_g=g3, ln3_b=b3,
            w1=w((d_model, d_ff)), b1=zeros(d_ff),
            w2=w((d_ff, d_model)), b2=zeros(d_model)))

    eng, enb = ln()
    dng, dnb = ln()
    # TODO(synk): when loading a real PyTorch checkpoint, Conv1d weight (D, C, 3)
    # must be permuted to the (3*C, D) layout used for [x_{t-1}, x_t, x_{t+1}].
    return dict(
        pe=positional_encoding(max_len, d_model),
        enc_emb=dict(conv_w=w((3, enc_in, d_model)).reshape(3 * enc_in, d_model),
                     time_w=w((mark_dim, d_model))),
        dec_emb=dict(conv_w=w((3, dec_in, d_model)).reshape(3 * dec_in, d_model),
                     time_w=w((mark_dim, d_model))),
        enc_layers=enc_layers, dec_layers=dec_layers,
        enc_norm_g=eng, enc_norm_b=enb,
        dec_norm_g=dng, dec_norm_b=dnb,
        proj_w=w((d_model, c_out)), proj_b=jnp.zeros((1, c_out), jnp.float32))


# ----------------------------------------------------------------------------
# Main
# ----------------------------------------------------------------------------

if __name__ == "__main__":
    # configs: task_name='long_term_forecast', seq_len=8, label_len=4, pred_len=4,
    # enc_in=dec_in=c_out=4, d_model=32, n_heads=4, d_ff=32, e_layers=2, d_layers=1,
    # embed='timeF', freq='h' (4 time features), dropout (eval -> identity), gelu.
    B, seq_len, label_len, pred_len = 2, 8, 4, 4
    enc_in = dec_in = c_out = 4
    d_model, n_heads, d_ff = 32, 4, 32
    e_layers, d_layers = 2, 1
    mark_dim = 4

    key = jax.random.PRNGKey(0)
    k0, k1, k2, k3, kp = jax.random.split(key, 5)
    x_enc = jax.random.normal(k0, (B, seq_len, enc_in), jnp.float32)
    x_mark_enc = jax.random.normal(k1, (B, seq_len, mark_dim), jnp.float32)
    x_dec = jax.random.normal(k2, (B, label_len + pred_len, dec_in), jnp.float32)
    x_mark_dec = jax.random.normal(k3, (B, label_len + pred_len, mark_dim), jnp.float32)

    params = init_params(kp, enc_in, dec_in, c_out, d_model, d_ff,
                         e_layers, d_layers, mark_dim)

    fwd = jax.jit(partial(transformer_forecast, n_heads=n_heads, pred_len=pred_len))
    out = fwd(params, x_enc, x_mark_enc, x_dec, x_mark_dec)
    out = jax.block_until_ready(out)
    assert out.shape == (B, pred_len, c_out), out.shape
    assert bool(jnp.all(jnp.isfinite(out)))
    print("KERNEL_OK")
</pallas_src>

<mosaic_0001>
module attributes {stable_mosaic.version = 11 : i64} {
  func.func @fused_forward_kernel(%arg0: memref<16x12xf32, #tpu.memory_space<vmem>>, %arg1: memref<16x4xf32, #tpu.memory_space<vmem>>, %arg2: memref<16x32xf32, #tpu.memory_space<vmem>>, %arg3: memref<16x12xf32, #tpu.memory_space<vmem>>, %arg4: memref<16x4xf32, #tpu.memory_space<vmem>>, %arg5: memref<16x32xf32, #tpu.memory_space<vmem>>, %arg6: memref<12x32xf32, #tpu.memory_space<vmem>>, %arg7: memref<4x32xf32, #tpu.memory_space<vmem>>, %arg8: memref<12x32xf32, #tpu.memory_space<vmem>>, %arg9: memref<4x32xf32, #tpu.memory_space<vmem>>, %arg10: memref<32x96xf32, #tpu.memory_space<vmem>>, %arg11: memref<1x96xf32, #tpu.memory_space<vmem>>, %arg12: memref<32x32xf32, #tpu.memory_space<vmem>>, %arg13: memref<1x32xf32, #tpu.memory_space<vmem>>, %arg14: memref<1x32xf32, #tpu.memory_space<vmem>>, %arg15: memref<1x32xf32, #tpu.memory_space<vmem>>, %arg16: memref<32x32xf32, #tpu.memory_space<vmem>>, %arg17: memref<1x32xf32, #tpu.memory_space<vmem>>, %arg18: memref<32x32xf32, #tpu.memory_space<vmem>>, %arg19: memref<1x32xf32, #tpu.memory_space<vmem>>, %arg20: memref<1x32xf32, #tpu.memory_space<vmem>>, %arg21: memref<1x32xf32, #tpu.memory_space<vmem>>, %arg22: memref<32x96xf32, #tpu.memory_space<vmem>>, %arg23: memref<1x96xf32, #tpu.memory_space<vmem>>, %arg24: memref<32x32xf32, #tpu.memory_space<vmem>>, %arg25: memref<1x32xf32, #tpu.memory_space<vmem>>, %arg26: memref<1x32xf32, #tpu.memory_space<vmem>>, %arg27: memref<1x32xf32, #tpu.memory_space<vmem>>, %arg28: memref<32x32xf32, #tpu.memory_space<vmem>>, %arg29: memref<1x32xf32, #tpu.memory_space<vmem>>, %arg30: memref<32x32xf32, #tpu.memory_space<vmem>>, %arg31: memref<1x32xf32, #tpu.memory_space<vmem>>, %arg32: memref<1x32xf32, #tpu.memory_space<vmem>>, %arg33: memref<1x32xf32, #tpu.memory_space<vmem>>, %arg34: memref<1x32xf32, #tpu.memory_space<vmem>>, %arg35: memref<1x32xf32, #tpu.memory_space<vmem>>, %arg36: memref<32x96xf32, #tpu.memory_space<vmem>>, %arg37: memref<1x96xf32, #tpu.memory_space<vmem>>, %arg38: memref<32x32xf32, #tpu.memory_space<vmem>>, %arg39: memref<1x32xf32, #tpu.memory_space<vmem>>, %arg40: memref<32x32xf32, #tpu.memory_space<vmem>>, %arg41: memref<1x32xf32, #tpu.memory_space<vmem>>, %arg42: memref<32x64xf32, #tpu.memory_space<vmem>>, %arg43: memref<1x64xf32, #tpu.memory_space<vmem>>, %arg44: memref<32x32xf32, #tpu.memory_space<vmem>>, %arg45: memref<1x32xf32, #tpu.memory_space<vmem>>, %arg46: memref<1x32xf32, #tpu.memory_space<vmem>>, %arg47: memref<1x32xf32, #tpu.memory_space<vmem>>, %arg48: memref<1x32xf32, #tpu.memory_space<vmem>>, %arg49: memref<1x32xf32, #tpu.memory_space<vmem>>, %arg50: memref<1x32xf32, #tpu.memory_space<vmem>>, %arg51: memref<1x32xf32, #tpu.memory_space<vmem>>, %arg52: memref<32x32xf32, #tpu.memory_space<vmem>>, %arg53: memref<1x32xf32, #tpu.memory_space<vmem>>, %arg54: memref<32x32xf32, #tpu.memory_space<vmem>>, %arg55: memref<1x32xf32, #tpu.memory_space<vmem>>, %arg56: memref<1x32xf32, #tpu.memory_space<vmem>>, %arg57: memref<1x32xf32, #tpu.memory_space<vmem>>, %arg58: memref<32x4xf32, #tpu.memory_space<vmem>>, %arg59: memref<1x4xf32, #tpu.memory_space<vmem>>, %arg60: memref<8x4xf32, #tpu.memory_space<vmem>>) attributes {dimension_semantics = [], scalar_prefetch = 0 : i64, scratch_operands = 0 : i64, tpu.core_type = #tpu.core_type<tc>} {
    %c0 = arith.constant 0 : index
    %c0_0 = arith.constant 0 : index
    %0 = vector.load %arg0[%c0, %c0_0] : memref<16x12xf32, #tpu.memory_space<vmem>>, vector<16x12xf32>
    %c0_1 = arith.constant 0 : index
    %c0_2 = arith.constant 0 : index
    %1 = vector.load %arg1[%c0_1, %c0_2] : memref<16x4xf32, #tpu.memory_space<vmem>>, vector<16x4xf32>
    %c0_3 = arith.constant 0 : index
    %c0_4 = arith.constant 0 : index
    %2 = vector.load %arg2[%c0_3, %c0_4] : memref<16x32xf32, #tpu.memory_space<vmem>>, vector<16x32xf32>
    %c0_5 = arith.constant 0 : index
    %c0_6 = arith.constant 0 : index
    %3 = vector.load %arg3[%c0_5, %c0_6] : memref<16x12xf32, #tpu.memory_space<vmem>>, vector<16x12xf32>
    %c0_7 = arith.constant 0 : index
    %c0_8 = arith.constant 0 : index
    %4 = vector.load %arg4[%c0_7, %c0_8] : memref<16x4xf32, #tpu.memory_space<vmem>>, vector<16x4xf32>
    %c0_9 = arith.constant 0 : index
    %c0_10 = arith.constant 0 : index
    %5 = vector.load %arg5[%c0_9, %c0_10] : memref<16x32xf32, #tpu.memory_space<vmem>>, vector<16x32xf32>
    %c0_11 = arith.constant 0 : index
    %c0_12 = arith.constant 0 : index
    %6 = vector.load %arg6[%c0_11, %c0_12] : memref<12x32xf32, #tpu.memory_space<vmem>>, vector<12x32xf32>
    %c0_13 = arith.constant 0 : index
    %c0_14 = arith.constant 0 : index
    %7 = vector.load %arg7[%c0_13, %c0_14] : memref<4x32xf32, #tpu.memory_space<vmem>>, vector<4x32xf32>
    %c0_15 = arith.constant 0 : index
    %c0_16 = arith.constant 0 : index
    %8 = vector.load %arg8[%c0_15, %c0_16] : memref<12x32xf32, #tpu.memory_space<vmem>>, vector<12x32xf32>
    %c0_17 = arith.constant 0 : index
    %c0_18 = arith.constant 0 : index
    %9 = vector.load %arg9[%c0_17, %c0_18] : memref<4x32xf32, #tpu.memory_space<vmem>>, vector<4x32xf32>
    %cst = arith.constant dense<0.000000e+00> : vector<16x32xf32>
    %10 = tpu.matmul %0, %6, %cst {dimension_numbers = #tpu.dot_dimension_numbers<[1], [0], [0], [1], [0, 0, 1, 1], [], []>} : vector<16x12xf32>, vector<12x32xf32>, vector<16x32xf32> -> vector<16x32xf32>
    %cst_19 = arith.constant dense<0.000000e+00> : vector<16x32xf32>
    %11 = tpu.matmul %1, %7, %cst_19 {dimension_numbers = #tpu.dot_dimension_numbers<[1], [0], [0], [1], [0, 0, 1, 1], [], []>} : vector<16x4xf32>, vector<4x32xf32>, vector<16x32xf32> -> vector<16x32xf32>
    %12 = arith.addf %10, %11 : vector<16x32xf32>
    %13 = arith.addf %12, %2 : vector<16x32xf32>
    %cst_20 = arith.constant dense<0.000000e+00> : vector<16x32xf32>
    %14 = tpu.matmul %3, %8, %cst_20 {dimension_numbers = #tpu.dot_dimension_numbers<[1], [0], [0], [1], [0, 0, 1, 1], [], []>} : vector<16x12xf32>, vector<12x32xf32>, vector<16x32xf32> -> vector<16x32xf32>
    %cst_21 = arith.constant dense<0.000000e+00> : vector<16x32xf32>
    %15 = tpu.matmul %4, %9, %cst_21 {dimension_numbers = #tpu.dot_dimension_numbers<[1], [0], [0], [1], [0, 0, 1, 1], [], []>} : vector<16x4xf32>, vector<4x32xf32>, vector<16x32xf32> -> vector<16x32xf32>
    %16 = arith.addf %14, %15 : vector<16x32xf32>
    %17 = arith.addf %16, %5 : vector<16x32xf32>
    %c0_22 = arith.constant 0 : index
    %c0_23 = arith.constant 0 : index
    %18 = vector.load %arg10[%c0_22, %c0_23] : memref<32x96xf32, #tpu.memory_space<vmem>>, vector<32x96xf32>
    %c0_24 = arith.constant 0 : index
    %c0_25 = arith.constant 0 : index
    %19 = vector.load %arg11[%c0_24, %c0_25] : memref<1x96xf32, #tpu.memory_space<vmem>>, vector<1x96xf32>
    %c0_26 = arith.constant 0 : index
    %c0_27 = arith.constant 0 : index
    %20 = vector.load %arg12[%c0_26, %c0_27] : memref<32x32xf32, #tpu.memory_space<vmem>>, vector<32x32xf32>
    %c0_28 = arith.constant 0 : index
    %c0_29 = arith.constant 0 : index
    %21 = vector.load %arg13[%c0_28, %c0_29] : memref<1x32xf32, #tpu.memory_space<vmem>>, vector<1x32xf32>
    %c0_30 = arith.constant 0 : index
    %c0_31 = arith.constant 0 : index
    %22 = vector.load %arg14[%c0_30, %c0_31] : memref<1x32xf32, #tpu.memory_space<vmem>>, vector<1x32xf32>
    %c0_32 = arith.constant 0 : index
    %c0_33 = arith.constant 0 : index
    %23 = vector.load %arg15[%c0_32, %c0_33] : memref<1x32xf32, #tpu.memory_space<vmem>>, vector<1x32xf32>
    %c0_34 = arith.constant 0 : index
    %c0_35 = arith.constant 0 : index
    %24 = vector.load %arg16[%c0_34, %c0_35] : memref<32x32xf32, #tpu.memory_space<vmem>>, vector<32x32xf32>
    %c0_36 = arith.constant 0 : index
    %c0_37 = arith.constant 0 : index
    %25 = vector.load %arg17[%c0_36, %c0_37] : memref<1x32xf32, #tpu.memory_space<vmem>>, vector<1x32xf32>
    %c0_38 = arith.constant 0 : index
    %c0_39 = arith.constant 0 : index
    %26 = vector.load %arg18[%c0_38, %c0_39] : memref<32x32xf32, #tpu.memory_space<vmem>>, vector<32x32xf32>
    %c0_40 = arith.constant 0 : index
    %c0_41 = arith.constant 0 : index
    %27 = vector.load %arg19[%c0_40, %c0_41] : memref<1x32xf32, #tpu.memory_space<vmem>>, vector<1x32xf32>
    %c0_42 = arith.constant 0 : index
    %c0_43 = arith.constant 0 : index
    %28 = vector.load %arg20[%c0_42, %c0_43] : memref<1x32xf32, #tpu.memory_space<vmem>>, vector<1x32xf32>
    %c0_44 = arith.constant 0 : index
    %c0_45 = arith.constant 0 : index
    %29 = vector.load %arg21[%c0_44, %c0_45] : memref<1x32xf32, #tpu.memory_space<vmem>>, vector<1x32xf32>
    %cst_46 = arith.constant dense<0.000000e+00> : vector<16x96xf32>
    %30 = tpu.matmul %13, %18, %cst_46 {dimension_numbers = #tpu.dot_dimension_numbers<[1], [0], [0], [1], [0, 0, 1, 1], [], []>} : vector<16x32xf32>, vector<32x96xf32>, vector<16x96xf32> -> vector<16x96xf32>
    %31 = vector.broadcast %19 : vector<1x96xf32> to vector<16x96xf32>
    %32 = arith.addf %30, %31 : vector<16x96xf32>
    %33 = vector.extract_strided_slice %32 {offsets = [0, 0], sizes = [16, 32], strides = [1, 1]} : vector<16x96xf32> to vector<16x32xf32>
    %34 = vector.extract_strided_slice %32 {offsets = [0, 32], sizes = [16, 32], strides = [1, 1]} : vector<16x96xf32> to vector<16x32xf32>
    %35 = vector.extract_strided_slice %32 {offsets = [0, 64], sizes = [16, 32], strides = [1, 1]} : vector<16x96xf32> to vector<16x32xf32>
    %36 = vector.extract_strided_slice %33 {offsets = [0, 0], sizes = [8, 8], strides = [1, 1]} : vector<16x32xf32> to vector<8x8xf32>
    %37 = vector.extract_strided_slice %33 {offsets = [0, 8], sizes = [8, 8], strides = [1, 1]} : vector<16x32xf32> to vector<8x8xf32>
    %38 = vector.extract_strided_slice %33 {offsets = [0, 16], sizes = [8, 8], strides = [1, 1]} : vector<16x32xf32> to vector<8x8xf32>
    %39 = vector.extract_strided_slice %33 {offsets = [0, 24], sizes = [8, 8], strides = [1, 1]} : vector<16x32xf32> to vector<8x8xf32>
    %40 = vector.extract_strided_slice %33 {offsets = [8, 0], sizes = [8, 8], strides = [1, 1]} : vector<16x32xf32> to vector<8x8xf32>
    %41 = vector.extract_strided_slice %33 {offsets = [8, 8], sizes = [8, 8], strides = [1, 1]} : vector<16x32xf32> to vector<8x8xf32>
    %42 = vector.extract_strided_slice %33 {offsets = [8, 16], sizes = [8, 8], strides = [1, 1]} : vector<16x32xf32> to vector<8x8xf32>
    %43 = vector.extract_strided_slice %33 {offsets = [8, 24], sizes = [8, 8], strides = [1, 1]} : vector<16x32xf32> to vector<8x8xf32>
    %44 = vector.shape_cast %36 : vector<8x8xf32> to vector<1x8x8xf32>
    %45 = vector.shape_cast %37 : vector<8x8xf32> to vector<1x8x8xf32>
    %46 = vector.shape_cast %38 : vector<8x8xf32> to vector<1x8x8xf32>
    %47 = vector.shape_cast %39 : vector<8x8xf32> to vector<1x8x8xf32>
    %48 = vector.shape_cast %40 : vector<8x8xf32> to vector<1x8x8xf32>
    %49 = vector.shape_cast %41 : vector<8x8xf32> to vector<1x8x8xf32>
    %50 = vector.shape_cast %42 : vector<8x8xf32> to vector<1x8x8xf32>
    %51 = vector.shape_cast %43 : vector<8x8xf32> to vector<1x8x8xf32>
    %52 = tpu.concatenate %44, %45, %46, %47, %48, %49, %50, %51 in 0 : vector<1x8x8xf32>, vector<1x8x8xf32>, vector<1x8x8xf32>, vector<1x8x8xf32>, vector<1x8x8xf32>, vector<1x8x8xf32>, vector<1x8x8xf32>, vector<1x8x8xf32> -> vector<8x8x8xf32>
    %53 = vector.extract_strided_slice %34 {offsets = [0, 0], sizes = [8, 8], strides = [1, 1]} : vector<16x32xf32> to vector<8x8xf32>
    %54 = vector.extract_strided_slice %34 {offsets = [0, 8], sizes = [8, 8], strides = [1, 1]} : vector<16x32xf32> to vector<8x8xf32>
    %55 = vector.extract_strided_slice %34 {offsets = [0, 16], sizes = [8, 8], strides = [1, 1]} : vector<16x32xf32> to vector<8x8xf32>
    %56 = vector.extract_strided_slice %34 {offsets = [0, 24], sizes = [8, 8], strides = [1, 1]} : vector<16x32xf32> to vector<8x8xf32>
    %57 = vector.extract_strided_slice %34 {offsets = [8, 0], sizes = [8, 8], strides = [1, 1]} : vector<16x32xf32> to vector<8x8xf32>
    %58 = vector.extract_strided_slice %34 {offsets = [8, 8], sizes = [8, 8], strides = [1, 1]} : vector<16x32xf32> to vector<8x8xf32>
    %59 = vector.extract_strided_slice %34 {offsets = [8, 16], sizes = [8, 8], strides = [1, 1]} : vector<16x32xf32> to vector<8x8xf32>
    %60 = vector.extract_strided_slice %34 {offsets = [8, 24], sizes = [8, 8], strides = [1, 1]} : vector<16x32xf32> to vector<8x8xf32>
    %61 = vector.shape_cast %53 : vector<8x8xf32> to vector<1x8x8xf32>
    %62 = vector.shape_cast %54 : vector<8x8xf32> to vector<1x8x8xf32>
    %63 = vector.shape_cast %55 : vector<8x8xf32> to vector<1x8x8xf32>
    %64 = vector.shape_cast %56 : vector<8x8xf32> to vector<1x8x8xf32>
    %65 = vector.shape_cast %57 : vector<8x8xf32> to vector<1x8x8xf32>
    %66 = vector.shape_cast %58 : vector<8x8xf32> to vector<1x8x8xf32>
    %67 = vector.shape_cast %59 : vector<8x8xf32> to vector<1x8x8xf32>
    %68 = vector.shape_cast %60 : vector<8x8xf32> to vector<1x8x8xf32>
    %69 = tpu.concatenate %61, %62, %63, %64, %65, %66, %67, %68 in 0 : vector<1x8x8xf32>, vector<1x8x8xf32>, vector<1x8x8xf32>, vector<1x8x8xf32>, vector<1x8x8xf32>, vector<1x8x8xf32>, vector<1x8x8xf32>, vector<1x8x8xf32> -> vector<8x8x8xf32>
    %70 = vector.extract_strided_slice %35 {offsets = [0, 0], sizes = [8, 8], strides = [1, 1]} : vector<16x32xf32> to vector<8x8xf32>
    %71 = vector.extract_strided_slice %35 {offsets = [0, 8], sizes = [8, 8], strides = [1, 1]} : vector<16x32xf32> to vector<8x8xf32>
    %72 = vector.extract_strided_slice %35 {offsets = [0, 16], sizes = [8, 8], strides = [1, 1]} : vector<16x32xf32> to vector<8x8xf32>
    %73 = vector.extract_strided_slice %35 {offsets = [0, 24], sizes = [8, 8], strides = [1, 1]} : vector<16x32xf32> to vector<8x8xf32>
    %74 = vector.extract_strided_slice %35 {offsets = [8, 0], sizes = [8, 8], strides = [1, 1]} : vector<16x32xf32> to vector<8x8xf32>
    %75 = vector.extract_strided_slice %35 {offsets = [8, 8], sizes = [8, 8], strides = [1, 1]} : vector<16x32xf32> to vector<8x8xf32>
    %76 = vector.extract_strided_slice %35 {offsets = [8, 16], sizes = [8, 8], strides = [1, 1]} : vector<16x32xf32> to vector<8x8xf32>
    %77 = vector.extract_strided_slice %35 {offsets = [8, 24], sizes = [8, 8], strides = [1, 1]} : vector<16x32xf32> to vector<8x8xf32>
    %78 = vector.shape_cast %70 : vector<8x8xf32> to vector<1x8x8xf32>
    %79 = vector.shape_cast %71 : vector<8x8xf32> to vector<1x8x8xf32>
    %80 = vector.shape_cast %72 : vector<8x8xf32> to vector<1x8x8xf32>
    %81 = vector.shape_cast %73 : vector<8x8xf32> to vector<1x8x8xf32>
    %82 = vector.shape_cast %74 : vector<8x8xf32> to vector<1x8x8xf32>
    %83 = vector.shape_cast %75 : vector<8x8xf32> to vector<1x8x8xf32>
    %84 = vector.shape_cast %76 : vector<8x8xf32> to vector<1x8x8xf32>
    %85 = vector.shape_cast %77 : vector<8x8xf32> to vector<1x8x8xf32>
    %86 = tpu.concatenate %78, %79, %80, %81, %82, %83, %84, %85 in 0 : vector<1x8x8xf32>, vector<1x8x8xf32>, vector<1x8x8xf32>, vector<1x8x8xf32>, vector<1x8x8xf32>, vector<1x8x8xf32>, vector<1x8x8xf32>, vector<1x8x8xf32> -> vector<8x8x8xf32>
    "tpu.trace_start"() <{level = 10 : i32, message = "bqd,bkd->bqk"}> : () -> ()
    %cst_47 = arith.constant dense<0.000000e+00> : vector<8x8x8xf32>
    %87 = tpu.matmul %52, %69, %cst_47 {dimension_numbers = #tpu.dot_dimension_numbers<[2], [2], [1], [1], [0, 0, 0, 1, 1, 1], [0], [0]>} : vector<8x8x8xf32>, vector<8x8x8xf32>, vector<8x8x8xf32> -> vector<8x8x8xf32>
    "tpu.trace_stop"() : () -> ()
    %cst_48 = arith.constant 0.353553385 : f32
    %88 = vector.broadcast %cst_48 : f32 to vector<8x8x8xf32>
    %89 = arith.mulf %87, %88 : vector<8x8x8xf32>
    %cst_49 = arith.constant dense<0xFF800000> : vector<8x8xf32>
    %90 = vector.multi_reduction <maximumf>, %89, %cst_49 [2] : vector<8x8x8xf32> to vector<8x8xf32>
    %91 = vector.shape_cast %90 : vector<8x8xf32> to vector<8x8x1xf32>
    %92 = vector.broadcast %91 : vector<8x8x1xf32> to vector<8x8x8xf32>
    %93 = arith.subf %89, %92 : vector<8x8x8xf32>
    %94 = math.exp %93 : vector<8x8x8xf32>
    %cst_50 = arith.constant dense<0.000000e+00> : vector<8x8xf32>
    %95 = vector.multi_reduction <add>, %94, %cst_50 [2] : vector<8x8x8xf32> to vector<8x8xf32>
    %96 = vector.shape_cast %95 : vector<8x8xf32> to vector<8x8x1xf32>
    %97 = vector.broadcast %96 : vector<8x8x1xf32> to vector<8x8x8xf32>
    %98 = arith.divf %94, %97 : vector<8x8x8xf32>
    "tpu.trace_start"() <{level = 10 : i32, message = "bqk,bkd->bqd"}> : () -> ()
    %cst_51 = arith.constant dense<0.000000e+00> : vector<8x8x8xf32>
    %99 = tpu.matmul %98, %86, %cst_51 {dimension_numbers = #tpu.dot_dimension_numbers<[2], [1], [1], [2], [0, 0, 0, 1, 1, 2], [0], [0]>} : vector<8x8x8xf32>, vector<8x8x8xf32>, vector<8x8x8xf32> -> vector<8x8x8xf32>
    "tpu.trace_stop"() : () -> ()
    %100 = vector.extract_strided_slice %99 {offsets = [0, 0, 0], sizes = [1, 8, 8], strides = [1, 1, 1]} : vector<8x8x8xf32> to vector<1x8x8xf32>
    %101 = vector.shape_cast %100 : vector<1x8x8xf32> to vector<8x8xf32>
    %102 = vector.extract_strided_slice %99 {offsets = [1, 0, 0], sizes = [1, 8, 8], strides = [1, 1, 1]} : vector<8x8x8xf32> to vector<1x8x8xf32>
    %103 = vector.shape_cast %102 : vector<1x8x8xf32> to vector<8x8xf32>
    %104 = vector.extract_strided_slice %99 {offsets = [2, 0, 0], sizes = [1, 8, 8], strides = [1, 1, 1]} : vector<8x8x8xf32> to vector<1x8x8xf32>
    %105 = vector.shape_cast %104 : vector<1x8x8xf32> to vector<8x8xf32>
    %106 = vector.extract_strided_slice %99 {offsets = [3, 0, 0], sizes = [1, 8, 8], strides = [1, 1, 1]} : vector<8x8x8xf32> to vector<1x8x8xf32>
    %107 = vector.shape_cast %106 : vector<1x8x8xf32> to vector<8x8xf32>
    %108 = tpu.concatenate %101, %103, %105, %107 in 1 : vector<8x8xf32>, vector<8x8xf32>, vector<8x8xf32>, vector<8x8xf32> -> vector<8x32xf32>
    %109 = vector.extract_strided_slice %99 {offsets = [4, 0, 0], sizes = [1, 8, 8], strides = [1, 1, 1]} : vector<8x8x8xf32> to vector<1x8x8xf32>
    %110 = vector.shape_cast %109 : vector<1x8x8xf32> to vector<8x8xf32>
    %111 = vector.extract_strided_slice %99 {offsets = [5, 0, 0], sizes = [1, 8, 8], strides = [1, 1, 1]} : vector<8x8x8xf32> to vector<1x8x8xf32>
    %112 = vector.shape_cast %111 : vector<1x8x8xf32> to vector<8x8xf32>
    %113 = vector.extract_strided_slice %99 {offsets = [6, 0, 0], sizes = [1, 8, 8], strides = [1, 1, 1]} : vector<8x8x8xf32> to vector<1x8x8xf32>
    %114 = vector.shape_cast %113 : vector<1x8x8xf32> to vector<8x8xf32>
    %115 = vector.extract_strided_slice %99 {offsets = [7, 0, 0], sizes = [1, 8, 8], strides = [1, 1, 1]} : vector<8x8x8xf32> to vector<1x8x8xf32>
    %116 = vector.shape_cast %115 : vector<1x8x8xf32> to vector<8x8xf32>
    %117 = tpu.concatenate %110, %112, %114, %116 in 1 : vector<8x8xf32>, vector<8x8xf32>, vector<8x8xf32>, vector<8x8xf32> -> vector<8x32xf32>
    %118 = tpu.concatenate %108, %117 in 0 : vector<8x32xf32>, vector<8x32xf32> -> vector<16x32xf32>
    %cst_52 = arith.constant dense<0.000000e+00> : vector<16x32xf32>
    %119 = tpu.matmul %118, %20, %cst_52 {dimension_numbers = #tpu.dot_dimension_numbers<[1], [0], [0], [1], [0, 0, 1, 1], [], []>} : vector<16x32xf32>, vector<32x32xf32>, vector<16x32xf32> -> vector<16x32xf32>
    %120 = vector.broadcast %21 : vector<1x32xf32> to vector<16x32xf32>
    %121 = arith.addf %119, %120 : vector<16x32xf32>
    %122 = arith.addf %13, %121 : vector<16x32xf32>
    %cst_53 = arith.constant dense<0.000000e+00> : vector<16xf32>
    %123 = vector.multi_reduction <add>, %122, %cst_53 [1] : vector<16x32xf32> to vector<16xf32>
    %124 = vector.shape_cast %123 : vector<16xf32> to vector<16x1xf32>
    %cst_54 = arith.constant 3.200000e+01 : f32
    %125 = vector.broadcast %cst_54 : f32 to vector<16x1xf32>
    %126 = arith.divf %124, %125 : vector<16x1xf32>
    %127 = vector.broadcast %126 : vector<16x1xf32> to vector<16x32xf32>
    %128 = arith.subf %122, %127 : vector<16x32xf32>
    %129 = arith.mulf %128, %128 : vector<16x32xf32>
    %cst_55 = arith.constant dense<0.000000e+00> : vector<16xf32>
    %130 = vector.multi_reduction <add>, %129, %cst_55 [1] : vector<16x32xf32> to vector<16xf32>
    %131 = vector.shape_cast %130 : vector<16xf32> to vector<16x1xf32>
    %cst_56 = arith.constant 3.200000e+01 : f32
    %132 = vector.broadcast %cst_56 : f32 to vector<16x1xf32>
    %133 = arith.divf %131, %132 : vector<16x1xf32>
    %134 = vector.broadcast %126 : vector<16x1xf32> to vector<16x32xf32>
    %135 = arith.subf %122, %134 : vector<16x32xf32>
    %cst_57 = arith.constant 9.99999974E-6 : f32
    %136 = vector.broadcast %cst_57 : f32 to vector<16x1xf32>
    %137 = arith.addf %133, %136 : vector<16x1xf32>
    %138 = math.rsqrt %137 : vector<16x1xf32>
    %139 = vector.broadcast %138 : vector<16x1xf32> to vector<16x32xf32>
    %140 = arith.mulf %135, %139 : vector<16x32xf32>
    %141 = vector.broadcast %22 : vector<1x32xf32> to vector<16x32xf32>
    %142 = arith.mulf %140, %141 : vector<16x32xf32>
    %143 = vector.broadcast %23 : vector<1x32xf32> to vector<16x32xf32>
    %144 = arith.addf %142, %143 : vector<16x32xf32>
    %cst_58 = arith.constant dense<0.000000e+00> : vector<16x32xf32>
    %145 = tpu.matmul %144, %24, %cst_58 {dimension_numbers = #tpu.dot_dimension_numbers<[1], [0], [0], [1], [0, 0, 1, 1], [], []>} : vector<16x32xf32>, vector<32x32xf32>, vector<16x32xf32> -> vector<16x32xf32>
    %146 = vector.broadcast %25 : vector<1x32xf32> to vector<16x32xf32>
    %147 = arith.addf %145, %146 : vector<16x32xf32>
    %cst_59 = arith.constant 5.000000e-01 : f32
    %148 = vector.broadcast %cst_59 : f32 to vector<16x32xf32>
    %149 = arith.mulf %148, %147 : vector<16x32xf32>
    %cst_60 = arith.constant 4.471500e-02 : f32
    %150 = vector.broadcast %cst_60 : f32 to vector<16x32xf32>
    %151 = arith.mulf %150, %147 : vector<16x32xf32>
    %152 = arith.mulf %151, %147 : vector<16x32xf32>
    %153 = arith.mulf %152, %147 : vector<16x32xf32>
    %154 = arith.addf %147, %153 : vector<16x32xf32>
    %cst_61 = arith.constant 0.797884583 : f32
    %155 = vector.broadcast %cst_61 : f32 to vector<16x32xf32>
    %156 = arith.mulf %155, %154 : vector<16x32xf32>
    %157 = math.tanh %156 : vector<16x32xf32>
    %cst_62 = arith.constant 1.000000e+00 : f32
    %158 = vector.broadcast %cst_62 : f32 to vector<16x32xf32>
    %159 = arith.addf %158, %157 : vector<16x32xf32>
    %160 = arith.mulf %149, %159 : vector<16x32xf32>
    %cst_63 = arith.constant dense<0.000000e+00> : vector<16x32xf32>
    %161 = tpu.matmul %160, %26, %cst_63 {dimension_numbers = #tpu.dot_dimension_numbers<[1], [0], [0], [1], [0, 0, 1, 1], [], []>} : vector<16x32xf32>, vector<32x32xf32>, vector<16x32xf32> -> vector<16x32xf32>
    %162 = vector.broadcast %27 : vector<1x32xf32> to vector<16x32xf32>
    %163 = arith.addf %161, %162 : vector<16x32xf32>
    %164 = arith.addf %144, %163 : vector<16x32xf32>
    %cst_64 = arith.constant dense<0.000000e+00> : vector<16xf32>
    %165 = vector.multi_reduction <add>, %164, %cst_64 [1] : vector<16x32xf32> to vector<16xf32>
    %166 = vector.shape_cast %165 : vector<16xf32> to vector<16x1xf32>
    %cst_65 = arith.constant 3.200000e+01 : f32
    %167 = vector.broadcast %cst_65 : f32 to vector<16x1xf32>
    %168 = arith.divf %166, %167 : vector<16x1xf32>
    %169 = vector.broadcast %168 : vector<16x1xf32> to vector<16x32xf32>
    %170 = arith.subf %164, %169 : vector<16x32xf32>
    %171 = arith.mulf %170, %170 : vector<16x32xf32>
    %cst_66 = arith.constant dense<0.000000e+00> : vector<16xf32>
    %172 = vector.multi_reduction <add>, %171, %cst_66 [1] : vector<16x32xf32> to vector<16xf32>
    %173 = vector.shape_cast %172 : vector<16xf32> to vector<16x1xf32>
    %cst_67 = arith.constant 3.200000e+01 : f32
    %174 = vector.broadcast %cst_67 : f32 to vector<16x1xf32>
    %175 = arith.divf %173, %174 : vector<16x1xf32>
    %176 = vector.broadcast %168 : vector<16x1xf32> to vector<16x32xf32>
    %177 = arith.subf %164, %176 : vector<16x32xf32>
    %cst_68 = arith.constant 9.99999974E-6 : f32
    %178 = vector.broadcast %cst_68 : f32 to vector<16x1xf32>
    %179 = arith.addf %175, %178 : vector<16x1xf32>
    %180 = math.rsqrt %179 : vector<16x1xf32>
    %181 = vector.broadcast %180 : vector<16x1xf32> to vector<16x32xf32>
    %182 = arith.mulf %177, %181 : vector<16x32xf32>
    %183 = vector.broadcast %28 : vector<1x32xf32> to vector<16x32xf32>
    %184 = arith.mulf %182, %183 : vector<16x32xf32>
    %185 = vector.broadcast %29 : vector<1x32xf32> to vector<16x32xf32>
    %186 = arith.addf %184, %185 : vector<16x32xf32>
    %c0_69 = arith.constant 0 : index
    %c0_70 = arith.constant 0 : index
    %187 = vector.load %arg22[%c0_69, %c0_70] : memref<32x96xf32, #tpu.memory_space<vmem>>, vector<32x96xf32>
    %c0_71 = arith.constant 0 : index
    %c0_72 = arith.constant 0 : index
    %188 = vector.load %arg23[%c0_71, %c0_72] : memref<1x96xf32, #tpu.memory_space<vmem>>, vector<1x96xf32>
    %c0_73 = arith.constant 0 : index
    %c0_74 = arith.constant 0 : index
    %189 = vector.load %arg24[%c0_73, %c0_74] : memref<32x32xf32, #tpu.memory_space<vmem>>, vector<32x32xf32>
    %c0_75 = arith.constant 0 : index
    %c0_76 = arith.constant 0 : index
    %190 = vector.load %arg25[%c0_75, %c0_76] : memref<1x32xf32, #tpu.memory_space<vmem>>, vector<1x32xf32>
    %c0_77 = arith.constant 0 : index
    %c0_78 = arith.constant 0 : index
    %191 = vector.load %arg26[%c0_77, %c0_78] : memref<1x32xf32, #tpu.memory_space<vmem>>, vector<1x32xf32>
    %c0_79 = arith.constant 0 : index
    %c0_80 = arith.constant 0 : index
    %192 = vector.load %arg27[%c0_79, %c0_80] : memref<1x32xf32, #tpu.memory_space<vmem>>, vector<1x32xf32>
    %c0_81 = arith.constant 0 : index
    %c0_82 = arith.constant 0 : index
    %193 = vector.load %arg28[%c0_81, %c0_82] : memref<32x32xf32, #tpu.memory_space<vmem>>, vector<32x32xf32>
    %c0_83 = arith.constant 0 : index
    %c0_84 = arith.constant 0 : index
    %194 = vector.load %arg29[%c0_83, %c0_84] : memref<1x32xf32, #tpu.memory_space<vmem>>, vector<1x32xf32>
    %c0_85 = arith.constant 0 : index
    %c0_86 = arith.constant 0 : index
    %195 = vector.load %arg30[%c0_85, %c0_86] : memref<32x32xf32, #tpu.memory_space<vmem>>, vector<32x32xf32>
    %c0_87 = arith.constant 0 : index
    %c0_88 = arith.constant 0 : index
    %196 = vector.load %arg31[%c0_87, %c0_88] : memref<1x32xf32, #tpu.memory_space<vmem>>, vector<1x32xf32>
    %c0_89 = arith.constant 0 : index
    %c0_90 = arith.constant 0 : index
    %197 = vector.load %arg32[%c0_89, %c0_90] : memref<1x32xf32, #tpu.memory_space<vmem>>, vector<1x32xf32>
    %c0_91 = arith.constant 0 : index
    %c0_92 = arith.constant 0 : index
    %198 = vector.load %arg33[%c0_91, %c0_92] : memref<1x32xf32, #tpu.memory_space<vmem>>, vector<1x32xf32>
    %cst_93 = arith.constant dense<0.000000e+00> : vector<16x96xf32>
    %199 = tpu.matmul %186, %187, %cst_93 {dimension_numbers = #tpu.dot_dimension_numbers<[1], [0], [0], [1], [0, 0, 1, 1], [], []>} : vector<16x32xf32>, vector<32x96xf32>, vector<16x96xf32> -> vector<16x96xf32>
    %200 = vector.broadcast %188 : vector<1x96xf32> to vector<16x96xf32>
    %201 = arith.addf %199, %200 : vector<16x96xf32>
    %202 = vector.extract_strided_slice %201 {offsets = [0, 0], sizes = [16, 32], strides = [1, 1]} : vector<16x96xf32> to vector<16x32xf32>
    %203 = vector.extract_strided_slice %201 {offsets = [0, 32], sizes = [16, 32], strides = [1, 1]} : vector<16x96xf32> to vector<16x32xf32>
    %204 = vector.extract_strided_slice %201 {offsets = [0, 64], sizes = [16, 32], strides = [1, 1]} : vector<16x96xf32> to vector<16x32xf32>
    %205 = vector.extract_strided_slice %202 {offsets = [0, 0], sizes = [8, 8], strides = [1, 1]} : vector<16x32xf32> to vector<8x8xf32>
    %206 = vector.extract_strided_slice %202 {offsets = [0, 8], sizes = [8, 8], strides = [1, 1]} : vector<16x32xf32> to vector<8x8xf32>
    %207 = vector.extract_strided_slice %202 {offsets = [0, 16], sizes = [8, 8], strides = [1, 1]} : vector<16x32xf32> to vector<8x8xf32>
    %208 = vector.extract_strided_slice %202 {offsets = [0, 24], sizes = [8, 8], strides = [1, 1]} : vector<16x32xf32> to vector<8x8xf32>
    %209 = vector.extract_strided_slice %202 {offsets = [8, 0], sizes = [8, 8], strides = [1, 1]} : vector<16x32xf32> to vector<8x8xf32>
    %210 = vector.extract_strided_slice %202 {offsets = [8, 8], sizes = [8, 8], strides = [1, 1]} : vector<16x32xf32> to vector<8x8xf32>
    %211 = vector.extract_strided_slice %202 {offsets = [8, 16], sizes = [8, 8], strides = [1, 1]} : vector<16x32xf32> to vector<8x8xf32>
    %212 = vector.extract_strided_slice %202 {offsets = [8, 24], sizes = [8, 8], strides = [1, 1]} : vector<16x32xf32> to vector<8x8xf32>
    %213 = vector.shape_cast %205 : vector<8x8xf32> to vector<1x8x8xf32>
    %214 = vector.shape_cast %206 : vector<8x8xf32> to vector<1x8x8xf32>
    %215 = vector.shape_cast %207 : vector<8x8xf32> to vector<1x8x8xf32>
    %216 = vector.shape_cast %208 : vector<8x8xf32> to vector<1x8x8xf32>
    %217 = vector.shape_cast %209 : vector<8x8xf32> to vector<1x8x8xf32>
    %218 = vector.shape_cast %210 : vector<8x8xf32> to vector<1x8x8xf32>
    %219 = vector.shape_cast %211 : vector<8x8xf32> to vector<1x8x8xf32>
    %220 = vector.shape_cast %212 : vector<8x8xf32> to vector<1x8x8xf32>
    %221 = tpu.concatenate %213, %214, %215, %216, %217, %218, %219, %220 in 0 : vector<1x8x8xf32>, vector<1x8x8xf32>, vector<1x8x8xf32>, vector<1x8x8xf32>, vector<1x8x8xf32>, vector<1x8x8xf32>, vector<1x8x8xf32>, vector<1x8x8xf32> -> vector<8x8x8xf32>
    %222 = vector.extract_strided_slice %203 {offsets = [0, 0], sizes = [8, 8], strides = [1, 1]} : vector<16x32xf32> to vector<8x8xf32>
    %223 = vector.extract_strided_slice %203 {offsets = [0, 8], sizes = [8, 8], strides = [1, 1]} : vector<16x32xf32> to vector<8x8xf32>
    %224 = vector.extract_strided_slice %203 {offsets = [0, 16], sizes = [8, 8], strides = [1, 1]} : vector<16x32xf32> to vector<8x8xf32>
    %225 = vector.extract_strided_slice %203 {offsets = [0, 24], sizes = [8, 8], strides = [1, 1]} : vector<16x32xf32> to vector<8x8xf32>
    %226 = vector.extract_strided_slice %203 {offsets = [8, 0], sizes = [8, 8], strides = [1, 1]} : vector<16x32xf32> to vector<8x8xf32>
    %227 = vector.extract_strided_slice %203 {offsets = [8, 8], sizes = [8, 8], strides = [1, 1]} : vector<16x32xf32> to vector<8x8xf32>
    %228 = vector.extract_strided_slice %203 {offsets = [8, 16], sizes = [8, 8], strides = [1, 1]} : vector<16x32xf32> to vector<8x8xf32>
    %229 = vector.extract_strided_slice %203 {offsets = [8, 24], sizes = [8, 8], strides = [1, 1]} : vector<16x32xf32> to vector<8x8xf32>
    %230 = vector.shape_cast %222 : vector<8x8xf32> to vector<1x8x8xf32>
    %231 = vector.shape_cast %223 : vector<8x8xf32> to vector<1x8x8xf32>
    %232 = vector.shape_cast %224 : vector<8x8xf32> to vector<1x8x8xf32>
    %233 = vector.shape_cast %225 : vector<8x8xf32> to vector<1x8x8xf32>
    %234 = vector.shape_cast %226 : vector<8x8xf32> to vector<1x8x8xf32>
    %235 = vector.shape_cast %227 : vector<8x8xf32> to vector<1x8x8xf32>
    %236 = vector.shape_cast %228 : vector<8x8xf32> to vector<1x8x8xf32>
    %237 = vector.shape_cast %229 : vector<8x8xf32> to vector<1x8x8xf32>
    %238 = tpu.concatenate %230, %231, %232, %233, %234, %235, %236, %237 in 0 : vector<1x8x8xf32>, vector<1x8x8xf32>, vector<1x8x8xf32>, vector<1x8x8xf32>, vector<1x8x8xf32>, vector<1x8x8xf32>, vector<1x8x8xf32>, vector<1x8x8xf32> -> vector<8x8x8xf32>
    %239 = vector.extract_strided_slice %204 {offsets = [0, 0], sizes = [8, 8], strides = [1, 1]} : vector<16x32xf32> to vector<8x8xf32>
    %240 = vector.extract_strided_slice %204 {offsets = [0, 8], sizes = [8, 8], strides = [1, 1]} : vector<16x32xf32> to vector<8x8xf32>
    %241 = vector.extract_strided_slice %204 {offsets = [0, 16], sizes = [8, 8], strides = [1, 1]} : vector<16x32xf32> to vector<8x8xf32>
    %242 = vector.extract_strided_slice %204 {offsets = [0, 24], sizes = [8, 8], strides = [1, 1]} : vector<16x32xf32> to vector<8x8xf32>
    %243 = vector.extract_strided_slice %204 {offsets = [8, 0], sizes = [8, 8], strides = [1, 1]} : vector<16x32xf32> to vector<8x8xf32>
    %244 = vector.extract_strided_slice %204 {offsets = [8, 8], sizes = [8, 8], strides = [1, 1]} : vector<16x32xf32> to vector<8x8xf32>
    %245 = vector.extract_strided_slice %204 {offsets = [8, 16], sizes = [8, 8], strides = [1, 1]} : vector<16x32xf32> to vector<8x8xf32>
    %246 = vector.extract_strided_slice %204 {offsets = [8, 24], sizes = [8, 8], strides = [1, 1]} : vector<16x32xf32> to vector<8x8xf32>
    %247 = vector.shape_cast %239 : vector<8x8xf32> to vector<1x8x8xf32>
    %248 = vector.shape_cast %240 : vector<8x8xf32> to vector<1x8x8xf32>
    %249 = vector.shape_cast %241 : vector<8x8xf32> to vector<1x8x8xf32>
    %250 = vector.shape_cast %242 : vector<8x8xf32> to vector<1x8x8xf32>
    %251 = vector.shape_cast %243 : vector<8x8xf32> to vector<1x8x8xf32>
    %252 = vector.shape_cast %244 : vector<8x8xf32> to vector<1x8x8xf32>
    %253 = vector.shape_cast %245 : vector<8x8xf32> to vector<1x8x8xf32>
    %254 = vector.shape_cast %246 : vector<8x8xf32> to vector<1x8x8xf32>
    %255 = tpu.concatenate %247, %248, %249, %250, %251, %252, %253, %254 in 0 : vector<1x8x8xf32>, vector<1x8x8xf32>, vector<1x8x8xf32>, vector<1x8x8xf32>, vector<1x8x8xf32>, vector<1x8x8xf32>, vector<1x8x8xf32>, vector<1x8x8xf32> -> vector<8x8x8xf32>
    "tpu.trace_start"() <{level = 10 : i32, message = "bqd,bkd->bqk"}> : () -> ()
    %cst_94 = arith.constant dense<0.000000e+00> : vector<8x8x8xf32>
    %256 = tpu.matmul %221, %238, %cst_94 {dimension_numbers = #tpu.dot_dimension_numbers<[2], [2], [1], [1], [0, 0, 0, 1, 1, 1], [0], [0]>} : vector<8x8x8xf32>, vector<8x8x8xf32>, vector<8x8x8xf32> -> vector<8x8x8xf32>
    "tpu.trace_stop"() : () -> ()
    %cst_95 = arith.constant 0.353553385 : f32
    %257 = vector.broadcast %cst_95 : f32 to vector<8x8x8xf32>
    %258 = arith.mulf %256, %257 : vector<8x8x8xf32>
    %cst_96 = arith.constant dense<0xFF800000> : vector<8x8xf32>
    %259 = vector.multi_reduction <maximumf>, %258, %cst_96 [2] : vector<8x8x8xf32> to vector<8x8xf32>
    %260 = vector.shape_cast %259 : vector<8x8xf32> to vector<8x8x1xf32>
    %261 = vector.broadcast %260 : vector<8x8x1xf32> to vector<8x8x8xf32>
    %262 = arith.subf %258, %261 : vector<8x8x8xf32>
    %263 = math.exp %262 : vector<8x8x8xf32>
    %cst_97 = arith.constant dense<0.000000e+00> : vector<8x8xf32>
    %264 = vector.multi_reduction <add>, %263, %cst_97 [2] : vector<8x8x8xf32> to vector<8x8xf32>
    %265 = vector.shape_cast %264 : vector<8x8xf32> to vector<8x8x1xf32>
    %266 = vector.broadcast %265 : vector<8x8x1xf32> to vector<8x8x8xf32>
    %267 = arith.divf %263, %266 : vector<8x8x8xf32>
    "tpu.trace_start"() <{level = 10 : i32, message = "bqk,bkd->bqd"}> : () -> ()
    %cst_98 = arith.constant dense<0.000000e+00> : vector<8x8x8xf32>
    %268 = tpu.matmul %267, %255, %cst_98 {dimension_numbers = #tpu.dot_dimension_numbers<[2], [1], [1], [2], [0, 0, 0, 1, 1, 2], [0], [0]>} : vector<8x8x8xf32>, vector<8x8x8xf32>, vector<8x8x8xf32> -> vector<8x8x8xf32>
    "tpu.trace_stop"() : () -> ()
    %269 = vector.extract_strided_slice %268 {offsets = [0, 0, 0], sizes = [1, 8, 8], strides = [1, 1, 1]} : vector<8x8x8xf32> to vector<1x8x8xf32>
    %270 = vector.shape_cast %269 : vector<1x8x8xf32> to vector<8x8xf32>
    %271 = vector.extract_strided_slice %268 {offsets = [1, 0, 0], sizes = [1, 8, 8], strides = [1, 1, 1]} : vector<8x8x8xf32> to vector<1x8x8xf32>
    %272 = vector.shape_cast %271 : vector<1x8x8xf32> to vector<8x8xf32>
    %273 = vector.extract_strided_slice %268 {offsets = [2, 0, 0], sizes = [1, 8, 8], strides = [1, 1, 1]} : vector<8x8x8xf32> to vector<1x8x8xf32>
    %274 = vector.shape_cast %273 : vector<1x8x8xf32> to vector<8x8xf32>
    %275 = vector.extract_strided_slice %268 {offsets = [3, 0, 0], sizes = [1, 8, 8], strides = [1, 1, 1]} : vector<8x8x8xf32> to vector<1x8x8xf32>
    %276 = vector.shape_cast %275 : vector<1x8x8xf32> to vector<8x8xf32>
    %277 = tpu.concatenate %270, %272, %274, %276 in 1 : vector<8x8xf32>, vector<8x8xf32>, vector<8x8xf32>, vector<8x8xf32> -> vector<8x32xf32>
    %278 = vector.extract_strided_slice %268 {offsets = [4, 0, 0], sizes = [1, 8, 8], strides = [1, 1, 1]} : vector<8x8x8xf32> to vector<1x8x8xf32>
    %279 = vector.shape_cast %278 : vector<1x8x8xf32> to vector<8x8xf32>
    %280 = vector.extract_strided_slice %268 {offsets = [5, 0, 0], sizes = [1, 8, 8], strides = [1, 1, 1]} : vector<8x8x8xf32> to vector<1x8x8xf32>
    %281 = vector.shape_cast %280 : vector<1x8x8xf32> to vector<8x8xf32>
    %282 = vector.extract_strided_slice %268 {offsets = [6, 0, 0], sizes = [1, 8, 8], strides = [1, 1, 1]} : vector<8x8x8xf32> to vector<1x8x8xf32>
    %283 = vector.shape_cast %282 : vector<1x8x8xf32> to vector<8x8xf32>
    %284 = vector.extract_strided_slice %268 {offsets = [7, 0, 0], sizes = [1, 8, 8], strides = [1, 1, 1]} : vector<8x8x8xf32> to vector<1x8x8xf32>
    %285 = vector.shape_cast %284 : vector<1x8x8xf32> to vector<8x8xf32>
    %286 = tpu.concatenate %279, %281, %283, %285 in 1 : vector<8x8xf32>, vector<8x8xf32>, vector<8x8xf32>, vector<8x8xf32> -> vector<8x32xf32>
    %287 = tpu.concatenate %277, %286 in 0 : vector<8x32xf32>, vector<8x32xf32> -> vector<16x32xf32>
    %cst_99 = arith.constant dense<0.000000e+00> : vector<16x32xf32>
    %288 = tpu.matmul %287, %189, %cst_99 {dimension_numbers = #tpu.dot_dimension_numbers<[1], [0], [0], [1], [0, 0, 1, 1], [], []>} : vector<16x32xf32>, vector<32x32xf32>, vector<16x32xf32> -> vector<16x32xf32>
    %289 = vector.broadcast %190 : vector<1x32xf32> to vector<16x32xf32>
    %290 = arith.addf %288, %289 : vector<16x32xf32>
    %291 = arith.addf %186, %290 : vector<16x32xf32>
    %cst_100 = arith.constant dense<0.000000e+00> : vector<16xf32>
    %292 = vector.multi_reduction <add>, %291, %cst_100 [1] : vector<16x32xf32> to vector<16xf32>
    %293 = vector.shape_cast %292 : vector<16xf32> to vector<16x1xf32>
    %cst_101 = arith.constant 3.200000e+01 : f32
    %294 = vector.broadcast %cst_101 : f32 to vector<16x1xf32>
    %295 = arith.divf %293, %294 : vector<16x1xf32>
    %296 = vector.broadcast %295 : vector<16x1xf32> to vector<16x32xf32>
    %297 = arith.subf %291, %296 : vector<16x32xf32>
    %298 = arith.mulf %297, %297 : vector<16x32xf32>
    %cst_102 = arith.constant dense<0.000000e+00> : vector<16xf32>
    %299 = vector.multi_reduction <add>, %298, %cst_102 [1] : vector<16x32xf32> to vector<16xf32>
    %300 = vector.shape_cast %299 : vector<16xf32> to vector<16x1xf32>
    %cst_103 = arith.constant 3.200000e+01 : f32
    %301 = vector.broadcast %cst_103 : f32 to vector<16x1xf32>
    %302 = arith.divf %300, %301 : vector<16x1xf32>
    %303 = vector.broadcast %295 : vector<16x1xf32> to vector<16x32xf32>
    %304 = arith.subf %291, %303 : vector<16x32xf32>
    %cst_104 = arith.constant 9.99999974E-6 : f32
    %305 = vector.broadcast %cst_104 : f32 to vector<16x1xf32>
    %306 = arith.addf %302, %305 : vector<16x1xf32>
    %307 = math.rsqrt %306 : vector<16x1xf32>
    %308 = vector.broadcast %307 : vector<16x1xf32> to vector<16x32xf32>
    %309 = arith.mulf %304, %308 : vector<16x32xf32>
    %310 = vector.broadcast %191 : vector<1x32xf32> to vector<16x32xf32>
    %311 = arith.mulf %309, %310 : vector<16x32xf32>
    %312 = vector.broadcast %192 : vector<1x32xf32> to vector<16x32xf32>
    %313 = arith.addf %311, %312 : vector<16x32xf32>
    %cst_105 = arith.constant dense<0.000000e+00> : vector<16x32xf32>
    %314 = tpu.matmul %313, %193, %cst_105 {dimension_numbers = #tpu.dot_dimension_numbers<[1], [0], [0], [1], [0, 0, 1, 1], [], []>} : vector<16x32xf32>, vector<32x32xf32>, vector<16x32xf32> -> vector<16x32xf32>
    %315 = vector.broadcast %194 : vector<1x32xf32> to vector<16x32xf32>
    %316 = arith.addf %314, %315 : vector<16x32xf32>
    %cst_106 = arith.constant 5.000000e-01 : f32
    %317 = vector.broadcast %cst_106 : f32 to vector<16x32xf32>
    %318 = arith.mulf %317, %316 : vector<16x32xf32>
    %cst_107 = arith.constant 4.471500e-02 : f32
    %319 = vector.broadcast %cst_107 : f32 to vector<16x32xf32>
    %320 = arith.mulf %319, %316 : vector<16x32xf32>
    %321 = arith.mulf %320, %316 : vector<16x32xf32>
    %322 = arith.mulf %321, %316 : vector<16x32xf32>
    %323 = arith.addf %316, %322 : vector<16x32xf32>
    %cst_108 = arith.constant 0.797884583 : f32
    %324 = vector.broadcast %cst_108 : f32 to vector<16x32xf32>
    %325 = arith.mulf %324, %323 : vector<16x32xf32>
    %326 = math.tanh %325 : vector<16x32xf32>
    %cst_109 = arith.constant 1.000000e+00 : f32
    %327 = vector.broadcast %cst_109 : f32 to vector<16x32xf32>
    %328 = arith.addf %327, %326 : vector<16x32xf32>
    %329 = arith.mulf %318, %328 : vector<16x32xf32>
    %cst_110 = arith.constant dense<0.000000e+00> : vector<16x32xf32>
    %330 = tpu.matmul %329, %195, %cst_110 {dimension_numbers = #tpu.dot_dimension_numbers<[1], [0], [0], [1], [0, 0, 1, 1], [], []>} : vector<16x32xf32>, vector<32x32xf32>, vector<16x32xf32> -> vector<16x32xf32>
    %331 = vector.broadcast %196 : vector<1x32xf32> to vector<16x32xf32>
    %332 = arith.addf %330, %331 : vector<16x32xf32>
    %333 = arith.addf %313, %332 : vector<16x32xf32>
    %cst_111 = arith.constant dense<0.000000e+00> : vector<16xf32>
    %334 = vector.multi_reduction <add>, %333, %cst_111 [1] : vector<16x32xf32> to vector<16xf32>
    %335 = vector.shape_cast %334 : vector<16xf32> to vector<16x1xf32>
    %cst_112 = arith.constant 3.200000e+01 : f32
    %336 = vector.broadcast %cst_112 : f32 to vector<16x1xf32>
    %337 = arith.divf %335, %336 : vector<16x1xf32>
    %338 = vector.broadcast %337 : vector<16x1xf32> to vector<16x32xf32>
    %339 = arith.subf %333, %338 : vector<16x32xf32>
    %340 = arith.mulf %339, %339 : vector<16x32xf32>
    %cst_113 = arith.constant dense<0.000000e+00> : vector<16xf32>
    %341 = vector.multi_reduction <add>, %340, %cst_113 [1] : vector<16x32xf32> to vector<16xf32>
    %342 = vector.shape_cast %341 : vector<16xf32> to vector<16x1xf32>
    %cst_114 = arith.constant 3.200000e+01 : f32
    %343 = vector.broadcast %cst_114 : f32 to vector<16x1xf32>
    %344 = arith.divf %342, %343 : vector<16x1xf32>
    %345 = vector.broadcast %337 : vector<16x1xf32> to vector<16x32xf32>
    %346 = arith.subf %333, %345 : vector<16x32xf32>
    %cst_115 = arith.constant 9.99999974E-6 : f32
    %347 = vector.broadcast %cst_115 : f32 to vector<16x1xf32>
    %348 = arith.addf %344, %347 : vector<16x1xf32>
    %349 = math.rsqrt %348 : vector<16x1xf32>
    %350 = vector.broadcast %349 : vector<16x1xf32> to vector<16x32xf32>
    %351 = arith.mulf %346, %350 : vector<16x32xf32>
    %352 = vector.broadcast %197 : vector<1x32xf32> to vector<16x32xf32>
    %353 = arith.mulf %351, %352 : vector<16x32xf32>
    %354 = vector.broadcast %198 : vector<1x32xf32> to vector<16x32xf32>
    %355 = arith.addf %353, %354 : vector<16x32xf32>
    %c0_116 = arith.constant 0 : index
    %c0_117 = arith.constant 0 : index
    %356 = vector.load %arg34[%c0_116, %c0_117] : memref<1x32xf32, #tpu.memory_space<vmem>>, vector<1x32xf32>
    %c0_118 = arith.constant 0 : index
    %c0_119 = arith.constant 0 : index
    %357 = vector.load %arg35[%c0_118, %c0_119] : memref<1x32xf32, #tpu.memory_space<vmem>>, vector<1x32xf32>
    %cst_120 = arith.constant dense<0.000000e+00> : vector<16xf32>
    %358 = vector.multi_reduction <add>, %355, %cst_120 [1] : vector<16x32xf32> to vector<16xf32>
    %359 = vector.shape_cast %358 : vector<16xf32> to vector<16x1xf32>
    %cst_121 = arith.constant 3.200000e+01 : f32
    %360 = vector.broadcast %cst_121 : f32 to vector<16x1xf32>
    %361 = arith.divf %359, %360 : vector<16x1xf32>
    %362 = vector.broadcast %361 : vector<16x1xf32> to vector<16x32xf32>
    %363 = arith.subf %355, %362 : vector<16x32xf32>
    %364 = arith.mulf %363, %363 : vector<16x32xf32>
    %cst_122 = arith.constant dense<0.000000e+00> : vector<16xf32>
    %365 = vector.multi_reduction <add>, %364, %cst_122 [1] : vector<16x32xf32> to vector<16xf32>
    %366 = vector.shape_cast %365 : vector<16xf32> to vector<16x1xf32>
    %cst_123 = arith.constant 3.200000e+01 : f32
    %367 = vector.broadcast %cst_123 : f32 to vector<16x1xf32>
    %368 = arith.divf %366, %367 : vector<16x1xf32>
    %369 = vector.broadcast %361 : vector<16x1xf32> to vector<16x32xf32>
    %370 = arith.subf %355, %369 : vector<16x32xf32>
    %cst_124 = arith.constant 9.99999974E-6 : f32
    %371 = vector.broadcast %cst_124 : f32 to vector<16x1xf32>
    %372 = arith.addf %368, %371 : vector<16x1xf32>
    %373 = math.rsqrt %372 : vector<16x1xf32>
    %374 = vector.broadcast %373 : vector<16x1xf32> to vector<16x32xf32>
    %375 = arith.mulf %370, %374 : vector<16x32xf32>
    %376 = vector.broadcast %356 : vector<1x32xf32> to vector<16x32xf32>
    %377 = arith.mulf %375, %376 : vector<16x32xf32>
    %378 = vector.broadcast %357 : vector<1x32xf32> to vector<16x32xf32>
    %379 = arith.addf %377, %378 : vector<16x32xf32>
    %c0_125 = arith.constant 0 : index
    %c0_126 = arith.constant 0 : index
    %380 = vector.load %arg36[%c0_125, %c0_126] : memref<32x96xf32, #tpu.memory_space<vmem>>, vector<32x96xf32>
    %c0_127 = arith.constant 0 : index
    %c0_128 = arith.constant 0 : index
    %381 = vector.load %arg37[%c0_127, %c0_128] : memref<1x96xf32, #tpu.memory_space<vmem>>, vector<1x96xf32>
    %c0_129 = arith.constant 0 : index
    %c0_130 = arith.constant 0 : index
    %382 = vector.load %arg38[%c0_129, %c0_130] : memref<32x32xf32, #tpu.memory_space<vmem>>, vector<32x32xf32>
    %c0_131 = arith.constant 0 : index
    %c0_132 = arith.constant 0 : index
    %383 = vector.load %arg39[%c0_131, %c0_132] : memref<1x32xf32, #tpu.memory_space<vmem>>, vector<1x32xf32>
    %c0_133 = arith.constant 0 : index
    %c0_134 = arith.constant 0 : index
    %384 = vector.load %arg40[%c0_133, %c0_134] : memref<32x32xf32, #tpu.memory_space<vmem>>, vector<32x32xf32>
    %c0_135 = arith.constant 0 : index
    %c0_136 = arith.constant 0 : index
    %385 = vector.load %arg41[%c0_135, %c0_136] : memref<1x32xf32, #tpu.memory_space<vmem>>, vector<1x32xf32>
    %c0_137 = arith.constant 0 : index
    %c0_138 = arith.constant 0 : index
    %386 = vector.load %arg42[%c0_137, %c0_138] : memref<32x64xf32, #tpu.memory_space<vmem>>, vector<32x64xf32>
    %c0_139 = arith.constant 0 : index
    %c0_140 = arith.constant 0 : index
    %387 = vector.load %arg43[%c0_139, %c0_140] : memref<1x64xf32, #tpu.memory_space<vmem>>, vector<1x64xf32>
    %c0_141 = arith.constant 0 : index
    %c0_142 = arith.constant 0 : index
    %388 = vector.load %arg44[%c0_141, %c0_142] : memref<32x32xf32, #tpu.memory_space<vmem>>, vector<32x32xf32>
    %c0_143 = arith.constant 0 : index
    %c0_144 = arith.constant 0 : index
    %389 = vector.load %arg45[%c0_143, %c0_144] : memref<1x32xf32, #tpu.memory_space<vmem>>, vector<1x32xf32>
    %c0_145 = arith.constant 0 : index
    %c0_146 = arith.constant 0 : index
    %390 = vector.load %arg46[%c0_145, %c0_146] : memref<1x32xf32, #tpu.memory_space<vmem>>, vector<1x32xf32>
    %c0_147 = arith.constant 0 : index
    %c0_148 = arith.constant 0 : index
    %391 = vector.load %arg47[%c0_147, %c0_148] : memref<1x32xf32, #tpu.memory_space<vmem>>, vector<1x32xf32>
    %c0_149 = arith.constant 0 : index
    %c0_150 = arith.constant 0 : index
    %392 = vector.load %arg48[%c0_149, %c0_150] : memref<1x32xf32, #tpu.memory_space<vmem>>, vector<1x32xf32>
    %c0_151 = arith.constant 0 : index
    %c0_152 = arith.constant 0 : index
    %393 = vector.load %arg49[%c0_151, %c0_152] : memref<1x32xf32, #tpu.memory_space<vmem>>, vector<1x32xf32>
    %c0_153 = arith.constant 0 : index
    %c0_154 = arith.constant 0 : index
    %394 = vector.load %arg50[%c0_153, %c0_154] : memref<1x32xf32, #tpu.memory_space<vmem>>, vector<1x32xf32>
    %c0_155 = arith.constant 0 : index
    %c0_156 = arith.constant 0 : index
    %395 = vector.load %arg51[%c0_155, %c0_156] : memref<1x32xf32, #tpu.memory_space<vmem>>, vector<1x32xf32>
    %c0_157 = arith.constant 0 : index
    %c0_158 = arith.constant 0 : index
    %396 = vector.load %arg52[%c0_157, %c0_158] : memref<32x32xf32, #tpu.memory_space<vmem>>, vector<32x32xf32>
    %c0_159 = arith.constant 0 : index
    %c0_160 = arith.constant 0 : index
    %397 = vector.load %arg53[%c0_159, %c0_160] : memref<1x32xf32, #tpu.memory_space<vmem>>, vector<1x32xf32>
    %c0_161 = arith.constant 0 : index
    %c0_162 = arith.constant 0 : index
    %398 = vector.load %arg54[%c0_161, %c0_162] : memref<32x32xf32, #tpu.memory_space<vmem>>, vector<32x32xf32>
    %c0_163 = arith.constant 0 : index
    %c0_164 = arith.constant 0 : index
    %399 = vector.load %arg55[%c0_163, %c0_164] : memref<1x32xf32, #tpu.memory_space<vmem>>, vector<1x32xf32>
    %cst_165 = arith.constant dense<0.000000e+00> : vector<16x96xf32>
    %400 = tpu.matmul %17, %380, %cst_165 {dimension_numbers = #tpu.dot_dimension_numbers<[1], [0], [0], [1], [0, 0, 1, 1], [], []>} : vector<16x32xf32>, vector<32x96xf32>, vector<16x96xf32> -> vector<16x96xf32>
    %401 = vector.broadcast %381 : vector<1x96xf32> to vector<16x96xf32>
    %402 = arith.addf %400, %401 : vector<16x96xf32>
    %403 = vector.extract_strided_slice %402 {offsets = [0, 0], sizes = [16, 32], strides = [1, 1]} : vector<16x96xf32> to vector<16x32xf32>
    %404 = vector.extract_strided_slice %402 {offsets = [0, 32], sizes = [16, 32], strides = [1, 1]} : vector<16x96xf32> to vector<16x32xf32>
    %405 = vector.extract_strided_slice %402 {offsets = [0, 64], sizes = [16, 32], strides = [1, 1]} : vector<16x96xf32> to vector<16x32xf32>
    %406 = vector.extract_strided_slice %403 {offsets = [0, 0], sizes = [8, 8], strides = [1, 1]} : vector<16x32xf32> to vector<8x8xf32>
    %407 = vector.extract_strided_slice %403 {offsets = [0, 8], sizes = [8, 8], strides = [1, 1]} : vector<16x32xf32> to vector<8x8xf32>
    %408 = vector.extract_strided_slice %403 {offsets = [0, 16], sizes = [8, 8], strides = [1, 1]} : vector<16x32xf32> to vector<8x8xf32>
    %409 = vector.extract_strided_slice %403 {offsets = [0, 24], sizes = [8, 8], strides = [1, 1]} : vector<16x32xf32> to vector<8x8xf32>
    %410 = vector.extract_strided_slice %403 {offsets = [8, 0], sizes = [8, 8], strides = [1, 1]} : vector<16x32xf32> to vector<8x8xf32>
    %411 = vector.extract_strided_slice %403 {offsets = [8, 8], sizes = [8, 8], strides = [1, 1]} : vector<16x32xf32> to vector<8x8xf32>
    %412 = vector.extract_strided_slice %403 {offsets = [8, 16], sizes = [8, 8], strides = [1, 1]} : vector<16x32xf32> to vector<8x8xf32>
    %413 = vector.extract_strided_slice %403 {offsets = [8, 24], sizes = [8, 8], strides = [1, 1]} : vector<16x32xf32> to vector<8x8xf32>
    %414 = vector.shape_cast %406 : vector<8x8xf32> to vector<1x8x8xf32>
    %415 = vector.shape_cast %407 : vector<8x8xf32> to vector<1x8x8xf32>
    %416 = vector.shape_cast %408 : vector<8x8xf32> to vector<1x8x8xf32>
    %417 = vector.shape_cast %409 : vector<8x8xf32> to vector<1x8x8xf32>
    %418 = vector.shape_cast %410 : vector<8x8xf32> to vector<1x8x8xf32>
    %419 = vector.shape_cast %411 : vector<8x8xf32> to vector<1x8x8xf32>
    %420 = vector.shape_cast %412 : vector<8x8xf32> to vector<1x8x8xf32>
    %421 = vector.shape_cast %413 : vector<8x8xf32> to vector<1x8x8xf32>
    %422 = tpu.concatenate %414, %415, %416, %417, %418, %419, %420, %421 in 0 : vector<1x8x8xf32>, vector<1x8x8xf32>, vector<1x8x8xf32>, vector<1x8x8xf32>, vector<1x8x8xf32>, vector<1x8x8xf32>, vector<1x8x8xf32>, vector<1x8x8xf32> -> vector<8x8x8xf32>
    %423 = vector.extract_strided_slice %404 {offsets = [0, 0], sizes = [8, 8], strides = [1, 1]} : vector<16x32xf32> to vector<8x8xf32>
    %424 = vector.extract_strided_slice %404 {offsets = [0, 8], sizes = [8, 8], strides = [1, 1]} : vector<16x32xf32> to vector<8x8xf32>
    %425 = vector.extract_strided_slice %404 {offsets = [0, 16], sizes = [8, 8], strides = [1, 1]} : vector<16x32xf32> to vector<8x8xf32>
    %426 = vector.extract_strided_slice %404 {offsets = [0, 24], sizes = [8, 8], strides = [1, 1]} : vector<16x32xf32> to vector<8x8xf32>
    %427 = vector.extract_strided_slice %404 {offsets = [8, 0], sizes = [8, 8], strides = [1, 1]} : vector<16x32xf32> to vector<8x8xf32>
    %428 = vector.extract_strided_slice %404 {offsets = [8, 8], sizes = [8, 8], strides = [1, 1]} : vector<16x32xf32> to vector<8x8xf32>
    %429 = vector.extract_strided_slice %404 {offsets = [8, 16], sizes = [8, 8], strides = [1, 1]} : vector<16x32xf32> to vector<8x8xf32>
    %430 = vector.extract_strided_slice %404 {offsets = [8, 24], sizes = [8, 8], strides = [1, 1]} : vector<16x32xf32> to vector<8x8xf32>
    %431 = vector.shape_cast %423 : vector<8x8xf32> to vector<1x8x8xf32>
    %432 = vector.shape_cast %424 : vector<8x8xf32> to vector<1x8x8xf32>
    %433 = vector.shape_cast %425 : vector<8x8xf32> to vector<1x8x8xf32>
    %434 = vector.shape_cast %426 : vector<8x8xf32> to vector<1x8x8xf32>
    %435 = vector.shape_cast %427 : vector<8x8xf32> to vector<1x8x8xf32>
    %436 = vector.shape_cast %428 : vector<8x8xf32> to vector<1x8x8xf32>
    %437 = vector.shape_cast %429 : vector<8x8xf32> to vector<1x8x8xf32>
    %438 = vector.shape_cast %430 : vector<8x8xf32> to vector<1x8x8xf32>
    %439 = tpu.concatenate %431, %432, %433, %434, %435, %436, %437, %438 in 0 : vector<1x8x8xf32>, vector<1x8x8xf32>, vector<1x8x8xf32>, vector<1x8x8xf32>, vector<1x8x8xf32>, vector<1x8x8xf32>, vector<1x8x8xf32>, vector<1x8x8xf32> -> vector<8x8x8xf32>
    %440 = vector.extract_strided_slice %405 {offsets = [0, 0], sizes = [8, 8], strides = [1, 1]} : vector<16x32xf32> to vector<8x8xf32>
    %441 = vector.extract_strided_slice %405 {offsets = [0, 8], sizes = [8, 8], strides = [1, 1]} : vector<16x32xf32> to vector<8x8xf32>
    %442 = vector.extract_strided_slice %405 {offsets = [0, 16], sizes = [8, 8], strides = [1, 1]} : vector<16x32xf32> to vector<8x8xf32>
    %443 = vector.extract_strided_slice %405 {offsets = [0, 24], sizes = [8, 8], strides = [1, 1]} : vector<16x32xf32> to vector<8x8xf32>
    %444 = vector.extract_strided_slice %405 {offsets = [8, 0], sizes = [8, 8], strides = [1, 1]} : vector<16x32xf32> to vector<8x8xf32>
    %445 = vector.extract_strided_slice %405 {offsets = [8, 8], sizes = [8, 8], strides = [1, 1]} : vector<16x32xf32> to vector<8x8xf32>
    %446 = vector.extract_strided_slice %405 {offsets = [8, 16], sizes = [8, 8], strides = [1, 1]} : vector<16x32xf32> to vector<8x8xf32>
    %447 = vector.extract_strided_slice %405 {offsets = [8, 24], sizes = [8, 8], strides = [1, 1]} : vector<16x32xf32> to vector<8x8xf32>
    %448 = vector.shape_cast %440 : vector<8x8xf32> to vector<1x8x8xf32>
    %449 = vector.shape_cast %441 : vector<8x8xf32> to vector<1x8x8xf32>
    %450 = vector.shape_cast %442 : vector<8x8xf32> to vector<1x8x8xf32>
    %451 = vector.shape_cast %443 : vector<8x8xf32> to vector<1x8x8xf32>
    %452 = vector.shape_cast %444 : vector<8x8xf32> to vector<1x8x8xf32>
    %453 = vector.shape_cast %445 : vector<8x8xf32> to vector<1x8x8xf32>
    %454 = vector.shape_cast %446 : vector<8x8xf32> to vector<1x8x8xf32>
    %455 = vector.shape_cast %447 : vector<8x8xf32> to vector<1x8x8xf32>
    %456 = tpu.concatenate %448, %449, %450, %451, %452, %453, %454, %455 in 0 : vector<1x8x8xf32>, vector<1x8x8xf32>, vector<1x8x8xf32>, vector<1x8x8xf32>, vector<1x8x8xf32>, vector<1x8x8xf32>, vector<1x8x8xf32>, vector<1x8x8xf32> -> vector<8x8x8xf32>
    "tpu.trace_start"() <{level = 10 : i32, message = "bqd,bkd->bqk"}> : () -> ()
    %cst_166 = arith.constant dense<0.000000e+00> : vector<8x8x8xf32>
    %457 = tpu.matmul %422, %439, %cst_166 {dimension_numbers = #tpu.dot_dimension_numbers<[2], [2], [1], [1], [0, 0, 0, 1, 1, 1], [0], [0]>} : vector<8x8x8xf32>, vector<8x8x8xf32>, vector<8x8x8xf32> -> vector<8x8x8xf32>
    "tpu.trace_stop"() : () -> ()
    %cst_167 = arith.constant 0.353553385 : f32
    %458 = vector.broadcast %cst_167 : f32 to vector<8x8x8xf32>
    %459 = arith.mulf %457, %458 : vector<8x8x8xf32>
    %460 = tpu.iota {dimensions = array<i32: 1>} : vector<8x8x8xi32>
    %461 = tpu.iota {dimensions = array<i32: 2>} : vector<8x8x8xi32>
    %462 = arith.cmpi sgt, %461, %460 : vector<8x8x8xi32>
    %cst_168 = arith.constant -1.000000e+30 : f32
    %463 = vector.broadcast %cst_168 : f32 to vector<8x8x8xf32>
    %464 = arith.select %462, %463, %459 : vector<8x8x8xi1>, vector<8x8x8xf32>
    %cst_169 = arith.constant dense<0xFF800000> : vector<8x8xf32>
    %465 = vector.multi_reduction <maximumf>, %464, %cst_169 [2] : vector<8x8x8xf32> to vector<8x8xf32>
    %466 = vector.shape_cast %465 : vector<8x8xf32> to vector<8x8x1xf32>
    %467 = vector.broadcast %466 : vector<8x8x1xf32> to vector<8x8x8xf32>
    %468 = arith.subf %464, %467 : vector<8x8x8xf32>
    %469 = math.exp %468 : vector<8x8x8xf32>
    %cst_170 = arith.constant dense<0.000000e+00> : vector<8x8xf32>
    %470 = vector.multi_reduction <add>, %469, %cst_170 [2] : vector<8x8x8xf32> to vector<8x8xf32>
    %471 = vector.shape_cast %470 : vector<8x8xf32> to vector<8x8x1xf32>
    %472 = vector.broadcast %471 : vector<8x8x1xf32> to vector<8x8x8xf32>
    %473 = arith.divf %469, %472 : vector<8x8x8xf32>
    "tpu.trace_start"() <{level = 10 : i32, message = "bqk,bkd->bqd"}> : () -> ()
    %cst_171 = arith.constant dense<0.000000e+00> : vector<8x8x8xf32>
    %474 = tpu.matmul %473, %456, %cst_171 {dimension_numbers = #tpu.dot_dimension_numbers<[2], [1], [1], [2], [0, 0, 0, 1, 1, 2], [0], [0]>} : vector<8x8x8xf32>, vector<8x8x8xf32>, vector<8x8x8xf32> -> vector<8x8x8xf32>
    "tpu.trace_stop"() : () -> ()
    %475 = vector.extract_strided_slice %474 {offsets = [0, 0, 0], sizes = [1, 8, 8], strides = [1, 1, 1]} : vector<8x8x8xf32> to vector<1x8x8xf32>
    %476 = vector.shape_cast %475 : vector<1x8x8xf32> to vector<8x8xf32>
    %477 = vector.extract_strided_slice %474 {offsets = [1, 0, 0], sizes = [1, 8, 8], strides = [1, 1, 1]} : vector<8x8x8xf32> to vector<1x8x8xf32>
    %478 = vector.shape_cast %477 : vector<1x8x8xf32> to vector<8x8xf32>
    %479 = vector.extract_strided_slice %474 {offsets = [2, 0, 0], sizes = [1, 8, 8], strides = [1, 1, 1]} : vector<8x8x8xf32> to vector<1x8x8xf32>
    %480 = vector.shape_cast %479 : vector<1x8x8xf32> to vector<8x8xf32>
    %481 = vector.extract_strided_slice %474 {offsets = [3, 0, 0], sizes = [1, 8, 8], strides = [1, 1, 1]} : vector<8x8x8xf32> to vector<1x8x8xf32>
    %482 = vector.shape_cast %481 : vector<1x8x8xf32> to vector<8x8xf32>
    %483 = tpu.concatenate %476, %478, %480, %482 in 1 : vector<8x8xf32>, vector<8x8xf32>, vector<8x8xf32>, vector<8x8xf32> -> vector<8x32xf32>
    %484 = vector.extract_strided_slice %474 {offsets = [4, 0, 0], sizes = [1, 8, 8], strides = [1, 1, 1]} : vector<8x8x8xf32> to vector<1x8x8xf32>
    %485 = vector.shape_cast %484 : vector<1x8x8xf32> to vector<8x8xf32>
    %486 = vector.extract_strided_slice %474 {offsets = [5, 0, 0], sizes = [1, 8, 8], strides = [1, 1, 1]} : vector<8x8x8xf32> to vector<1x8x8xf32>
    %487 = vector.shape_cast %486 : vector<1x8x8xf32> to vector<8x8xf32>
    %488 = vector.extract_strided_slice %474 {offsets = [6, 0, 0], sizes = [1, 8, 8], strides = [1, 1, 1]} : vector<8x8x8xf32> to vector<1x8x8xf32>
    %489 = vector.shape_cast %488 : vector<1x8x8xf32> to vector<8x8xf32>
    %490 = vector.extract_strided_slice %474 {offsets = [7, 0, 0], sizes = [1, 8, 8], strides = [1, 1, 1]} : vector<8x8x8xf32> to vector<1x8x8xf32>
    %491 = vector.shape_cast %490 : vector<1x8x8xf32> to vector<8x8xf32>
    %492 = tpu.concatenate %485, %487, %489, %491 in 1 : vector<8x8xf32>, vector<8x8xf32>, vector<8x8xf32>, vector<8x8xf32> -> vector<8x32xf32>
    %493 = tpu.concatenate %483, %492 in 0 : vector<8x32xf32>, vector<8x32xf32> -> vector<16x32xf32>
    %cst_172 = arith.constant dense<0.000000e+00> : vector<16x32xf32>
    %494 = tpu.matmul %493, %382, %cst_172 {dimension_numbers = #tpu.dot_dimension_numbers<[1], [0], [0], [1], [0, 0, 1, 1], [], []>} : vector<16x32xf32>, vector<32x32xf32>, vector<16x32xf32> -> vector<16x32xf32>
    %495 = vector.broadcast %383 : vector<1x32xf32> to vector<16x32xf32>
    %496 = arith.addf %494, %495 : vector<16x32xf32>
    %497 = arith.addf %17, %496 : vector<16x32xf32>
    %cst_173 = arith.constant dense<0.000000e+00> : vector<16xf32>
    %498 = vector.multi_reduction <add>, %497, %cst_173 [1] : vector<16x32xf32> to vector<16xf32>
    %499 = vector.shape_cast %498 : vector<16xf32> to vector<16x1xf32>
    %cst_174 = arith.constant 3.200000e+01 : f32
    %500 = vector.broadcast %cst_174 : f32 to vector<16x1xf32>
    %501 = arith.divf %499, %500 : vector<16x1xf32>
    %502 = vector.broadcast %501 : vector<16x1xf32> to vector<16x32xf32>
    %503 = arith.subf %497, %502 : vector<16x32xf32>
    %504 = arith.mulf %503, %503 : vector<16x32xf32>
    %cst_175 = arith.constant dense<0.000000e+00> : vector<16xf32>
    %505 = vector.multi_reduction <add>, %504, %cst_175 [1] : vector<16x32xf32> to vector<16xf32>
    %506 = vector.shape_cast %505 : vector<16xf32> to vector<16x1xf32>
    %cst_176 = arith.constant 3.200000e+01 : f32
    %507 = vector.broadcast %cst_176 : f32 to vector<16x1xf32>
    %508 = arith.divf %506, %507 : vector<16x1xf32>
    %509 = vector.broadcast %501 : vector<16x1xf32> to vector<16x32xf32>
    %510 = arith.subf %497, %509 : vector<16x32xf32>
    %cst_177 = arith.constant 9.99999974E-6 : f32
    %511 = vector.broadcast %cst_177 : f32 to vector<16x1xf32>
    %512 = arith.addf %508, %511 : vector<16x1xf32>
    %513 = math.rsqrt %512 : vector<16x1xf32>
    %514 = vector.broadcast %513 : vector<16x1xf32> to vector<16x32xf32>
    %515 = arith.mulf %510, %514 : vector<16x32xf32>
    %516 = vector.broadcast %390 : vector<1x32xf32> to vector<16x32xf32>
    %517 = arith.mulf %515, %516 : vector<16x32xf32>
    %518 = vector.broadcast %391 : vector<1x32xf32> to vector<16x32xf32>
    %519 = arith.addf %517, %518 : vector<16x32xf32>
    %cst_178 = arith.constant dense<0.000000e+00> : vector<16x32xf32>
    %520 = tpu.matmul %519, %384, %cst_178 {dimension_numbers = #tpu.dot_dimension_numbers<[1], [0], [0], [1], [0, 0, 1, 1], [], []>} : vector<16x32xf32>, vector<32x32xf32>, vector<16x32xf32> -> vector<16x32xf32>
    %521 = vector.broadcast %385 : vector<1x32xf32> to vector<16x32xf32>
    %522 = arith.addf %520, %521 : vector<16x32xf32>
    %cst_179 = arith.constant dense<0.000000e+00> : vector<16x64xf32>
    %523 = tpu.matmul %379, %386, %cst_179 {dimension_numbers = #tpu.dot_dimension_numbers<[1], [0], [0], [1], [0, 0, 1, 1], [], []>} : vector<16x32xf32>, vector<32x64xf32>, vector<16x64xf32> -> vector<16x64xf32>
    %524 = vector.broadcast %387 : vector<1x64xf32> to vector<16x64xf32>
    %525 = arith.addf %523, %524 : vector<16x64xf32>
    %526 = vector.extract_strided_slice %525 {offsets = [0, 0], sizes = [16, 32], strides = [1, 1]} : vector<16x64xf32> to vector<16x32xf32>
    %527 = vector.extract_strided_slice %525 {offsets = [0, 32], sizes = [16, 32], strides = [1, 1]} : vector<16x64xf32> to vector<16x32xf32>
    %528 = vector.extract_strided_slice %522 {offsets = [0, 0], sizes = [8, 8], strides = [1, 1]} : vector<16x32xf32> to vector<8x8xf32>
    %529 = vector.extract_strided_slice %522 {offsets = [0, 8], sizes = [8, 8], strides = [1, 1]} : vector<16x32xf32> to vector<8x8xf32>
    %530 = vector.extract_strided_slice %522 {offsets = [0, 16], sizes = [8, 8], strides = [1, 1]} : vector<16x32xf32> to vector<8x8xf32>
    %531 = vector.extract_strided_slice %522 {offsets = [0, 24], sizes = [8, 8], strides = [1, 1]} : vector<16x32xf32> to vector<8x8xf32>
    %532 = vector.extract_strided_slice %522 {offsets = [8, 0], sizes = [8, 8], strides = [1, 1]} : vector<16x32xf32> to vector<8x8xf32>
    %533 = vector.extract_strided_slice %522 {offsets = [8, 8], sizes = [8, 8], strides = [1, 1]} : vector<16x32xf32> to vector<8x8xf32>
    %534 = vector.extract_strided_slice %522 {offsets = [8, 16], sizes = [8, 8], strides = [1, 1]} : vector<16x32xf32> to vector<8x8xf32>
    %535 = vector.extract_strided_slice %522 {offsets = [8, 24], sizes = [8, 8], strides = [1, 1]} : vector<16x32xf32> to vector<8x8xf32>
    %536 = vector.shape_cast %528 : vector<8x8xf32> to vector<1x8x8xf32>
    %537 = vector.shape_cast %529 : vector<8x8xf32> to vector<1x8x8xf32>
    %538 = vector.shape_cast %530 : vector<8x8xf32> to vector<1x8x8xf32>
    %539 = vector.shape_cast %531 : vector<8x8xf32> to vector<1x8x8xf32>
    %540 = vector.shape_cast %532 : vector<8x8xf32> to vector<1x8x8xf32>
    %541 = vector.shape_cast %533 : vector<8x8xf32> to vector<1x8x8xf32>
    %542 = vector.shape_cast %534 : vector<8x8xf32> to vector<1x8x8xf32>
    %543 = vector.shape_cast %535 : vector<8x8xf32> to vector<1x8x8xf32>
    %544 = tpu.concatenate %536, %537, %538, %539, %540, %541, %542, %543 in 0 : vector<1x8x8xf32>, vector<1x8x8xf32>, vector<1x8x8xf32>, vector<1x8x8xf32>, vector<1x8x8xf32>, vector<1x8x8xf32>, vector<1x8x8xf32>, vector<1x8x8xf32> -> vector<8x8x8xf32>
    %545 = vector.extract_strided_slice %526 {offsets = [0, 0], sizes = [8, 8], strides = [1, 1]} : vector<16x32xf32> to vector<8x8xf32>
    %546 = vector.extract_strided_slice %526 {offsets = [0, 8], sizes = [8, 8], strides = [1, 1]} : vector<16x32xf32> to vector<8x8xf32>
    %547 = vector.extract_strided_slice %526 {offsets = [0, 16], sizes = [8, 8], strides = [1, 1]} : vector<16x32xf32> to vector<8x8xf32>
    %548 = vector.extract_strided_slice %526 {offsets = [0, 24], sizes = [8, 8], strides = [1, 1]} : vector<16x32xf32> to vector<8x8xf32>
    %549 = vector.extract_strided_slice %526 {offsets = [8, 0], sizes = [8, 8], strides = [1, 1]} : vector<16x32xf32> to vector<8x8xf32>
    %550 = vector.extract_strided_slice %526 {offsets = [8, 8], sizes = [8, 8], strides = [1, 1]} : vector<16x32xf32> to vector<8x8xf32>
    %551 = vector.extract_strided_slice %526 {offsets = [8, 16], sizes = [8, 8], strides = [1, 1]} : vector<16x32xf32> to vector<8x8xf32>
    %552 = vector.extract_strided_slice %526 {offsets = [8, 24], sizes = [8, 8], strides = [1, 1]} : vector<16x32xf32> to vector<8x8xf32>
    %553 = vector.shape_cast %545 : vector<8x8xf32> to vector<1x8x8xf32>
    %554 = vector.shape_cast %546 : vector<8x8xf32> to vector<1x8x8xf32>
    %555 = vector.shape_cast %547 : vector<8x8xf32> to vector<1x8x8xf32>
    %556 = vector.shape_cast %548 : vector<8x8xf32> to vector<1x8x8xf32>
    %557 = vector.shape_cast %549 : vector<8x8xf32> to vector<1x8x8xf32>
    %558 = vector.shape_cast %550 : vector<8x8xf32> to vector<1x8x8xf32>
    %559 = vector.shape_cast %551 : vector<8x8xf32> to vector<1x8x8xf32>
    %560 = vector.shape_cast %552 : vector<8x8xf32> to vector<1x8x8xf32>
    %561 = tpu.concatenate %553, %554, %555, %556, %557, %558, %559, %560 in 0 : vector<1x8x8xf32>, vector<1x8x8xf32>, vector<1x8x8xf32>, vector<1x8x8xf32>, vector<1x8x8xf32>, vector<1x8x8xf32>, vector<1x8x8xf32>, vector<1x8x8xf32> -> vector<8x8x8xf32>
    %562 = vector.extract_strided_slice %527 {offsets = [0, 0], sizes = [8, 8], strides = [1, 1]} : vector<16x32xf32> to vector<8x8xf32>
    %563 = vector.extract_strided_slice %527 {offsets = [0, 8], sizes = [8, 8], strides = [1, 1]} : vector<16x32xf32> to vector<8x8xf32>
    %564 = vector.extract_strided_slice %527 {offsets = [0, 16], sizes = [8, 8], strides = [1, 1]} : vector<16x32xf32> to vector<8x8xf32>
    %565 = vector.extract_strided_slice %527 {offsets = [0, 24], sizes = [8, 8], strides = [1, 1]} : vector<16x32xf32> to vector<8x8xf32>
    %566 = vector.extract_strided_slice %527 {offsets = [8, 0], sizes = [8, 8], strides = [1, 1]} : vector<16x32xf32> to vector<8x8xf32>
    %567 = vector.extract_strided_slice %527 {offsets = [8, 8], sizes = [8, 8], strides = [1, 1]} : vector<16x32xf32> to vector<8x8xf32>
    %568 = vector.extract_strided_slice %527 {offsets = [8, 16], sizes = [8, 8], strides = [1, 1]} : vector<16x32xf32> to vector<8x8xf32>
    %569 = vector.extract_strided_slice %527 {offsets = [8, 24], sizes = [8, 8], strides = [1, 1]} : vector<16x32xf32> to vector<8x8xf32>
    %570 = vector.shape_cast %562 : vector<8x8xf32> to vector<1x8x8xf32>
    %571 = vector.shape_cast %563 : vector<8x8xf32> to vector<1x8x8xf32>
    %572 = vector.shape_cast %564 : vector<8x8xf32> to vector<1x8x8xf32>
    %573 = vector.shape_cast %565 : vector<8x8xf32> to vector<1x8x8xf32>
    %574 = vector.shape_cast %566 : vector<8x8xf32> to vector<1x8x8xf32>
    %575 = vector.shape_cast %567 : vector<8x8xf32> to vector<1x8x8xf32>
    %576 = vector.shape_cast %568 : vector<8x8xf32> to vector<1x8x8xf32>
    %577 = vector.shape_cast %569 : vector<8x8xf32> to vector<1x8x8xf32>
    %578 = tpu.concatenate %570, %571, %572, %573, %574, %575, %576, %577 in 0 : vector<1x8x8xf32>, vector<1x8x8xf32>, vector<1x8x8xf32>, vector<1x8x8xf32>, vector<1x8x8xf32>, vector<1x8x8xf32>, vector<1x8x8xf32>, vector<1x8x8xf32> -> vector<8x8x8xf32>
    "tpu.trace_start"() <{level = 10 : i32, message = "bqd,bkd->bqk"}> : () -> ()
    %cst_180 = arith.constant dense<0.000000e+00> : vector<8x8x8xf32>
    %579 = tpu.matmul %544, %561, %cst_180 {dimension_numbers = #tpu.dot_dimension_numbers<[2], [2], [1], [1], [0, 0, 0, 1, 1, 1], [0], [0]>} : vector<8x8x8xf32>, vector<8x8x8xf32>, vector<8x8x8xf32> -> vector<8x8x8xf32>
    "tpu.trace_stop"() : () -> ()
    %cst_181 = arith.constant 0.353553385 : f32
    %580 = vector.broadcast %cst_181 : f32 to vector<8x8x8xf32>
    %581 = arith.mulf %579, %580 : vector<8x8x8xf32>
    %cst_182 = arith.constant dense<0xFF800000> : vector<8x8xf32>
    %582 = vector.multi_reduction <maximumf>, %581, %cst_182 [2] : vector<8x8x8xf32> to vector<8x8xf32>
    %583 = vector.shape_cast %582 : vector<8x8xf32> to vector<8x8x1xf32>
    %584 = vector.broadcast %583 : vector<8x8x1xf32> to vector<8x8x8xf32>
    %585 = arith.subf %581, %584 : vector<8x8x8xf32>
    %586 = math.exp %585 : vector<8x8x8xf32>
    %cst_183 = arith.constant dense<0.000000e+00> : vector<8x8xf32>
    %587 = vector.multi_reduction <add>, %586, %cst_183 [2] : vector<8x8x8xf32> to vector<8x8xf32>
    %588 = vector.shape_cast %587 : vector<8x8xf32> to vector<8x8x1xf32>
    %589 = vector.broadcast %588 : vector<8x8x1xf32> to vector<8x8x8xf32>
    %590 = arith.divf %586, %589 : vector<8x8x8xf32>
    "tpu.trace_start"() <{level = 10 : i32, message = "bqk,bkd->bqd"}> : () -> ()
    %cst_184 = arith.constant dense<0.000000e+00> : vector<8x8x8xf32>
    %591 = tpu.matmul %590, %578, %cst_184 {dimension_numbers = #tpu.dot_dimension_numbers<[2], [1], [1], [2], [0, 0, 0, 1, 1, 2], [0], [0]>} : vector<8x8x8xf32>, vector<8x8x8xf32>, vector<8x8x8xf32> -> vector<8x8x8xf32>
    "tpu.trace_stop"() : () -> ()
    %592 = vector.extract_strided_slice %591 {offsets = [0, 0, 0], sizes = [1, 8, 8], strides = [1, 1, 1]} : vector<8x8x8xf32> to vector<1x8x8xf32>
    %593 = vector.shape_cast %592 : vector<1x8x8xf32> to vector<8x8xf32>
    %594 = vector.extract_strided_slice %591 {offsets = [1, 0, 0], sizes = [1, 8, 8], strides = [1, 1, 1]} : vector<8x8x8xf32> to vector<1x8x8xf32>
    %595 = vector.shape_cast %594 : vector<1x8x8xf32> to vector<8x8xf32>
    %596 = vector.extract_strided_slice %591 {offsets = [2, 0, 0], sizes = [1, 8, 8], strides = [1, 1, 1]} : vector<8x8x8xf32> to vector<1x8x8xf32>
    %597 = vector.shape_cast %596 : vector<1x8x8xf32> to vector<8x8xf32>
    %598 = vector.extract_strided_slice %591 {offsets = [3, 0, 0], sizes = [1, 8, 8], strides = [1, 1, 1]} : vector<8x8x8xf32> to vector<1x8x8xf32>
    %599 = vector.shape_cast %598 : vector<1x8x8xf32> to vector<8x8xf32>
    %600 = tpu.concatenate %593, %595, %597, %599 in 1 : vector<8x8xf32>, vector<8x8xf32>, vector<8x8xf32>, vector<8x8xf32> -> vector<8x32xf32>
    %601 = vector.extract_strided_slice %591 {offsets = [4, 0, 0], sizes = [1, 8, 8], strides = [1, 1, 1]} : vector<8x8x8xf32> to vector<1x8x8xf32>
    %602 = vector.shape_cast %601 : vector<1x8x8xf32> to vector<8x8xf32>
    %603 = vector.extract_strided_slice %591 {offsets = [5, 0, 0], sizes = [1, 8, 8], strides = [1, 1, 1]} : vector<8x8x8xf32> to vector<1x8x8xf32>
    %604 = vector.shape_cast %603 : vector<1x8x8xf32> to vector<8x8xf32>
    %605 = vector.extract_strided_slice %591 {offsets = [6, 0, 0], sizes = [1, 8, 8], strides = [1, 1, 1]} : vector<8x8x8xf32> to vector<1x8x8xf32>
    %606 = vector.shape_cast %605 : vector<1x8x8xf32> to vector<8x8xf32>
    %607 = vector.extract_strided_slice %591 {offsets = [7, 0, 0], sizes = [1, 8, 8], strides = [1, 1, 1]} : vector<8x8x8xf32> to vector<1x8x8xf32>
    %608 = vector.shape_cast %607 : vector<1x8x8xf32> to vector<8x8xf32>
    %609 = tpu.concatenate %602, %604, %606, %608 in 1 : vector<8x8xf32>, vector<8x8xf32>, vector<8x8xf32>, vector<8x8xf32> -> vector<8x32xf32>
    %610 = tpu.concatenate %600, %609 in 0 : vector<8x32xf32>, vector<8x32xf32> -> vector<16x32xf32>
    %cst_185 = arith.constant dense<0.000000e+00> : vector<16x32xf32>
    %611 = tpu.matmul %610, %388, %cst_185 {dimension_numbers = #tpu.dot_dimension_numbers<[1], [0], [0], [1], [0, 0, 1, 1], [], []>} : vector<16x32xf32>, vector<32x32xf32>, vector<16x32xf32> -> vector<16x32xf32>
    %612 = vector.broadcast %389 : vector<1x32xf32> to vector<16x32xf32>
    %613 = arith.addf %611, %612 : vector<16x32xf32>
    %614 = arith.addf %519, %613 : vector<16x32xf32>
    %cst_186 = arith.constant dense<0.000000e+00> : vector<16xf32>
    %615 = vector.multi_reduction <add>, %614, %cst_186 [1] : vector<16x32xf32> to vector<16xf32>
    %616 = vector.shape_cast %615 : vector<16xf32> to vector<16x1xf32>
    %cst_187 = arith.constant 3.200000e+01 : f32
    %617 = vector.broadcast %cst_187 : f32 to vector<16x1xf32>
    %618 = arith.divf %616, %617 : vector<16x1xf32>
    %619 = vector.broadcast %618 : vector<16x1xf32> to vector<16x32xf32>
    %620 = arith.subf %614, %619 : vector<16x32xf32>
    %621 = arith.mulf %620, %620 : vector<16x32xf32>
    %cst_188 = arith.constant dense<0.000000e+00> : vector<16xf32>
    %622 = vector.multi_reduction <add>, %621, %cst_188 [1] : vector<16x32xf32> to vector<16xf32>
    %623 = vector.shape_cast %622 : vector<16xf32> to vector<16x1xf32>
    %cst_189 = arith.constant 3.200000e+01 : f32
    %624 = vector.broadcast %cst_189 : f32 to vector<16x1xf32>
    %625 = arith.divf %623, %624 : vector<16x1xf32>
    %626 = vector.broadcast %618 : vector<16x1xf32> to vector<16x32xf32>
    %627 = arith.subf %614, %626 : vector<16x32xf32>
    %cst_190 = arith.constant 9.99999974E-6 : f32
    %628 = vector.broadcast %cst_190 : f32 to vector<16x1xf32>
    %629 = arith.addf %625, %628 : vector<16x1xf32>
    %630 = math.rsqrt %629 : vector<16x1xf32>
    %631 = vector.broadcast %630 : vector<16x1xf32> to vector<16x32xf32>
    %632 = arith.mulf %627, %631 : vector<16x32xf32>
    %633 = vector.broadcast %392 : vector<1x32xf32> to vector<16x32xf32>
    %634 = arith.mulf %632, %633 : vector<16x32xf32>
    %635 = vector.broadcast %393 : vector<1x32xf32> to vector<16x32xf32>
    %636 = arith.addf %634, %635 : vector<16x32xf32>
    %cst_191 = arith.constant dense<0.000000e+00> : vector<16x32xf32>
    %637 = tpu.matmul %636, %396, %cst_191 {dimension_numbers = #tpu.dot_dimension_numbers<[1], [0], [0], [1], [0, 0, 1, 1], [], []>} : vector<16x32xf32>, vector<32x32xf32>, vector<16x32xf32> -> vector<16x32xf32>
    %638 = vector.broadcast %397 : vector<1x32xf32> to vector<16x32xf32>
    %639 = arith.addf %637, %638 : vector<16x32xf32>
    %cst_192 = arith.constant 5.000000e-01 : f32
    %640 = vector.broadcast %cst_192 : f32 to vector<16x32xf32>
    %641 = arith.mulf %640, %639 : vector<16x32xf32>
    %cst_193 = arith.constant 4.471500e-02 : f32
    %642 = vector.broadcast %cst_193 : f32 to vector<16x32xf32>
    %643 = arith.mulf %642, %639 : vector<16x32xf32>
    %644 = arith.mulf %643, %639 : vector<16x32xf32>
    %645 = arith.mulf %644, %639 : vector<16x32xf32>
    %646 = arith.addf %639, %645 : vector<16x32xf32>
    %cst_194 = arith.constant 0.797884583 : f32
    %647 = vector.broadcast %cst_194 : f32 to vector<16x32xf32>
    %648 = arith.mulf %647, %646 : vector<16x32xf32>
    %649 = math.tanh %648 : vector<16x32xf32>
    %cst_195 = arith.constant 1.000000e+00 : f32
    %650 = vector.broadcast %cst_195 : f32 to vector<16x32xf32>
    %651 = arith.addf %650, %649 : vector<16x32xf32>
    %652 = arith.mulf %641, %651 : vector<16x32xf32>
    %cst_196 = arith.constant dense<0.000000e+00> : vector<16x32xf32>
    %653 = tpu.matmul %652, %398, %cst_196 {dimension_numbers = #tpu.dot_dimension_numbers<[1], [0], [0], [1], [0, 0, 1, 1], [], []>} : vector<16x32xf32>, vector<32x32xf32>, vector<16x32xf32> -> vector<16x32xf32>
    %654 = vector.broadcast %399 : vector<1x32xf32> to vector<16x32xf32>
    %655 = arith.addf %653, %654 : vector<16x32xf32>
    %656 = arith.addf %636, %655 : vector<16x32xf32>
    %cst_197 = arith.constant dense<0.000000e+00> : vector<16xf32>
    %657 = vector.multi_reduction <add>, %656, %cst_197 [1] : vector<16x32xf32> to vector<16xf32>
    %658 = vector.shape_cast %657 : vector<16xf32> to vector<16x1xf32>
    %cst_198 = arith.constant 3.200000e+01 : f32
    %659 = vector.broadcast %cst_198 : f32 to vector<16x1xf32>
    %660 = arith.divf %658, %659 : vector<16x1xf32>
    %661 = vector.broadcast %660 : vector<16x1xf32> to vector<16x32xf32>
    %662 = arith.subf %656, %661 : vector<16x32xf32>
    %663 = arith.mulf %662, %662 : vector<16x32xf32>
    %cst_199 = arith.constant dense<0.000000e+00> : vector<16xf32>
    %664 = vector.multi_reduction <add>, %663, %cst_199 [1] : vector<16x32xf32> to vector<16xf32>
    %665 = vector.shape_cast %664 : vector<16xf32> to vector<16x1xf32>
    %cst_200 = arith.constant 3.200000e+01 : f32
    %666 = vector.broadcast %cst_200 : f32 to vector<16x1xf32>
    %667 = arith.divf %665, %666 : vector<16x1xf32>
    %668 = vector.broadcast %660 : vector<16x1xf32> to vector<16x32xf32>
    %669 = arith.subf %656, %668 : vector<16x32xf32>
    %cst_201 = arith.constant 9.99999974E-6 : f32
    %670 = vector.broadcast %cst_201 : f32 to vector<16x1xf32>
    %671 = arith.addf %667, %670 : vector<16x1xf32>
    %672 = math.rsqrt %671 : vector<16x1xf32>
    %673 = vector.broadcast %672 : vector<16x1xf32> to vector<16x32xf32>
    %674 = arith.mulf %669, %673 : vector<16x32xf32>
    %675 = vector.broadcast %394 : vector<1x32xf32> to vector<16x32xf32>
    %676 = arith.mulf %674, %675 : vector<16x32xf32>
    %677 = vector.broadcast %395 : vector<1x32xf32> to vector<16x32xf32>
    %678 = arith.addf %676, %677 : vector<16x32xf32>
    %c0_202 = arith.constant 0 : index
    %c0_203 = arith.constant 0 : index
    %679 = vector.load %arg56[%c0_202, %c0_203] : memref<1x32xf32, #tpu.memory_space<vmem>>, vector<1x32xf32>
    %c0_204 = arith.constant 0 : index
    %c0_205 = arith.constant 0 : index
    %680 = vector.load %arg57[%c0_204, %c0_205] : memref<1x32xf32, #tpu.memory_space<vmem>>, vector<1x32xf32>
    %c0_206 = arith.constant 0 : index
    %c0_207 = arith.constant 0 : index
    %681 = vector.load %arg58[%c0_206, %c0_207] : memref<32x4xf32, #tpu.memory_space<vmem>>, vector<32x4xf32>
    %c0_208 = arith.constant 0 : index
    %c0_209 = arith.constant 0 : index
    %682 = vector.load %arg59[%c0_208, %c0_209] : memref<1x4xf32, #tpu.memory_space<vmem>>, vector<1x4xf32>
    %683 = vector.extract_strided_slice %678 {offsets = [4, 0], sizes = [4, 32], strides = [1, 1]} : vector<16x32xf32> to vector<4x32xf32>
    %684 = vector.extract_strided_slice %678 {offsets = [12, 0], sizes = [4, 32], strides = [1, 1]} : vector<16x32xf32> to vector<4x32xf32>
    %685 = tpu.concatenate %683, %684 in 0 : vector<4x32xf32>, vector<4x32xf32> -> vector<8x32xf32>
    %cst_210 = arith.constant dense<0.000000e+00> : vector<8xf32>
    %686 = vector.multi_reduction <add>, %685, %cst_210 [1] : vector<8x32xf32> to vector<8xf32>
    %687 = vector.shape_cast %686 : vector<8xf32> to vector<8x1xf32>
    %cst_211 = arith.constant 3.200000e+01 : f32
    %688 = vector.broadcast %cst_211 : f32 to vector<8x1xf32>
    %689 = arith.divf %687, %688 : vector<8x1xf32>
    %690 = vector.broadcast %689 : vector<8x1xf32> to vector<8x32xf32>
    %691 = arith.subf %685, %690 : vector<8x32xf32>
    %692 = arith.mulf %691, %691 : vector<8x32xf32>
    %cst_212 = arith.constant dense<0.000000e+00> : vector<8xf32>
    %693 = vector.multi_reduction <add>, %692, %cst_212 [1] : vector<8x32xf32> to vector<8xf32>
    %694 = vector.shape_cast %693 : vector<8xf32> to vector<8x1xf32>
    %cst_213 = arith.constant 3.200000e+01 : f32
    %695 = vector.broadcast %cst_213 : f32 to vector<8x1xf32>
    %696 = arith.divf %694, %695 : vector<8x1xf32>
    %697 = vector.broadcast %689 : vector<8x1xf32> to vector<8x32xf32>
    %698 = arith.subf %685, %697 : vector<8x32xf32>
    %cst_214 = arith.constant 9.99999974E-6 : f32
    %699 = vector.broadcast %cst_214 : f32 to vector<8x1xf32>
    %700 = arith.addf %696, %699 : vector<8x1xf32>
    %701 = math.rsqrt %700 : vector<8x1xf32>
    %702 = vector.broadcast %701 : vector<8x1xf32> to vector<8x32xf32>
    %703 = arith.mulf %698, %702 : vector<8x32xf32>
    %704 = vector.broadcast %679 : vector<1x32xf32> to vector<8x32xf32>
    %705 = arith.mulf %703, %704 : vector<8x32xf32>
    %706 = vector.broadcast %680 : vector<1x32xf32> to vector<8x32xf32>
    %707 = arith.addf %705, %706 : vector<8x32xf32>
    %cst_215 = arith.constant dense<0.000000e+00> : vector<8x4xf32>
    %708 = tpu.matmul %707, %681, %cst_215 {dimension_numbers = #tpu.dot_dimension_numbers<[1], [0], [0], [1], [0, 0, 1, 1], [], []>} : vector<8x32xf32>, vector<32x4xf32>, vector<8x4xf32> -> vector<8x4xf32>
    %709 = vector.broadcast %682 : vector<1x4xf32> to vector<8x4xf32>
    %710 = arith.addf %708, %709 : vector<8x4xf32>
    %c0_216 = arith.constant 0 : index
    %c0_217 = arith.constant 0 : index
    %711 = vector.load %arg60[%c0_216, %c0_217] : memref<8x4xf32, #tpu.memory_space<vmem>>, vector<8x4xf32>
    tpu.vector_store %arg60[%c0_216, %c0_217], %710 {strides = array<i32>} : memref<8x4xf32, #tpu.memory_space<vmem>>, vector<8x4xf32>,
    return
  }
}

</mosaic_0001>

<bundles_post_ra>
// kernel: transformer_forecast.1
= control target key start
LH: loop header
LB: loop body
LE: loop exit
PB: predicated region body
PF: predicated region fallthrough
CT: control target
= control target key end

     0   :  { %s9885_s6 = smov 1   ;;  %s9886_s10 = smov 2   ;;  %s11292_s0 = inlined_call_operand.smem [shape: u32[61], index: -1, kind: input, shape index: {}] }
   0x1   :  { %s9983_s5 = sld [smem:[%s11292_s0]]   ;;  %s9887_s14 = smov 3  }
   0x2   :  { %s9988_s9 = sld [smem:[%s11292_s0 + %s9885_s6]]   ;;  %s9888_s18 = smov 4  }
   0x3   :  { %s9993_s13 = sld [smem:[%s11292_s0 + %s9886_s10]]   ;;  %s9889_s22 = smov 5  }
   0x4   :  { %s9998_s17 = sld [smem:[%s11292_s0 + %s9887_s14]]   ;;  %s9890_s26 = smov 6  }
   0x5   :  { %s10003_s21 = sld [smem:[%s11292_s0 + %s9888_s18]]   ;;  %s9891_s30 = smov 7  }
   0x6   :  { %s10008_s25 = sld [smem:[%s11292_s0 + %s9889_s22]]   ;;  %s9892_s4 = smov 8  }
   0x7   :  { %11316 = sst [smem:[#allocation44_spill]] %s9983_s5  ;;  %s9893_s10 = smov 9  }
   0x8   :  { %11317 = sst [smem:[#allocation45_spill]] %s9988_s9  ;;  %s9894_s15 = smov 10  }
   0x9   :  { %11318 = sst [smem:[#allocation46_spill]] %s9993_s13  ;;  %s9895_s20 = smov 11  }
   0xa   :  { %11319 = sst [smem:[#allocation47_spill]] %s9998_s17  ;;  %s9897_s1 = smov 13  }
   0xb   :  { %11320 = sst [smem:[#allocation48_spill]] %s10003_s21  ;;  %s9898_s7 = smov 14  }
   0xc   :  { %11321 = sst [smem:[#allocation49_spill]] %s10008_s25  ;;  %s9900_s22 = smov 16  }
   0xd   :  { %s10013_s29 = sld [smem:[%s11292_s0 + %s9890_s26]]   ;;  %s9896_s26 = smov 12  }
   0xe   :  { %s10018_s3 = sld [smem:[%s11292_s0 + %s9891_s30]]   ;;  %s9901_s28 = smov 17  }
   0xf   :  { %s10023_s8 = sld [smem:[%s11292_s0 + %s9892_s4]]  }
  0x10   :  { %s10028_s14 = sld [smem:[%s11292_s0 + %s9893_s10]]  }
  0x11   :  { %s10033_s19 = sld [smem:[%s11292_s0 + %s9894_s15]]   ;;  %s9899_s15 = smov 15  }
  0x12   :  { %s10038_s24 = sld [smem:[%s11292_s0 + %s9895_s20]]  }
  0x13   :  { %11322 = sst [smem:[#allocation50_spill]] %s10013_s29 }
  0x14   :  { %11323 = sst [smem:[#allocation51_spill]] %s10018_s3 }
  0x15   :  { %11324 = sst [smem:[#allocation52_spill]] %s10023_s8 }
  0x16   :  { %11325 = sst [smem:[#allocation53_spill]] %s10028_s14 }
  0x17   :  { %11326 = sst [smem:[#allocation54_spill]] %s10033_s19 }
  0x18   :  { %s10043_s30 = sld [smem:[%s11292_s0 + %s9896_s26]]  }
  0x19   :  { %s10048_s6 = sld [smem:[%s11292_s0 + %s9897_s1]]  }
  0x1a   :  { %s10053_s12 = sld [smem:[%s11292_s0 + %s9898_s7]]   ;;  %s9902_s7 = smov 18  }
  0x1b   :  { %s10058_s20 = sld [smem:[%s11292_s0 + %s9899_s15]]   ;;  %s9903_s15 = smov 19  }
  0x1c   :  { %s10063_s27 = sld [smem:[%s11292_s0 + %s9900_s22]]   ;;  %s9904_s22 = smov 20  }
  0x1d   :  { %s10068_s4 = sld [smem:[%s11292_s0 + %s9901_s28]]   ;;  %s9905_s28 = smov 21  }
  0x1e   :  { %11327 = sst [smem:[#allocation55_spill]] %s10043_s30 }
  0x1f   :  { %11328 = sst [smem:[#allocation56_spill]] %s10048_s6 }
  0x20   :  { %s10073_s25 = sld [smem:[%s11292_s0 + %s9902_s7]]   ;;  %s9906_s7 = smov 22  }
  0x21   :  { %s10078_s6 = sld [smem:[%s11292_s0 + %s9903_s15]]   ;;  %s9907_s15 = smov 23  }
  0x22   :  { %11329 = sst [smem:[#allocation57_spill]] %s10063_s27 }
  0x23   :  { %11330 = sst [smem:[#allocation58_spill]] %s10068_s4 }
  0x24   :  { %s10083_s27 = sld [smem:[%s11292_s0 + %s9904_s22]]   ;;  %s9908_s22 = smov 24  }
  0x25   :  { %s10088_s4 = sld [smem:[%s11292_s0 + %s9905_s28]]   ;;  %s9909_s28 = smov 25  }
  0x26   :  { %11331 = sst [smem:[#allocation59_spill]] %s10073_s25 }
  0x27   :  { %s10093_s25 = sld [smem:[%s11292_s0 + %s9906_s7]]   ;;  %s9910_s7 = smov 26  }
  0x28   :  { %s10098_s30 = sld [smem:[%s11292_s0 + %s9907_s15]]   ;;  %s9911_s15 = smov 27  }
  0x29   :  { %s10103_s13 = sld [smem:[%s11292_s0 + %s9908_s22]]   ;;  %s9912_s22 = smov 28  }
  0x2a   :  { %s10108_s19 = sld [smem:[%s11292_s0 + %s9909_s28]]   ;;  %s9913_s28 = smov 29  }
  0x2b   :  { %s10118_s17 = sld [smem:[%s11292_s0 + %s9911_s15]]   ;;  %s9915_s15 = smov 31  }
  0x2c   :  { %s10128_s21 = sld [smem:[%s11292_s0 + %s9913_s28]]   ;;  %s9917_s28 = smov 33  }
  0x2d   :  { %11332 = sst [smem:[#allocation60_spill]] %s10093_s25 }
  0x2e   :  { %s10113_s25 = sld [smem:[%s11292_s0 + %s9910_s7]]   ;;  %s9914_s7 = smov 30  }
  0x2f   :  { %11333 = sst [smem:[#allocation61_spill]] %s10103_s13 }
  0x30   :  { %s10123_s13 = sld [smem:[%s11292_s0 + %s9912_s22]]   ;;  %s9916_s22 = smov 32  }
  0x31   :  { %s10133_s8 = sld [smem:[%s11292_s0 + %s9914_s7]]   ;;  %s9918_s7 = smov 34  }
  0x32   :  { %s10138_s14 = sld [smem:[%s11292_s0 + %s9915_s15]]   ;;  %s9919_s15 = smov 35  }
  0x33   :  { %s10148_s5 = sld [smem:[%s11292_s0 + %s9917_s28]]   ;;  %s9921_s28 = smov 37  }
  0x34   :  { %s10158_s9 = sld [smem:[%s11292_s0 + %s9919_s15]]   ;;  %s9923_s15 = smov 39  }
  0x35   :  { %s10168_s3 = sld [smem:[%s11292_s0 + %s9921_s28]]   ;;  %s9925_s28 = smov 41  }
  0x36   :  { %11334 = sst [smem:[#allocation62_spill]] %s10123_s13 }
  0x37   :  { %11335 = sst [smem:[#allocation63_spill]] %s10133_s8 }
  0x38   :  { %s10143_s13 = sld [smem:[%s11292_s0 + %s9916_s22]]   ;;  %s9920_s22 = smov 36  }
  0x39   :  { %s10153_s8 = sld [smem:[%s11292_s0 + %s9918_s7]]   ;;  %s9922_s7 = smov 38  }
  0x3a   :  { %s10163_s29 = sld [smem:[%s11292_s0 + %s9920_s22]]   ;;  %s9924_s22 = smov 40  }
  0x3b   :  { %11339 = sst [smem:[#allocation67_spill]] %s10168_s3 }
  0x3c   :  { %s10188_s3 = sld [smem:[%s11292_s0 + %s9925_s28]]   ;;  %s9929_s28 = smov 45  }
  0x3e   :  { %11336 = sst [smem:[#allocation64_spill]] %s10143_s13 }
  0x3f   :  { %11337 = sst [smem:[#allocation65_spill]] %s10153_s8 }
  0x40   :  { %11338 = sst [smem:[#allocation66_spill]] %s10163_s29 }
  0x41   :  { %s10173_s8 = sld [smem:[%s11292_s0 + %s9922_s7]]   ;;  %s9926_s7 = smov 42  }
  0x42   :  { %s10178_s13 = sld [smem:[%s11292_s0 + %s9923_s15]]   ;;  %s9927_s15 = smov 43  }
  0x43   :  { %s10183_s29 = sld [smem:[%s11292_s0 + %s9924_s22]]   ;;  %s9928_s22 = smov 44  }
  0x44   :  { %11343 = sst [smem:[#allocation71_spill]] %s10188_s3 }
  0x45   :  { %s10208_s3 = sld [smem:[%s11292_s0 + %s9929_s28]]   ;;  %s9933_s28 = smov 49  }
  0x47   :  { %11340 = sst [smem:[#allocation68_spill]] %s10173_s8 }
  0x48   :  { %11341 = sst [smem:[#allocation69_spill]] %s10178_s13 }
  0x49   :  { %11342 = sst [smem:[#allocation70_spill]] %s10183_s29 }
  0x4a   :  { %s10193_s8 = sld [smem:[%s11292_s0 + %s9926_s7]]   ;;  %s9930_s7 = smov 46  }
  0x4b   :  { %s10198_s13 = sld [smem:[%s11292_s0 + %s9927_s15]]   ;;  %s9931_s15 = smov 47  }
  0x4c   :  { %s10203_s29 = sld [smem:[%s11292_s0 + %s9928_s22]]   ;;  %s9932_s22 = smov 48  }
  0x4d   :  { %11347 = sst [smem:[#allocation75_spill]] %s10208_s3 }
  0x4e   :  { %s10228_s3 = sld [smem:[%s11292_s0 + %s9933_s28]]   ;;  %s9937_s28 = smov 53  }
  0x50   :  { %11344 = sst [smem:[#allocation72_spill]] %s10193_s8 }
  0x51   :  { %11345 = sst [smem:[#allocation73_spill]] %s10198_s13 }
  0x52   :  { %11346 = sst [smem:[#allocation74_spill]] %s10203_s29 }
  0x53   :  { %s10213_s8 = sld [smem:[%s11292_s0 + %s9930_s7]]   ;;  %s9934_s7 = smov 50  }
  0x54   :  { %s10218_s13 = sld [smem:[%s11292_s0 + %s9931_s15]]   ;;  %s9935_s15 = smov 51  }
  0x55   :  { %s10223_s29 = sld [smem:[%s11292_s0 + %s9932_s22]]   ;;  %s9936_s22 = smov 52  }
  0x56   :  { %11351 = sst [smem:[#allocation79_spill]] %s10228_s3 }
  0x57   :  { %s10248_s3 = sld [smem:[%s11292_s0 + %s9937_s28]]   ;;  %s9941_s28 = smov 57  }
  0x59   :  { %11348 = sst [smem:[#allocation76_spill]] %s10213_s8 }
  0x5a   :  { %11349 = sst [smem:[#allocation77_spill]] %s10218_s13 }
  0x5b   :  { %11350 = sst [smem:[#allocation78_spill]] %s10223_s29 }
  0x5c   :  { %s10233_s8 = sld [smem:[%s11292_s0 + %s9934_s7]]   ;;  %s9938_s7 = smov 54  }
  0x5d   :  { %s10238_s13 = sld [smem:[%s11292_s0 + %s9935_s15]]   ;;  %s9939_s15 = smov 55  }
  0x5e   :  { %s10243_s29 = sld [smem:[%s11292_s0 + %s9936_s22]]   ;;  %s9940_s22 = smov 56  }
  0x5f   :  { %11355 = sst [smem:[#allocation83_spill]] %s10248_s3 }
  0x60   :  { %s10268_s3 = sld [smem:[%s11292_s0 + %s9941_s28]]  }
  0x62   :  { %11352 = sst [smem:[#allocation80_spill]] %s10233_s8 }
  0x63   :  { %11353 = sst [smem:[#allocation81_spill]] %s10238_s13 }
  0x64   :  { %11354 = sst [smem:[#allocation82_spill]] %s10243_s29 }
  0x65   :  { %s10253_s8 = sld [smem:[%s11292_s0 + %s9938_s7]]   ;;  %s9942_s7 = smov 58  }
  0x66   :  { %s10258_s13 = sld [smem:[%s11292_s0 + %s9939_s15]]   ;;  %s9943_s15 = smov 59  }
  0x67   :  { %s10263_s29 = sld [smem:[%s11292_s0 + %s9940_s22]]   ;;  %s9944_s22 = smov 60  }
  0x6b   :  { %11356 = sst [smem:[#allocation84_spill]] %s10253_s8 }
  0x6c   :  { %11357 = sst [smem:[#allocation85_spill]] %s10258_s13 }
  0x6d   :  { %11358 = sst [smem:[#allocation86_spill]] %s10263_s29 }
  0x6e   :  { %s10273_s8 = sld [smem:[%s11292_s0 + %s9942_s7]]  }
  0x6f   :  { %s10278_s13 = sld [smem:[%s11292_s0 + %s9943_s15]]  }
  0x70   :  { %s10283_s29 = sld [smem:[%s11292_s0 + %s9944_s22]]  }
  0x71   :  { %126 = vsyncpa [#allocation3], 0 }
  0x72   :  { %127 = vsyncpa [#allocation6], 0 }
  0x73   :  { %128 = vsyncpa [#allocation9], 0 }
  0x74   :  { %129 = vsyncpa [#allocation12], 0 }
  0x75   :  { %130 = vsyncpa [#allocation15], 0 }
  0x76   :  { %131 = vsyncpa [#allocation18], 0 }
  0x77   :  { %132 = vsyncpa [#allocation21], 0 }
  0x78   :  { %133 = vsyncpa [#allocation24], 0 }
  0x79   :  { %134 = vsyncpa [#allocation27], 0 }
  0x7a   :  { %135 = vsyncpa [#allocation30], 0 }
  0x7b   :  { %136 = vsyncpa [#allocation4], 0  ;;  %s9945_s28 = smov [#allocation5]   ;;  %s9946_s2 = smov [#allocation8]  }
  0x7c   :  { %s179_s1 = sshll.u32 %s9945_s28, 4  ;;  %s205_s7 = sshll.u32 %s9946_s2, 4  ;;  %s180_s1 = int_to_ptr.vmem [resolvable:$true] %s179_s1  ;;  %s206_s7 = int_to_ptr.vmem [resolvable:$true] %s205_s7 }
  0x7d   :  { %s9471_s10 = scalar_lea.vmem %s180_s1, 16  ;;  %s9475_s0 = scalar_lea.vmem %s180_s1, 32 }
  0x7e   :  { %p9472_p0 = scmp.ne.s32.totalorder %s180_s1, %s9471_s10  ;;  %p9476_p1 = scmp.lt.s32.totalorder %s180_s1, %s180_s1 }
  0x7f   :  { %p9477_p2 = scmp.lt.s32.totalorder %s9475_s0, %s9471_s10 }
  0x81   :  { %p9478_p3 = por %p9477_p2, %p9476_p1 }
  0x83   :  { %p9479_p4 = pnand %p9478_p3, %p9472_p0 }
  0x85   :  { %9482 = shalt.err (!%p9479_p4)
}
  0x86   :  { %182 = dma.hbm_to_vmem [thread:$0]  %s10053_s12, 16, %s180_s1, [#allocation6]  }
  0x87   :  { %s9491_s11 = scalar_lea.vmem %s206_s7, 16  ;;  %s9495_s15 = scalar_lea.vmem %s206_s7, 32 }
  0x88   :  { %p9492_p5 = scmp.ne.s32.totalorder %s206_s7, %s9491_s11  ;;  %p9496_p6 = scmp.lt.s32.totalorder %s206_s7, %s206_s7 }
  0x89   :  { %p9497_p7 = scmp.lt.s32.totalorder %s9495_s15, %s9491_s11 }
  0x8b   :  { %p9498_p8 = por %p9497_p7, %p9496_p6 }
  0x8d   :  { %p9499_p9 = pnand %p9498_p8, %p9492_p5 }
  0x8f   :  { %9502 = shalt.err (!%p9499_p9)
}
  0x90   :  { %208 = dma.hbm_to_vmem [thread:$0]  %s10078_s6, 16, %s206_s7, [#allocation9]  }
  0x91   :  { %s9947_s16 = smov [#allocation11]   ;;  %s9948_s22 = smov [#allocation14]  }
  0x92   :  { %s225_s18 = sshll.u32 %s9947_s16, 4  ;;  %s249_s23 = sshll.u32 %s9948_s22, 4  ;;  %s226_s18 = int_to_ptr.vmem [resolvable:$true] %s225_s18  ;;  %s250_s23 = int_to_ptr.vmem [resolvable:$true] %s249_s23 }
  0x93   :  { %s9511_s26 = scalar_lea.vmem %s226_s18, 16  ;;  %s9515_s28 = scalar_lea.vmem %s226_s18, 32 }
  0x94   :  { %p9512_p10 = scmp.ne.s32.totalorder %s226_s18, %s9511_s26  ;;  %p9516_p11 = scmp.lt.s32.totalorder %s226_s18, %s226_s18 }
  0x95   :  { %p9517_p12 = scmp.lt.s32.totalorder %s9515_s28, %s9511_s26 }
  0x97   :  { %p9518_p13 = por %p9517_p12, %p9516_p11 }
  0x99   :  { %p9519_p0 = pnand %p9518_p13, %p9512_p10 }
  0x9b   :  { %9522 = shalt.err (!%p9519_p0)
}
  0x9c   :  { %228 = dma.hbm_to_vmem [thread:$0]  %s10088_s4, 16, %s226_s18, [#allocation12]  }
  0x9d   :  { %s9531_s12 = scalar_lea.vmem %s250_s23, 16  ;;  %s9535_s1 = scalar_lea.vmem %s250_s23, 32 }
  0x9e   :  { %p9532_p1 = scmp.ne.s32.totalorder %s250_s23, %s9531_s12  ;;  %p9536_p2 = scmp.lt.s32.totalorder %s250_s23, %s250_s23 }
  0x9f   :  { %p9537_p3 = scmp.lt.s32.totalorder %s9535_s1, %s9531_s12 }
  0xa1   :  { %p9538_p4 = por %p9537_p3, %p9536_p2 }
  0xa3   :  { %p9539_p5 = pnand %p9538_p4, %p9532_p1 }
  0xa5   :  { %9542 = shalt.err (!%p9539_p5)
}
  0xa6   :  { %252 = dma.hbm_to_vmem [thread:$0]  %s10108_s19, 16, %s250_s23, [#allocation15]  }
  0xa7   :  { %s9949_s6 = smov [#allocation17]   ;;  %s9950_s7 = smov [#allocation20]  }
  0xa8   :  { %s269_s2 = sshll.u32 %s9949_s6, 4  ;;  %s293_s10 = sshll.u32 %s9950_s7, 4  ;;  %s270_s2 = int_to_ptr.vmem [resolvable:$true] %s269_s2  ;;  %s294_s10 = int_to_ptr.vmem [resolvable:$true] %s293_s10 }
  0xa9   :  { %s9551_s0 = scalar_lea.vmem %s270_s2, 16  ;;  %s9555_s11 = scalar_lea.vmem %s270_s2, 32 }
  0xaa   :  { %p9552_p6 = scmp.ne.s32.totalorder %s270_s2, %s9551_s0  ;;  %p9556_p7 = scmp.lt.s32.totalorder %s270_s2, %s270_s2 }
  0xab   :  { %p9557_p8 = scmp.lt.s32.totalorder %s9555_s11, %s9551_s0 }
  0xad   :  { %p9558_p9 = por %p9557_p8, %p9556_p7 }
  0xaf   :  { %p9559_p10 = pnand %p9558_p9, %p9552_p6 }
  0xb1   :  { %9562 = shalt.err (!%p9559_p10)
}
  0xb2   :  { %272 = dma.hbm_to_vmem [thread:$0]  %s10118_s17, 16, %s270_s2, [#allocation18]  }
  0xb3   :  { %s9571_s4 = scalar_lea.vmem %s294_s10, 16  ;;  %s9575_s15 = scalar_lea.vmem %s294_s10, 32 }
  0xb4   :  { %p9572_p11 = scmp.ne.s32.totalorder %s294_s10, %s9571_s4  ;;  %p9576_p12 = scmp.lt.s32.totalorder %s294_s10, %s294_s10 }
  0xb5   :  { %p9577_p13 = scmp.lt.s32.totalorder %s9575_s15, %s9571_s4 }
  0xb7   :  { %p9578_p0 = por %p9577_p13, %p9576_p12 }
  0xb9   :  { %p9579_p1 = pnand %p9578_p0, %p9572_p11 }
  0xbb   :  { %9582 = shalt.err (!%p9579_p1)
}
  0xbc   :  { %296 = dma.hbm_to_vmem [thread:$0]  %s10138_s14, 16, %s294_s10, [#allocation21]  }
  0xbd   :  { %s9951_s19 = smov [#allocation23]   ;;  %s9952_s18 = smov [#allocation26]  }
  0xbe   :  { %s313_s16 = sshll.u32 %s9951_s19, 4  ;;  %s333_s22 = sshll.u32 %s9952_s18, 4  ;;  %s314_s16 = int_to_ptr.vmem [resolvable:$true] %s313_s16  ;;  %s334_s22 = int_to_ptr.vmem [resolvable:$true] %s333_s22 }
  0xbf   :  { %s9591_s23 = scalar_lea.vmem %s314_s16, 16  ;;  %s9595_s26 = scalar_lea.vmem %s314_s16, 32 }
  0xc0   :  { %p9592_p2 = scmp.ne.s32.totalorder %s314_s16, %s9591_s23  ;;  %p9596_p3 = scmp.lt.s32.totalorder %s314_s16, %s314_s16 }
  0xc1   :  { %p9597_p4 = scmp.lt.s32.totalorder %s9595_s26, %s9591_s23 }
  0xc3   :  { %p9598_p5 = por %p9597_p4, %p9596_p3 }
  0xc5   :  { %p9599_p6 = pnand %p9598_p5, %p9592_p2 }
  0xc7   :  { %9602 = shalt.err (!%p9599_p6)
}
  0xc8   :  { %316 = dma.hbm_to_vmem [thread:$0]  %s10148_s5, 16, %s314_s16, [#allocation24]  }
  0xc9   :  { %s9611_s17 = scalar_lea.vmem %s334_s22, 16  ;;  %s9615_s28 = scalar_lea.vmem %s334_s22, 32 }
  0xca   :  { %p9612_p7 = scmp.ne.s32.totalorder %s334_s22, %s9611_s17  ;;  %p9616_p8 = scmp.lt.s32.totalorder %s334_s22, %s334_s22 }
  0xcb   :  { %p9617_p9 = scmp.lt.s32.totalorder %s9615_s28, %s9611_s17 }
  0xcd   :  { %p9618_p10 = por %p9617_p9, %p9616_p8 }
  0xcf   :  { %p9619_p11 = pnand %p9618_p10, %p9612_p7 }
  0xd1   :  { %9622 = shalt.err (!%p9619_p11)
}
  0xd2   :  { %336 = dma.hbm_to_vmem [thread:$0]  %s10158_s9, 16, %s334_s22, [#allocation27]  }
  0xd3   :  { %s9953_s14 = smov [#allocation29]   ;;  %s9954_s1 = smov [#allocation2]  }
  0xd4   :  { %s393_s12 = sshll.u32 %s9953_s14, 4  ;;  %s165_s6 = sshll.u32 %s9954_s1, 4  ;;  %s394_s12 = int_to_ptr.vmem [resolvable:$true] %s393_s12  ;;  %s166_s6 = int_to_ptr.vmem [resolvable:$true] %s165_s6 }
  0xd5   :  { %s9631_s2 = scalar_lea.vmem %s394_s12, 16  ;;  %s9635_s7 = scalar_lea.vmem %s394_s12, 32 }
  0xd6   :  { %p9632_p12 = scmp.ne.s32.totalorder %s394_s12, %s9631_s2  ;;  %p9636_p13 = scmp.lt.s32.totalorder %s394_s12, %s394_s12 }
  0xd7   :  { %p9637_p0 = scmp.lt.s32.totalorder %s9635_s7, %s9631_s2 }
  0xd9   :  { %p9638_p1 = por %p9637_p0, %p9636_p13 }
  0xdb   :  { %p9639_p2 = pnand %p9638_p1, %p9632_p12 }
  0xdd   :  { %9642 = shalt.err (!%p9639_p2)
}
  0xde   :  { %396 = dma.hbm_to_vmem [thread:$0]  %s10268_s3, 16, %s394_s12, [#allocation30]  }
  0xdf   :  { %s9651_s5 = scalar_lea.vmem %s166_s6, 16  ;;  %s9655_s10 = scalar_lea.vmem %s166_s6, 32 }
  0xe0   :  { %p9652_p3 = scmp.ne.s32.totalorder %s166_s6, %s9651_s5  ;;  %p9656_p4 = scmp.lt.s32.totalorder %s166_s6, %s166_s6 }
  0xe1   :  { %p9657_p5 = scmp.lt.s32.totalorder %s9655_s10, %s9651_s5 }
  0xe3   :  { %p9658_p6 = por %p9657_p5, %p9656_p4 }
  0xe5   :  { %p9659_p7 = pnand %p9658_p6, %p9652_p3 }
  0xe7   :  { %9662 = shalt.err (!%p9659_p7)
}
  0xe8   :  { %168 = dma.hbm_to_vmem [thread:$0]  %s10038_s24, 16, %s166_s6, [#allocation3]  }
  0xe9   :  { %s9955_s9 = smov [#allocation7]   ;;  %s9956_s11 = smov [#allocation10]  }
  0xea   :  { %s189_s0 = sshll.u32 %s9955_s9, 4  ;;  %s215_s4 = sshll.u32 %s9956_s11, 4  ;;  %s190_s0 = int_to_ptr.vmem [resolvable:$true] %s189_s0  ;;  %s216_s4 = int_to_ptr.vmem [resolvable:$true] %s215_s4 }
  0xeb   :  { %s9671_s15 = scalar_lea.vmem %s190_s0, 16  ;;  %s9675_s19 = scalar_lea.vmem %s190_s0, 32 }
  0xec   :  { %p9672_p8 = scmp.ne.s32.totalorder %s190_s0, %s9671_s15  ;;  %p9676_p9 = scmp.lt.s32.totalorder %s190_s0, %s190_s0 }
  0xed   :  { %p9677_p10 = scmp.lt.s32.totalorder %s9675_s19, %s9671_s15 }
  0xef   :  { %p9678_p11 = por %p9677_p10, %p9676_p9 }
  0xf1   :  { %p9679_p12 = pnand %p9678_p11, %p9672_p8 }
  0xf3   :  { %9682 = shalt.err (!%p9679_p12)
}
  0xf4   :  { %192 = dma.hbm_to_vmem [thread:$0]  %s10058_s20, 16, %s190_s0, [#allocation6]  }
  0xf5   :  { %s9691_s3 = scalar_lea.vmem %s216_s4, 16  ;;  %s9695_s16 = scalar_lea.vmem %s216_s4, 32 }
  0xf6   :  { %p9692_p13 = scmp.ne.s32.totalorder %s216_s4, %s9691_s3  ;;  %p9696_p0 = scmp.lt.s32.totalorder %s216_s4, %s216_s4 }
  0xf7   :  { %p9697_p1 = scmp.lt.s32.totalorder %s9695_s16, %s9691_s3 }
  0xf9   :  { %p9698_p2 = por %p9697_p1, %p9696_p0 }
  0xfb   :  { %p9699_p3 = pnand %p9698_p2, %p9692_p13 }
  0xfd   :  { %9702 = shalt.err (!%p9699_p3)
}
  0xfe   :  { %218 = dma.hbm_to_vmem [thread:$0]  %s10083_s27, 16, %s216_s4, [#allocation9]  }
  0xff   :  { %s9957_s24 = smov [#allocation13]   ;;  %s9958_s22 = smov [#allocation16]  }
 0x100   :  { %s237_s18 = sshll.u32 %s9957_s24, 4  ;;  %s259_s23 = sshll.u32 %s9958_s22, 4  ;;  %s238_s18 = int_to_ptr.vmem [resolvable:$true] %s237_s18  ;;  %s260_s23 = int_to_ptr.vmem [resolvable:$true] %s259_s23 }
 0x101   :  { %s9711_s26 = scalar_lea.vmem %s238_s18, 16  ;;  %s9715_s17 = scalar_lea.vmem %s238_s18, 32 }
 0x102   :  { %p9712_p4 = scmp.ne.s32.totalorder %s238_s18, %s9711_s26  ;;  %p9716_p5 = scmp.lt.s32.totalorder %s238_s18, %s238_s18 }
 0x103   :  { %p9717_p6 = scmp.lt.s32.totalorder %s9715_s17, %s9711_s26 }
 0x105   :  { %p9718_p7 = por %p9717_p6, %p9716_p5 }
 0x107   :  { %p9719_p8 = pnand %p9718_p7, %p9712_p4 }
 0x109   :  { %9722 = shalt.err (!%p9719_p8)
}
 0x10a   :  { %240 = dma.hbm_to_vmem [thread:$0]  %s10098_s30, 16, %s238_s18, [#allocation12]  }
 0x10b   :  { %s9731_s20 = scalar_lea.vmem %s260_s23, 16  ;;  %s9735_s28 = scalar_lea.vmem %s260_s23, 32 }
 0x10c   :  { %p9732_p9 = scmp.ne.s32.totalorder %s260_s23, %s9731_s20  ;;  %p9736_p10 = scmp.lt.s32.totalorder %s260_s23, %s260_s23 }
 0x10d   :  { %p9737_p11 = scmp.lt.s32.totalorder %s9735_s28, %s9731_s20 }
 0x10f   :  { %p9738_p12 = por %p9737_p11, %p9736_p10 }
 0x111   :  { %p9739_p13 = pnand %p9738_p12, %p9732_p9 }
 0x113   :  { %9742 = shalt.err (!%p9739_p13)
}
 0x114   :  { %262 = dma.hbm_to_vmem [thread:$0]  %s10113_s25, 16, %s260_s23, [#allocation15]  }
 0x115   :  { %s9959_s27 = smov [#allocation19]   ;;  %s9960_s12 = smov [#allocation22]  }
 0x116   :  { %s281_s14 = sshll.u32 %s9959_s27, 4  ;;  %s303_s1 = sshll.u32 %s9960_s12, 4  ;;  %s282_s14 = int_to_ptr.vmem [resolvable:$true] %s281_s14  ;;  %s304_s1 = int_to_ptr.vmem [resolvable:$true] %s303_s1 }
 0x117   :  { %s9751_s6 = scalar_lea.vmem %s282_s14, 16  ;;  %s9755_s2 = scalar_lea.vmem %s282_s14, 32 }
 0x118   :  { %p9752_p0 = scmp.ne.s32.totalorder %s282_s14, %s9751_s6  ;;  %p9756_p1 = scmp.lt.s32.totalorder %s282_s14, %s282_s14 }
 0x119   :  { %p9757_p2 = scmp.lt.s32.totalorder %s9755_s2, %s9751_s6 }
 0x11b   :  { %p9758_p3 = por %p9757_p2, %p9756_p1 }
 0x11d   :  { %p9759_p4 = pnand %p9758_p3, %p9752_p0 }
 0x11f   :  { %9762 = shalt.err (!%p9759_p4)
}
 0x120   :  { %284 = dma.hbm_to_vmem [thread:$0]  %s10128_s21, 16, %s282_s14, [#allocation18]  }
 0x121   :  { %s9771_s30 = scalar_lea.vmem %s304_s1, 16  ;;  %s9775_s7 = scalar_lea.vmem %s304_s1, 32 }
 0x122   :  { %p9772_p5 = scmp.ne.s32.totalorder %s304_s1, %s9771_s30  ;;  %p9776_p6 = scmp.lt.s32.totalorder %s304_s1, %s304_s1 }
 0x123   :  { %p9777_p7 = scmp.lt.s32.totalorder %s9775_s7, %s9771_s30 }
 0x125   :  { %p9778_p8 = por %p9777_p7, %p9776_p6 }
 0x127   :  { %p9779_p9 = pnand %p9778_p8, %p9772_p5 }
 0x129   :  { %9782 = shalt.err (!%p9779_p9)
}
 0x12a   :  { %s11359_s25 = sld [smem:[#allocation64_spill]]  ;;  %s9961_s5 = smov [#allocation25]  }
 0x12b   :  { %s323_s10 = sshll.u32 %s9961_s5, 4  ;;  %s9962_s9 = smov [#allocation28]   ;;  %s324_s10 = int_to_ptr.vmem [resolvable:$true] %s323_s10 }
 0x12c   :  { %s383_s0 = sshll.u32 %s9962_s9, 4  ;;  %s9791_s11 = scalar_lea.vmem %s324_s10, 16  ;;  %s384_s0 = int_to_ptr.vmem [resolvable:$true] %s383_s0 }
 0x12d   :  { %p9792_p10 = scmp.ne.s32.totalorder %s324_s10, %s9791_s11  ;;  %s9795_s4 = scalar_lea.vmem %s324_s10, 32 }
 0x12e   :  { %p9796_p11 = scmp.lt.s32.totalorder %s324_s10, %s324_s10  ;;  %p9797_p12 = scmp.lt.s32.totalorder %s9795_s4, %s9791_s11 }
 0x130   :  { %306 = dma.hbm_to_vmem [thread:$0]  %s11359_s25, 16, %s304_s1, [#allocation21]  }
 0x131   :  { %p9798_p13 = por %p9797_p12, %p9796_p11 }
 0x133   :  { %p9799_p0 = pnand %p9798_p13, %p9792_p10 }
 0x135   :  { %9802 = shalt.err (!%p9799_p0)
}
 0x136   :  { %s11360_s21 = sld [smem:[#allocation65_spill]]  ;;  %s9811_s15 = scalar_lea.vmem %s384_s0, 16 }
 0x137   :  { %p9812_p1 = scmp.ne.s32.totalorder %s384_s0, %s9811_s15  ;;  %s9815_s19 = scalar_lea.vmem %s384_s0, 32 }
 0x138   :  { %p9816_p2 = scmp.lt.s32.totalorder %s384_s0, %s384_s0  ;;  %p9817_p3 = scmp.lt.s32.totalorder %s9815_s19, %s9811_s15 }
 0x13a   :  { %p9818_p4 = por %p9817_p3, %p9816_p2 }
 0x13c   :  { %326 = dma.hbm_to_vmem [thread:$0]  %s11360_s21, 16, %s324_s10, [#allocation24]  }
 0x13d   :  { %p9819_p5 = pnand %p9818_p4, %p9812_p1 }
 0x13f   :  { %9822 = shalt.err (!%p9819_p5)
}
 0x140   :  { %s11361_s3 = sld [smem:[#allocation86_spill]]  ;;  %s9963_s16 = smov [#allocation31]  }
 0x141   :  { %s405_s24 = sshll.u32 %s9963_s16, 4  ;;  %s406_s24 = int_to_ptr.vmem [resolvable:$true] %s405_s24 }
 0x142   :  { %s9831_s18 = scalar_lea.vmem %s406_s24, 16  ;;  %s9835_s22 = scalar_lea.vmem %s406_s24, 32 }
 0x143   :  { %p9832_p6 = scmp.ne.s32.totalorder %s406_s24, %s9831_s18  ;;  %p9836_p7 = scmp.lt.s32.totalorder %s406_s24, %s406_s24 }
 0x144   :  { %p9837_p8 = scmp.lt.s32.totalorder %s9835_s22, %s9831_s18 }
 0x146   :  { %386 = dma.hbm_to_vmem [thread:$0]  %s11361_s3, 16, %s384_s0, [#allocation27]  }
 0x147   :  { %p9838_p9 = por %p9837_p8, %p9836_p7 }
 0x149   :  { %p9839_p10 = pnand %p9838_p9, %p9832_p6 }
 0x14b   :  { %9842 = shalt.err (!%p9839_p10)
}
 0x14c   :  { %408 = dma.hbm_to_vmem [thread:$0]  %s10278_s13, 16, %s406_s24, [#allocation30]  }
 0x14d   :  { %9863 = dma.done.wait [#allocation3], 16  }
 0x14e   :  { %9864 = vsyncadd [#allocation3], 4294967280 }
 0x14f   :  { %9865 = dma.done.wait [#allocation6], 32  }
 0x150   :  { %9866 = vsyncadd [#allocation6], 4294967264 }
 0x151   :  { %9867 = dma.done.wait [#allocation9], 32  }
 0x152   :  { %9868 = vsyncadd [#allocation9], 4294967264 }
 0x153   :  { %9869 = dma.done.wait [#allocation12], 32  }
 0x154   :  { %9870 = vsyncadd [#allocation12], 4294967264 }
 0x155   :  { %9871 = dma.done.wait [#allocation15], 32  }
 0x156   :  { %9872 = vsyncadd [#allocation15], 4294967264 }
 0x157   :  { %9873 = dma.done.wait [#allocation18], 32  }
 0x158   :  { %9874 = vsyncadd [#allocation18], 4294967264 }
 0x159   :  { %9875 = dma.done.wait [#allocation21], 32  }
 0x15a   :  { %9876 = vsyncadd [#allocation21], 4294967264 }
 0x15b   :  { %9877 = dma.done.wait [#allocation24], 32  }
 0x15c   :  { %9878 = vsyncadd [#allocation24], 4294967264 }
 0x15d   :  { %9879 = dma.done.wait [#allocation27], 32  }
 0x15e   :  { %9880 = vsyncadd [#allocation27], 4294967264 }
 0x15f   :  { %9881 = dma.done.wait [#allocation30], 32  }
 0x160   :  { %9882 = vsyncadd [#allocation30], 4294967264  ;;  %s11362_s13 = sld [smem:[#allocation51_spill]]  ;;  %vm491_vm0 = vcmask 1043456   ;;  %vm484_vm1 = vcmask 31744   ;;  %vm570_vm2 = vcmask 97280  }
 0x161   :  { %s11363_s23 = sld [smem:[#allocation50_spill]]  ;;  %vm857_vm3 = vcmask 261120   ;;  %v9964_v33 = vmov 0.0   ;;  %v8281_v34 = vld [vmem:[#allocation2] ss:$0 sm:$0xff]  ;;  %s9965_s6 = smov 104  }
 0x162   :  { %s11364_s26 = sld [smem:[#allocation45_spill]]  ;;  %s9966_s2 = smov 120   ;;  %vm9967_vm4 = vmmov 0   ;;  %vm955_vm5 = vcmask 64512   ;;  %vm2279_vm6 = vcmask 130048   ;;  %vm2281_vm7 = vcmask 195584  }
 0x163   :  { %s11365_s17 = sld [smem:[#allocation44_spill]]  ;;  %s9968_s30 = smov 112  }
 0x164   :  { %s11366_s20 = sld [smem:[#allocation53_spill]]  ;;  %s9969_s7 = smov 96  }
 0x165   :  { %s11367_s28 = sld [smem:[#allocation52_spill]]  ;;  %s9970_s25 = smov 64  }
 0x166   :  { %v480_v0 = vld [vmem:[%s11362_s13] sm:$0xf]  ;;  %s11368_s27 = sld [smem:[#allocation48_spill]]  ;;  %s9971_s10 = smov 8  }
 0x167   :  { %v479_v1 = vld [vmem:[%s11363_s23 + $0x8] sm:$0xf]  ;;  %8679 = vmatprep.subr.msk.mxu0 %vm491_vm0, %v480_v0  ;;  %v478_v4 = vld [vmem:[%s11363_s23] sm:$0xff]  ;;  %s11369_s14 = sld [smem:[#allocation47_spill]]  ;;  %s9972_s9 = smov 16  }
 0x168   :  { %v468_v2 = vld [vmem:[%s11364_s26] sm:$0xff]  ;;  %8684 = vmatprep.subr.msk.mxu1 %vm491_vm0, %v479_v1  ;;  %v469_v3 = vld [vmem:[%s11364_s26 + $0x8] sm:$0xff]  ;;  %8680 = vmatpush3.msk.msra.mxu0 %vm491_vm0, %v480_v0  ;;  %s11370_s12 = sld [smem:[#allocation54_spill]]  ;;  %s9973_s0 = smov 24  }
 0x169   :  { %v466_v5 = vld [vmem:[%s11365_s17] sm:$0xff]  ;;  %8681 = vmatprep.mubr.msk.f32.mxu0 %vm484_vm1, %v468_v2  ;;  %8685 = vmatpush3.msk.msra.mxu1 %vm491_vm0, %v479_v1  ;;  %v467_v7 = vld [vmem:[%s11365_s17 + $0x8] sm:$0xff]  ;;  %s11371_s1 = sld [smem:[#allocation46_spill]] }
 0x16a   :  { %v483_v6 = vld [vmem:[%s11366_s20] sm:$0xf]  ;;  %8682 = vmatmul.mubr.msk.f32.vlgmr.msra.gmra.mxu0 %vm484_vm1, %v469_v3  ;;  %8686 = vmatprep.subr.mxu1 %v478_v4  ;;  %s11372_s5 = sld [smem:[#allocation55_spill]] }
 0x16b   :  { %v482_v8 = vld [vmem:[%s11367_s28 + $0x8] sm:$0xf]  ;;  %8688 = vmatprep.mubr.msk.f32.mxu1 %vm570_vm2, %v466_v5  ;;  %8687 = vmatpush3.msra.mxu1 %v478_v4  ;;  %v481_v9 = vld [vmem:[%s11367_s28] sm:$0xff]  ;;  %s11373_s11 = sld [smem:[#allocation56_spill]] }
 0x16c   :  { %8691 = vmatprep.subr.msk.mxu0 %vm491_vm0, %v483_v6  ;;  %8689 = vmatmul.mubr.msk.f32.vlgmr.msra.gmra.mxu1 %vm570_vm2, %v467_v7  ;;  %v474_v10 = vld [vmem:[%s11368_s27] sm:$0xff]  ;;  %v475_v12 = vld [vmem:[%s11368_s27 + $0x8] sm:$0xff]  ;;  %s11374_s4 = sld [smem:[#allocation57_spill]] }
 0x16d   :  { %8696 = vmatprep.subr.msk.mxu1 %vm491_vm0, %v482_v8  ;;  %8692 = vmatpush3.msk.msra.mxu0 %vm491_vm0, %v483_v6  ;;  %v472_v11 = vld [vmem:[%s11369_s14] sm:$0xff]  ;;  %v473_v13 = vld [vmem:[%s11369_s14 + $0x8] sm:$0xff]  ;;  %s11375_s21 = sld [smem:[#allocation59_spill]] }
 0x16e   :  { %8697 = vmatpush3.msk.msra.mxu1 %vm491_vm0, %v482_v8  ;;  %8693 = vmatprep.mubr.msk.f32.mxu0 %vm484_vm1, %v474_v10  ;;  %v830_v14 = vld [vmem:[%s11370_s12 + $0x18] sm:$0xff]  ;;  %v829_v15 = vld [vmem:[%s11370_s12 + $0x10] sm:$0xff]  ;;  %v828_v16 = vld [vmem:[%s11370_s12 + $0x8] sm:$0xff]  ;;  %s11376_s15 = sld [smem:[#allocation58_spill]] }
 0x16f   :  { %8698 = vmatprep.subr.mxu1 %v481_v9  ;;  %8700 = vmatprep.mubr.msk.f32.mxu1 %vm570_vm2, %v472_v11  ;;  %v827_v17 = vld [vmem:[%s11370_s12] sm:$0xff]  ;;  %v471_v24 = vld [vmem:[%s11371_s1 + $0x8] sm:$0xff]  ;;  %s11377_s19 = sld [smem:[#allocation60_spill]] }
 0x170   :  { %8699 = vmatpush3.msra.mxu1 %v481_v9  ;;  %8694 = vmatmul.mubr.msk.f32.vlgmr.msra.gmra.mxu0 %vm484_vm1, %v475_v12  ;;  %v470_v22 = vld [vmem:[%s11371_s1] sm:$0xff]  ;;  %s11378_s3 = sld [smem:[#allocation61_spill]] }
 0x171   :  { %8701 = vmatmul.mubr.msk.f32.vlgmr.msra.gmra.mxu1 %vm570_vm2, %v473_v13  ;;  %8703 = vmatprep.subr.mxu0 %v830_v14  ;;  %s11379_s16 = sld [smem:[#allocation62_spill]] }
 0x172   :  { %8704 = vmatpush3.msra.mxu0 %v830_v14  ;;  %8714 = vmatprep.subr.mxu1 %v9964_v33  ;;  %s11380_s24 = sld [smem:[#allocation66_spill]] }
 0x173   :  { %8705 = vmatprep.subr.mxu0 %v829_v15  ;;  %8716 = vmatprep.mubr.msk.f32.mxu1 %vm9967_vm4, %v9964_v33  ;;  %s11381_s18 = sld [smem:[#allocation49_spill]] }
 0x174   :  { %8706 = vmatpush3.msra.mxu0 %v829_v15  ;;  %s11382_s22 = sld [smem:[#allocation63_spill]] }
 0x175   :  { %8707 = vmatprep.subr.mxu0 %v828_v16  ;;  %s11383_s13 = sld [smem:[#allocation67_spill]] }
 0x176   :  { %8708 = vmatpush3.msra.mxu0 %v828_v16  ;;  %s11386_s23 = sld [smem:[#allocation68_spill]] }
 0x177   :  { %8709 = vmatprep.subr.mxu0 %v827_v17  ;;  %s11387_s26 = sld [smem:[#allocation69_spill]] }
 0x178   :  { %8710 = vmatpush3.msra.mxu0 %v827_v17  ;;  %s11388_s17 = sld [smem:[#allocation72_spill]] }
 0x179   :  { %8724 = vmatprep.subr.mxu0 %v9964_v33  ;;  %s11389_s20 = sld [smem:[#allocation70_spill]] }
 0x17a   :  { %s11390_s28 = sld [smem:[#allocation76_spill]] }
 0x17b   :  { %s11391_s27 = sld [smem:[#allocation77_spill]] }
 0x17c   :  { %s11392_s14 = sld [smem:[#allocation73_spill]] }
 0x17d   :  { %s11393_s12 = sld [smem:[#allocation71_spill]] }
 0x17e   :  { %s11394_s1 = sld [smem:[#allocation74_spill]] }
 0x22a   :  { %v8683_v18 = vpop.f32.mrf.mxu0 }
 0x22c   :  { %v8690_v19 = vpop.f32.mrf.mxu1  ;;  %v561_v20 = vpop.f32.mrf.mxu0 }
 0x22d   :  { %v652_v21 = vadd.f32 %v8690_v19, %v8683_v18 }
 0x22e   :  { %v646_v23 = vpop.f32.mrf.mxu1 }
 0x22f   :  { %v647_v25 = vadd.f32 %v646_v23, %v561_v20  ;;  %v10342_v27 = vadd.f32 %v652_v21, %v471_v24 }
 0x230   :  { %v8695_v28 = vpop.f32.mrf.mxu0 }
 0x231   :  { %v10340_v26 = vadd.f32 %v647_v25, %v470_v22  ;;  %v8702_v29 = vpop.f32.mrf.mxu1 }
 0x232   :  { %v10348_v30 = vadd.f32 %v8702_v29, %v8695_v28  ;;  %v10350_v31 = vpop.f32.mrf.mxu0 }
 0x233   :  { %8711 = vmatprep.mubr.msk.f32.mxu0 %vm857_vm3, %v10340_v26  ;;  %v10450_v52 = vpop.f32.mrf.mxu1 }
 0x234   :  { %8712 = vmatmul.mubr.msk.f32.vlgmr.msra.gmra.mxu0 %vm857_vm3, %v10342_v27 }
 0x235   :  { %8726 = vmatprep.mubr.msk.f32.mxu0 %vm9967_vm4, %v9964_v33 }
 0x2f4   :  { %v8713_v32 = vpop.f32.mrf.mxu0 }
 0x2f5   :  { %v10364_v37 = vadd.f32 %v8713_v32, %v8281_v34 }
 0x2f6   :  { %v930_v35 = vpop.f32.mrf.mxu0 }
 0x2f7   :  { %v10354_v36 = vadd.f32 %v8281_v34, %v930_v35 }
 0x2f9   :  { %944 = vrot.lane.b32.xlu1 %v10354_v36, %s9965_s6  ;;  %940 = vrot.lane.b32.xlu0 %v10354_v36, %s9966_s2 }
 0x2fd   :  { %947 = vrot.lane.b32.xlu1 %v10364_v37, %s9966_s2  ;;  %942 = vrot.lane.b32.xlu0 %v10354_v36, %s9968_s30 }
 0x301   :  { %951 = vrot.lane.b32.xlu1 %v10364_v37, %s9965_s6  ;;  %949 = vrot.lane.b32.xlu0 %v10364_v37, %s9968_s30 }
 0x305   :  { %953 = vrot.lane.b32.xlu0 %v10354_v36, %s9969_s7 }
 0x36b   :  { %v10376_v38 = vpop.permute.xlu1 %944  ;;  %v10378_v39 = vpop.permute.xlu0 %940 }
 0x36c   :  { %1030 = vrot.lane.b32.xlu1 %v10378_v39, %s9969_s7 }
 0x36f   :  { %v10382_v40 = vpop.permute.xlu0 %942  ;;  %v10388_v41 = vpop.permute.xlu1 %947 }
 0x370   :  { %1182 = vrot.lane.b32.xlu1 %v10376_v38, %s9969_s7  ;;  %1106 = vrot.lane.b32.xlu0 %v10382_v40, %s9969_s7 }
 0x373   :  { %v10390_v42 = vpop.permute.xlu0 %949  ;;  %v10396_v43 = vpop.permute.xlu1 %951 }
 0x374   :  { %1334 = vrot.lane.b32.xlu1 %v10388_v41, %s9969_s7  ;;  %1258 = vrot.lane.b32.xlu0 %v10364_v37, %s9969_s7 }
 0x377   :  { %v954_v44 = vpop.permute.xlu0 %953 }
 0x378   :  { %1486 = vrot.lane.b32.xlu1 %v10396_v43, %s9969_s7  ;;  %1410 = vrot.lane.b32.xlu0 %v10390_v42, %s9969_s7 }
 0x379   :  { %8715 = vmatpush3.xpose.msk.msra.mxu1 %vm955_vm5, %v954_v44 }
 0x37a   :  { %8719 = vmatprep.subr.mxu1 %v9964_v33 }
 0x37c   :  { %8717 = vmatmul.mubr.msk.f32.vlgmr.msra.gmra.mxu1 %vm955_vm5, %v10354_v36 }
 0x37d   :  { %8721 = vmatprep.mubr.msk.f32.mxu1 %vm9967_vm4, %v9964_v33 }
 0x3de   :  { %v1031_v45 = vpop.permute.xlu1 %1030 }
 0x3df   :  { %8720 = vmatpush3.xpose.msk.msra.mxu1 %vm955_vm5, %v1031_v45 }
 0x3e0   :  { %8729 = vmatprep.subr.mxu1 %v9964_v33 }
 0x3e2   :  { %v1183_v46 = vpop.permute.xlu1 %1182  ;;  %8722 = vmatmul.mubr.msk.f32.vlgmr.msra.gmra.mxu1 %vm955_vm5, %v10378_v39  ;;  %v1107_v47 = vpop.permute.xlu0 %1106 }
 0x3e3   :  { %8725 = vmatpush3.xpose.msk.msra.mxu0 %vm955_vm5, %v1107_v47  ;;  %8730 = vmatpush3.xpose.msk.msra.mxu1 %vm955_vm5, %v1183_v46 }
 0x3e4   :  { %8731 = vmatprep.mubr.msk.f32.mxu1 %vm9967_vm4, %v9964_v33  ;;  %8734 = vmatprep.subr.mxu0 %v9964_v33 }
 0x3e5   :  { %8739 = vmatprep.subr.mxu1 %v9964_v33 }
 0x3e6   :  { %v1335_v48 = vpop.permute.xlu1 %1334  ;;  %8727 = vmatmul.mubr.msk.f32.vlgmr.msra.gmra.mxu0 %vm955_vm5, %v10382_v40  ;;  %8732 = vmatmul.mubr.msk.f32.vlgmr.msra.gmra.mxu1 %vm955_vm5, %v10376_v38  ;;  %v1259_v49 = vpop.permute.xlu0 %1258 }
 0x3e7   :  { %8735 = vmatpush3.xpose.msk.msra.mxu0 %vm955_vm5, %v1259_v49  ;;  %8740 = vmatpush3.xpose.msk.msra.mxu1 %vm955_vm5, %v1335_v48 }
 0x3e8   :  { %8736 = vmatprep.mubr.msk.f32.mxu0 %vm9967_vm4, %v9964_v33  ;;  %8741 = vmatprep.mubr.msk.f32.mxu1 %vm9967_vm4, %v9964_v33 }
 0x3e9   :  { %8744 = vmatprep.subr.mxu0 %v9964_v33  ;;  %8749 = vmatprep.subr.mxu1 %v9964_v33 }
 0x3ea   :  { %v1487_v50 = vpop.permute.xlu1 %1486  ;;  %8737 = vmatmul.mubr.msk.f32.vlgmr.msra.gmra.mxu0 %vm955_vm5, %v10364_v37  ;;  %8742 = vmatmul.mubr.msk.f32.vlgmr.msra.gmra.mxu1 %vm955_vm5, %v10388_v41  ;;  %v1411_v51 = vpop.permute.xlu0 %1410 }
 0x3eb   :  { %8745 = vmatpush3.xpose.msk.msra.mxu0 %vm955_vm5, %v1411_v51  ;;  %8750 = vmatpush3.xpose.msk.msra.mxu1 %vm955_vm5, %v1487_v50 }
 0x3ec   :  { %8746 = vmatprep.mubr.msk.f32.mxu0 %vm9967_vm4, %v9964_v33  ;;  %8751 = vmatprep.mubr.msk.f32.mxu1 %vm9967_vm4, %v9964_v33 }
 0x3ed   :  { %8754 = vmatprep.subr.mxu0 %v9964_v33  ;;  %8759 = vmatprep.subr.mxu1 %v9964_v33 }
 0x3ee   :  { %8747 = vmatmul.mubr.msk.f32.vlgmr.msra.gmra.mxu0 %vm955_vm5, %v10390_v42  ;;  %8752 = vmatmul.mubr.msk.f32.vlgmr.msra.gmra.mxu1 %vm955_vm5, %v10396_v43 }
 0x3ef   :  { %8756 = vmatprep.mubr.msk.f32.mxu0 %vm9967_vm4, %v9964_v33  ;;  %8761 = vmatprep.mubr.msk.f32.mxu1 %vm9967_vm4, %v9964_v33 }
 0x43c   :  { %v1026_v53 = vpop.f32.mrf.mxu1 }
 0x43d   :  { %v1562_v54 = vmul.f32 0.35355338, %v1026_v53 }
 0x43e   :  { %v8718_v55 = vpop.f32.mrf.mxu1 }
 0x43f   :  { %v1570_v56 = vsel %vm955_vm5, %v1562_v54, -inf }
 0x440   :  { %1571 = vmax.xlane.f32.xlu0 %v1570_v56 }
 0x4a2   :  { %v1102_v57 = vpop.f32.mrf.mxu1 }
 0x4a3   :  { %v1563_v58 = vmul.f32 0.35355338, %v1102_v57 }
 0x4a4   :  { %v8723_v59 = vpop.f32.mrf.mxu1 }
 0x4a5   :  { %v1573_v60 = vsel %vm955_vm5, %v1563_v58, -inf }
 0x4a6   :  { %1574 = vmax.xlane.f32.xlu1 %v1573_v60  ;;  %v1178_v61 = vpop.f32.mrf.mxu0  ;;  %v1254_v62 = vpop.f32.mrf.mxu1 }
 0x4a7   :  { %v1564_v63 = vmul.f32 0.35355338, %v1178_v61  ;;  %v1565_v2 = vmul.f32 0.35355338, %v1254_v62 }
 0x4a8   :  { %v8728_v0 = vpop.f32.mrf.mxu0  ;;  %v8733_v1 = vpop.f32.mrf.mxu1 }
 0x4a9   :  { %v1576_v3 = vsel %vm955_vm5, %v1564_v63, -inf  ;;  %v1579_v10 = vsel %vm955_vm5, %v1565_v2, -inf }
 0x4aa   :  { %v1406_v4 = vpop.f32.mrf.mxu1  ;;  %1577 = vmax.xlane.f32.xlu0 %v1576_v3  ;;  %v1330_v5 = vpop.f32.mrf.mxu0 }
 0x4ab   :  { %v1566_v6 = vmul.f32 0.35355338, %v1330_v5  ;;  %v1567_v9 = vmul.f32 0.35355338, %v1406_v4 }
 0x4ac   :  { %v8738_v7 = vpop.f32.mrf.mxu0  ;;  %v8743_v8 = vpop.f32.mrf.mxu1 }
 0x4ad   :  { %v1582_v11 = vsel %vm955_vm5, %v1566_v6, -inf  ;;  %v1585_v18 = vsel %vm955_vm5, %v1567_v9, -inf }
 0x4ae   :  { %v1558_v12 = vpop.f32.mrf.mxu1  ;;  %1580 = vmax.xlane.f32.xlu0 %v1579_v10  ;;  %1583 = vmax.xlane.f32.xlu1 %v1582_v11  ;;  %v1482_v13 = vpop.f32.mrf.mxu0 }
 0x4af   :  { %v1568_v14 = vmul.f32 0.35355338, %v1482_v13  ;;  %v1569_v17 = vmul.f32 0.35355338, %v1558_v12 }
 0x4b0   :  { %v8748_v15 = vpop.f32.mrf.mxu0  ;;  %v8753_v16 = vpop.f32.mrf.mxu1 }
 0x4b1   :  { %v1588_v19 = vsel %vm955_vm5, %v1568_v14, -inf  ;;  %v1591_v20 = vsel %vm955_vm5, %v1569_v17, -inf }
 0x4b2   :  { %1586 = vmax.xlane.f32.xlu0 %v1585_v18  ;;  %1589 = vmax.xlane.f32.xlu1 %v1588_v19 }
 0x4b6   :  { %1592 = vmax.xlane.f32.xlu0 %v1591_v20 }
 0x4c3   :  { %1658 = vrot.lane.b32.xlu1 %v10354_v36, %s9970_s25 }
 0x4c7   :  { %1810 = vrot.lane.b32.xlu1 %v10382_v40, %s9970_s25 }
 0x4c9   :  { %v1572_v21 = vpop.xlane.xlu0 %1571 }
 0x4ca   :  { %v1594_v22 = vsub.f32 %v1562_v54, %v1572_v21 }
 0x4cb   :  { %1886 = vrot.lane.b32.xlu1 %v10376_v38, %s9970_s25 }
 0x4cc   :  { %1734 = vrot.lane.b32.xlu0 %v10378_v39, %s9970_s25  ;;  %v1602_v23 = vmul.f32 1.442695, %v1594_v22 }
 0x4ce   :  { %9289 = vpow2.f32 %v1602_v23 }
 0x4cf   :  { %2038 = vrot.lane.b32.xlu1 %v10388_v41, %s9970_s25 }
 0x4d0   :  { %1962 = vrot.lane.b32.xlu0 %v10364_v37, %s9970_s25 }
 0x4db   :  { %v10472_v24 = vpop.eup %9289 }
 0x4dc   :  { %v1618_v25 = vsel %vm955_vm5, %v10472_v24, 0.0 }
 0x4f3   :  { %1619 = vadd.xlane.f32.xlu1 %v1618_v25 }
 0x52f   :  { %v1575_v28 = vpop.xlane.xlu1 %1574 }
 0x530   :  { %v1595_v29 = vsub.f32 %v1563_v58, %v1575_v28 }
 0x532   :  { %v1604_v32 = vmul.f32 1.442695, %v1595_v29 }
 0x533   :  { %v1578_v34 = vpop.xlane.xlu0 %1577 }
 0x534   :  { %9291 = vpow2.f32 %v1604_v32  ;;  %v1596_v35 = vsub.f32 %v1564_v63, %v1578_v34 }
 0x536   :  { %v1606_v36 = vmul.f32 1.442695, %v1596_v35 }
 0x537   :  { %v1584_v38 = vpop.xlane.xlu1 %1583  ;;  %v1581_v39 = vpop.xlane.xlu0 %1580 }
 0x538   :  { %9293 = vpow2.f32 %v1606_v36  ;;  %v1598_v37 = vsub.f32 %v1566_v6, %v1584_v38  ;;  %v1597_v40 = vsub.f32 %v1565_v2, %v1581_v39 }
 0x53a   :  { %v1610_v41 = vmul.f32 1.442695, %v1598_v37  ;;  %v1608_v44 = vmul.f32 1.442695, %v1597_v40 }
 0x53b   :  { %v1590_v45 = vpop.xlane.xlu1 %1589  ;;  %v1587_v46 = vpop.xlane.xlu0 %1586 }
 0x53c   :  { %9295 = vpow2.f32 %v1610_v41  ;;  %v1600_v47 = vsub.f32 %v1568_v14, %v1590_v45  ;;  %v1599_v48 = vsub.f32 %v1567_v9, %v1587_v46  ;;  %v834_v46 = vld [vmem:[%s11372_s5 + $0x10] sm:$0xff] }
 0x53d   :  { %9297 = vpow2.f32 %v1608_v44  ;;  %v835_v44 = vld [vmem:[%s11372_s5 + $0x18] sm:$0xff] }
 0x53e   :  { %v1614_v49 = vmul.f32 1.442695, %v1600_v47  ;;  %v1612_v50 = vmul.f32 1.442695, %v1599_v48  ;;  %v833_v47 = vld [vmem:[%s11372_s5 + $0x8] sm:$0xff] }
 0x53f   :  { %v1659_v51 = vpop.permute.xlu1 %1658  ;;  %v1593_v53 = vpop.xlane.xlu0 %1592 }
 0x540   :  { %9299 = vpow2.f32 %v1614_v49  ;;  %v1601_v54 = vsub.f32 %v1569_v17, %v1593_v53  ;;  %8755 = vmatpush3.msra.mxu0 %v1659_v51 }
 0x541   :  { %v9292_v55 = vpop.eup %9291  ;;  %9301 = vpow2.f32 %v1612_v50  ;;  %8764 = vmatprep.subr.mxu0 %v9964_v33  ;;  %v832_v50 = vld [vmem:[%s11372_s5] sm:$0xff]  ;;  %s11400_s5 = sld [smem:[#allocation83_spill]] }
 0x542   :  { %v1616_v56 = vmul.f32 1.442695, %v1601_v54  ;;  %v1621_v57 = vsel %vm955_vm5, %v9292_v55, 0.0 }
 0x543   :  { %1622 = vadd.xlane.f32.xlu0 %v1621_v57  ;;  %v1735_v58 = vpop.permute.xlu0 %1734  ;;  %v1811_v7 = vpop.permute.xlu1 %1810 }
 0x544   :  { %9303 = vpow2.f32 %v1616_v56  ;;  %8760 = vmatpush3.msra.mxu1 %v1735_v58 }
 0x545   :  { %v9294_v59 = vpop.eup %9293  ;;  %8769 = vmatprep.subr.mxu1 %v9964_v33 }
 0x546   :  { %v1624_v60 = vsel %vm955_vm5, %v9294_v59, 0.0 }
 0x547   :  { %1625 = vadd.xlane.f32.xlu1 %v1624_v60  ;;  %v1887_v8 = vpop.permute.xlu1 %1886 }
 0x549   :  { %v9296_v61 = vpop.eup %9295 }
 0x54a   :  { %v9298_v62 = vpop.eup %9297  ;;  %v1630_v63 = vsel %vm955_vm5, %v9296_v61, 0.0 }
 0x54b   :  { %1631 = vadd.xlane.f32.xlu1 %v1630_v63  ;;  %v1627_v0 = vsel %vm955_vm5, %v9298_v62, 0.0  ;;  %v2039_v9 = vpop.permute.xlu1 %2038 }
 0x54c   :  { %1628 = vadd.xlane.f32.xlu0 %v1627_v0 }
 0x54d   :  { %v9300_v1 = vpop.eup %9299 }
 0x54e   :  { %v10482_v2 = vpop.eup %9301  ;;  %v1636_v3 = vsel %vm955_vm5, %v9300_v1, 0.0 }
 0x54f   :  { %1637 = vadd.xlane.f32.xlu1 %v1636_v3  ;;  %v1633_v4 = vsel %vm955_vm5, %v10482_v2, 0.0 }
 0x550   :  { %1634 = vadd.xlane.f32.xlu0 %v1633_v4 }
 0x551   :  { %v10487_v5 = vpop.eup %9303 }
 0x552   :  { %v1639_v6 = vsel %vm955_vm5, %v10487_v5, 0.0 }
 0x554   :  { %1640 = vadd.xlane.f32.xlu0 %v1639_v6 }
 0x560   :  { %2190 = vrot.lane.b32.xlu1 %v10396_v43, %s9970_s25  ;;  %v1963_v43 = vpop.permute.xlu0 %1962 }
 0x56a   :  { %2114 = vrot.lane.b32.xlu0 %v10390_v42, %s9970_s25 }
 0x57c   :  { %v1620_v10 = vpop.xlane.xlu1 %1619 }
 0x57d   :  { %9305 = vrcp.f32 %v1620_v10 }
 0x58a   :  { %v9306_v11 = vpop.eup %9305 }
 0x58b   :  { %v1643_v12 = vmul.f32 %v9306_v11, %v10472_v24  ;;  %v8308_v11 = vld [vmem:[%s11373_s11] ss:$0 sm:$0xff]  ;;  %s9974_s11 = smov [#allocation32]  }
 0x58d   :  { %8757 = vmatmul.mubr.msk.f32.vlgmr.msra.gmra.mxu0 %vm955_vm5, %v1643_v12 }
 0x58e   :  { %8765 = vmatpush3.msra.mxu0 %v1811_v7  ;;  %8766 = vmatprep.mubr.msk.f32.mxu0 %vm9967_vm4, %v9964_v33 }
 0x58f   :  { %8774 = vmatprep.subr.mxu0 %v9964_v33 }
 0x5cc   :  { %v1623_v13 = vpop.xlane.xlu0 %1622 }
 0x5cd   :  { %9307 = vrcp.f32 %v1623_v13 }
 0x5d0   :  { %v1626_v42 = vpop.xlane.xlu1 %1625 }
 0x5d1   :  { %9309 = vrcp.f32 %v1626_v42 }
 0x5d4   :  { %v1632_v14 = vpop.xlane.xlu1 %1631 }
 0x5d5   :  { %9311 = vrcp.f32 %v1632_v14  ;;  %v1629_v15 = vpop.xlane.xlu0 %1628 }
 0x5d6   :  { %9313 = vrcp.f32 %v1629_v15 }
 0x5d8   :  { %v1638_v16 = vpop.xlane.xlu1 %1637 }
 0x5d9   :  { %9315 = vrcp.f32 %v1638_v16  ;;  %v1635_v17 = vpop.xlane.xlu0 %1634 }
 0x5da   :  { %v9308_v18 = vpop.eup %9307  ;;  %9317 = vrcp.f32 %v1635_v17 }
 0x5db   :  { %v1645_v19 = vmul.f32 %v9308_v18, %v9292_v55 }
 0x5dc   :  { %v2191_v38 = vpop.permute.xlu1 %2190 }
 0x5dd   :  { %v1641_v20 = vpop.xlane.xlu0 %1640  ;;  %8762 = vmatmul.mubr.msk.f32.vlgmr.msra.gmra.mxu1 %vm955_vm5, %v1645_v19 }
 0x5de   :  { %v9310_v21 = vpop.eup %9309  ;;  %9319 = vrcp.f32 %v1641_v20  ;;  %8770 = vmatpush3.msra.mxu1 %v1887_v8  ;;  %8771 = vmatprep.mubr.msk.f32.mxu1 %vm9967_vm4, %v9964_v33 }
 0x5df   :  { %v1647_v22 = vmul.f32 %v9310_v21, %v9294_v59  ;;  %8779 = vmatprep.subr.mxu1 %v9964_v33 }
 0x5e1   :  { %8767 = vmatmul.mubr.msk.f32.vlgmr.msra.gmra.mxu0 %vm955_vm5, %v1647_v22  ;;  %v2115_v29 = vpop.permute.xlu0 %2114 }
 0x5e2   :  { %v9312_v23 = vpop.eup %9311  ;;  %8775 = vmatpush3.msra.mxu0 %v1963_v43  ;;  %8776 = vmatprep.mubr.msk.f32.mxu0 %vm9967_vm4, %v9964_v33 }
 0x5e3   :  { %v9314_v24 = vpop.eup %9313  ;;  %8784 = vmatprep.subr.mxu0 %v9964_v33  ;;  %v1651_v25 = vmul.f32 %v9312_v23, %v9296_v61 }
 0x5e4   :  { %v1649_v28 = vmul.f32 %v9314_v24, %v9298_v62 }
 0x5e5   :  { %8777 = vmatmul.mubr.msk.f32.vlgmr.msra.gmra.mxu0 %vm955_vm5, %v1651_v25 }
 0x5e6   :  { %v9316_v32 = vpop.eup %9315  ;;  %8772 = vmatmul.mubr.msk.f32.vlgmr.msra.gmra.mxu1 %vm955_vm5, %v1649_v28  ;;  %8785 = vmatpush3.msra.mxu0 %v2115_v29  ;;  %v842_v28 = vld [vmem:[%s11374_s4 + $0x18] sm:$0xff]  ;;  %v841_v29 = vld [vmem:[%s11374_s4 + $0x10] sm:$0xff] }
 0x5e7   :  { %v9318_v34 = vpop.eup %9317  ;;  %8780 = vmatpush3.msra.mxu1 %v2039_v9  ;;  %8781 = vmatprep.mubr.msk.f32.mxu1 %vm9967_vm4, %v9964_v33  ;;  %v1655_v35 = vmul.f32 %v9316_v32, %v9300_v1  ;;  %v840_v32 = vld [vmem:[%s11374_s4 + $0x8] sm:$0xff] }
 0x5e8   :  { %8786 = vmatprep.mubr.msk.f32.mxu0 %vm9967_vm4, %v9964_v33  ;;  %8789 = vmatprep.subr.mxu1 %v9964_v33  ;;  %v1653_v36 = vmul.f32 %v9318_v34, %v10482_v2  ;;  %v839_v34 = vld [vmem:[%s11374_s4] sm:$0xff]  ;;  %s8191_s4 = sshll.u32 %s9974_s11, 4  ;;  %s8192_s4 = int_to_ptr.vmem [resolvable:$true] %s8191_s4 }
 0x5e9   :  { %8787 = vmatmul.mubr.msk.f32.vlgmr.msra.gmra.mxu0 %vm955_vm5, %v1655_v35  ;;  %8794 = vmatprep.subr.mxu0 %v835_v44  ;;  %p9848_p12 = scmp.lt.s32.totalorder %s8192_s4, %s8192_s4 }
 0x5ea   :  { %8782 = vmatmul.mubr.msk.f32.vlgmr.msra.gmra.mxu1 %vm955_vm5, %v1653_v36  ;;  %8795 = vmatpush3.msra.mxu0 %v835_v44  ;;  %v8311_v44 = vld [vmem:[#allocation5] ss:$0 sm:$0xff] }
 0x5eb   :  { %v9320_v39 = vpop.eup %9319  ;;  %8790 = vmatpush3.msra.mxu1 %v2191_v38  ;;  %8791 = vmatprep.mubr.msk.f32.mxu1 %vm9967_vm4, %v9964_v33 }
 0x5ec   :  { %v1657_v37 = vmul.f32 %v9320_v39, %v10487_v5  ;;  %8796 = vmatprep.subr.mxu0 %v834_v46  ;;  %8805 = vmatprep.subr.mxu1 %v842_v28 }
 0x5ed   :  { %8797 = vmatpush3.msra.mxu0 %v834_v46  ;;  %v8312_v46 = vld [vmem:[#allocation7] ss:$0 sm:$0xff] }
 0x5ee   :  { %8792 = vmatmul.mubr.msk.f32.vlgmr.msra.gmra.mxu1 %vm955_vm5, %v1657_v37  ;;  %8798 = vmatprep.subr.mxu0 %v833_v47 }
 0x5ef   :  { %8799 = vmatpush3.msra.mxu0 %v833_v47  ;;  %8806 = vmatpush3.msra.mxu1 %v842_v28 }
 0x5f0   :  { %8800 = vmatprep.subr.mxu0 %v832_v50  ;;  %8807 = vmatprep.subr.mxu1 %v841_v29 }
 0x5f1   :  { %8801 = vmatpush3.msra.mxu0 %v832_v50  ;;  %8808 = vmatpush3.msra.mxu1 %v841_v29 }
 0x5f2   :  { %8809 = vmatprep.subr.mxu1 %v840_v32 }
 0x5f3   :  { %8810 = vmatpush3.msra.mxu1 %v840_v32 }
 0x5f4   :  { %8811 = vmatprep.subr.mxu1 %v839_v34 }
 0x5f5   :  { %8812 = vmatpush3.msra.mxu1 %v839_v34 }
 0x64d   :  { %v1730_v40 = vpop.f32.mrf.mxu0 }
 0x64f   :  { %v8758_v41 = vpop.f32.mrf.mxu0 }
 0x69d   :  { %v1806_v45 = vpop.f32.mrf.mxu1 }
 0x69e   :  { %2267 = vrot.lane.b32.xlu0 %v1806_v45, %s9971_s10 }
 0x69f   :  { %v8763_v48 = vpop.f32.mrf.mxu1 }
 0x6a1   :  { %v1882_v49 = vpop.f32.mrf.mxu0 }
 0x6a2   :  { %2271 = vrot.lane.b32.xlu1 %v1882_v49, %s9972_s9 }
 0x6a3   :  { %v8768_v51 = vpop.f32.mrf.mxu0 }
 0x6a5   :  { %v2034_v53 = vpop.f32.mrf.mxu0 }
 0x6a6   :  { %v1958_v54 = vpop.f32.mrf.mxu1 }
 0x6a7   :  { %2275 = vrot.lane.b32.xlu1 %v1958_v54, %s9973_s0  ;;  %v8778_v55 = vpop.f32.mrf.mxu0  ;;  %v847_v54 = vld [vmem:[%s11375_s21 + $0x18] sm:$0xff] }
 0x6a8   :  { %v8773_v56 = vpop.f32.mrf.mxu1  ;;  %v846_v55 = vld [vmem:[%s11375_s21 + $0x10] sm:$0xff]  ;;  %8816 = vmatprep.subr.mxu0 %v847_v54 }
 0x6a9   :  { %v2186_v57 = vpop.f32.mrf.mxu0  ;;  %v845_v56 = vld [vmem:[%s11375_s21 + $0x8] sm:$0xff] }
 0x6aa   :  { %v2110_v58 = vpop.f32.mrf.mxu1 }
 0x6ab   :  { %2284 = vrot.lane.b32.xlu0 %v2110_v58, %s9971_s10  ;;  %v8788_v59 = vpop.f32.mrf.mxu0  ;;  %v8313_v58 = vld [vmem:[%s11376_s15] ss:$0 sm:$0xff] }
 0x6ac   :  { %v8783_v60 = vpop.f32.mrf.mxu1 }
 0x6ae   :  { %v2262_v61 = vpop.f32.mrf.mxu1 }
 0x6af   :  { %2292 = vrot.lane.b32.xlu1 %v2262_v61, %s9973_s0  ;;  %2288 = vrot.lane.b32.xlu0 %v2186_v57, %s9972_s9  ;;  %v844_v57 = vld [vmem:[%s11375_s21] sm:$0xff] }
 0x6b0   :  { %v8793_v62 = vpop.f32.mrf.mxu1 }
 0x710   :  { %v2268_v0 = vpop.permute.xlu0 %2267 }
 0x711   :  { %v2278_v1 = vsel %vm955_vm5, %v1730_v40, %v2268_v0 }
 0x714   :  { %v2272_v63 = vpop.permute.xlu1 %2271 }
 0x715   :  { %v2280_v2 = vsel %vm2279_vm6, %v2278_v1, %v2272_v63 }
 0x719   :  { %v2276_v3 = vpop.permute.xlu1 %2275 }
 0x71a   :  { %v2282_v4 = vsel %vm2281_vm7, %v2280_v2, %v2276_v3 }
 0x71b   :  { %8802 = vmatprep.mubr.msk.f32.mxu0 %vm857_vm3, %v2282_v4 }
 0x71d   :  { %v2285_v5 = vpop.permute.xlu0 %2284 }
 0x71e   :  { %v2295_v6 = vsel %vm955_vm5, %v2034_v53, %v2285_v5 }
 0x721   :  { %v2293_v7 = vpop.permute.xlu1 %2292  ;;  %v2289_v8 = vpop.permute.xlu0 %2288 }
 0x722   :  { %v2296_v9 = vsel %vm2279_vm6, %v2295_v6, %v2289_v8 }
 0x723   :  { %v2297_v10 = vsel %vm2281_vm7, %v2296_v9, %v2293_v7 }
 0x724   :  { %8803 = vmatmul.mubr.msk.f32.vlgmr.msra.gmra.mxu0 %vm857_vm3, %v2297_v10 }
 0x725   :  { %8817 = vmatpush3.msra.mxu0 %v847_v54 }
 0x726   :  { %8818 = vmatprep.subr.mxu0 %v846_v55 }
 0x727   :  { %8819 = vmatpush3.msra.mxu0 %v846_v55 }
 0x728   :  { %8820 = vmatprep.subr.mxu0 %v845_v56 }
 0x729   :  { %8821 = vmatpush3.msra.mxu0 %v845_v56  ;;  %v8320_v56 = vld [vmem:[#allocation11] ss:$0 sm:$0xff] }
 0x72a   :  { %8822 = vmatprep.subr.mxu0 %v844_v57 }
 0x72b   :  { %8823 = vmatpush3.msra.mxu0 %v844_v57 }
 0x72c   :  { %8838 = vmatprep.subr.mxu0 %v9964_v33 }
 0x7e4   :  { %v8804_v12 = vpop.f32.mrf.mxu0 }
 0x7e5   :  { %v2382_v43 = vadd.f32 %v8804_v12, %v8308_v11 }
 0x7e6   :  { %v2376_v13 = vpop.f32.mrf.mxu0 }
 0x7e7   :  { %v2377_v42 = vadd.f32 %v8308_v11, %v2376_v13  ;;  %v2386_v14 = vadd.f32 %v2382_v43, %v10342_v27 }
 0x7e9   :  { %v2390_v15 = vsel %vm857_vm3, %v2386_v14, 0.0  ;;  %v2385_v16 = vadd.f32 %v2377_v42, %v10340_v26 }
 0x7ea   :  { %2391 = vadd.xlane.f32.xlu1 %v2390_v15  ;;  %v8316_v15 = vld [vmem:[#allocation8] ss:$0 sm:$0xff] }
 0x7eb   :  { %v2387_v17 = vsel %vm857_vm3, %v2385_v16, 0.0 }
 0x7ec   :  { %2388 = vadd.xlane.f32.xlu0 %v2387_v17 }
 0x873   :  { %v2392_v18 = vpop.xlane.xlu1 %2391 }
 0x874   :  { %v2395_v19 = vmul.f32 0.03125, %v2392_v18 }
 0x875   :  { %v2389_v20 = vpop.xlane.xlu0 %2388 }
 0x876   :  { %v2394_v21 = vmul.f32 0.03125, %v2389_v20  ;;  %v2397_v22 = vsub.f32 %v2386_v14, %v2395_v19 }
 0x878   :  { %v2396_v23 = vsub.f32 %v2385_v16, %v2394_v21  ;;  %v2399_v25 = vmul.f32 %v2397_v22, %v2397_v22 }
 0x87a   :  { %v2398_v24 = vmul.f32 %v2396_v23, %v2396_v23  ;;  %v2403_v26 = vsel %vm857_vm3, %v2399_v25, 0.0 }
 0x87c   :  { %v2400_v27 = vsel %vm857_vm3, %v2398_v24, 0.0 }
 0x87d   :  { %2401 = vadd.xlane.f32.xlu0 %v2400_v27 }
 0x881   :  { %2404 = vadd.xlane.f32.xlu0 %v2403_v26 }
 0x906   :  { %v2402_v35 = vpop.xlane.xlu0 %2401 }
 0x907   :  { %v2406_v36 = vmul.f32 0.03125, %v2402_v35 }
 0x909   :  { %v2408_v38 = vadd.f32 1e-05, %v2406_v36 }
 0x90a   :  { %v2405_v39 = vpop.xlane.xlu0 %2404 }
 0x90b   :  { %9321 = vrsqrt.f32 %v2408_v38  ;;  %v2407_v37 = vmul.f32 0.03125, %v2405_v39  ;;  %v2669_v38 = vld [vmem:[%s11377_s19 + $0x18] sm:$0xff]  ;;  %v2668_v39 = vld [vmem:[%s11377_s19 + $0x10] sm:$0xff] }
 0x90c   :  { %8827 = vmatprep.subr.mxu1 %v2669_v38 }
 0x90d   :  { %v2409_v40 = vadd.f32 1e-05, %v2407_v37  ;;  %v2667_v37 = vld [vmem:[%s11377_s19 + $0x8] sm:$0xff] }
 0x90f   :  { %9323 = vrsqrt.f32 %v2409_v40  ;;  %v2666_v40 = vld [vmem:[%s11377_s19] sm:$0xff] }
 0x918   :  { %v9322_v41 = vpop.eup %9321 }
 0x919   :  { %v2412_v45 = vmul.f32 %v9322_v41, %v2396_v23 }
 0x91b   :  { %v2420_v47 = vmul.f32 %v8311_v44, %v2412_v45 }
 0x91c   :  { %v9324_v48 = vpop.eup %9323 }
 0x91d   :  { %v2413_v49 = vmul.f32 %v9324_v48, %v2397_v22  ;;  %v2428_v50 = vadd.f32 %v8312_v46, %v2420_v47 }
 0x91f   :  { %v2421_v51 = vmul.f32 %v8311_v44, %v2413_v49  ;;  %8813 = vmatprep.mubr.msk.f32.mxu1 %vm857_vm3, %v2428_v50 }
 0x921   :  { %v2429_v53 = vadd.f32 %v8312_v46, %v2421_v51 }
 0x923   :  { %8814 = vmatmul.mubr.msk.f32.vlgmr.msra.gmra.mxu1 %vm857_vm3, %v2429_v53 }
 0x924   :  { %8828 = vmatpush3.msra.mxu1 %v2669_v38 }
 0x925   :  { %8829 = vmatprep.subr.mxu1 %v2668_v39 }
 0x926   :  { %8830 = vmatpush3.msra.mxu1 %v2668_v39 }
 0x927   :  { %8831 = vmatprep.subr.mxu1 %v2667_v37 }
 0x928   :  { %8832 = vmatpush3.msra.mxu1 %v2667_v37 }
 0x929   :  { %8833 = vmatprep.subr.mxu1 %v2666_v40 }
 0x92a   :  { %8834 = vmatpush3.msra.mxu1 %v2666_v40 }
 0x92b   :  { %8843 = vmatprep.subr.mxu1 %v9964_v33 }
 0x9e3   :  { %v8815_v59 = vpop.f32.mrf.mxu1 }
 0x9e4   :  { %v2514_v60 = vadd.f32 %v8815_v59, %v8313_v58 }
 0x9e5   :  { %v2508_v61 = vpop.f32.mrf.mxu1 }
 0x9e6   :  { %v2520_v62 = vmul.f32 0.044715, %v2514_v60  ;;  %v2509_v63 = vadd.f32 %v8313_v58, %v2508_v61  ;;  %v2518_v13 = vmul.f32 0.5, %v2514_v60  ;;  %v8321_v61 = vld [vmem:[#allocation13] ss:$0 sm:$0xff] }
 0x9e8   :  { %v2522_v0 = vmul.f32 %v2520_v62, %v2514_v60  ;;  %v2519_v1 = vmul.f32 0.044715, %v2509_v63  ;;  %v2517_v12 = vmul.f32 0.5, %v2509_v63 }
 0x9ea   :  { %v2524_v2 = vmul.f32 %v2522_v0, %v2514_v60  ;;  %v2521_v3 = vmul.f32 %v2519_v1, %v2509_v63 }
 0x9ec   :  { %v2526_v4 = vadd.f32 %v2524_v2, %v2514_v60  ;;  %v2523_v5 = vmul.f32 %v2521_v3, %v2509_v63 }
 0x9ee   :  { %v2528_v6 = vmul.f32 0.7978846, %v2526_v4  ;;  %v2525_v7 = vadd.f32 %v2523_v5, %v2509_v63 }
 0x9f0   :  { %9325 = vtanh.f32 %v2528_v6  ;;  %v2527_v8 = vmul.f32 0.7978846, %v2525_v7 }
 0x9f2   :  { %9327 = vtanh.f32 %v2527_v8 }
 0x9fd   :  { %v9326_v9 = vpop.eup %9325 }
 0x9fe   :  { %v2532_v11 = vadd.f32 1.0, %v9326_v9 }
 0x9ff   :  { %v9328_v10 = vpop.eup %9327 }
 0xa00   :  { %v2531_v43 = vadd.f32 1.0, %v9328_v10  ;;  %v2534_v14 = vmul.f32 %v2532_v11, %v2518_v13 }
 0xa02   :  { %v2533_v42 = vmul.f32 %v2531_v43, %v2517_v12 }
 0xa04   :  { %8824 = vmatprep.mubr.msk.f32.mxu0 %vm857_vm3, %v2533_v42 }
 0xa05   :  { %8825 = vmatmul.mubr.msk.f32.vlgmr.msra.gmra.mxu0 %vm857_vm3, %v2534_v14 }
 0xa06   :  { %8840 = vmatprep.mubr.msk.f32.mxu0 %vm9967_vm4, %v9964_v33 }
 0xac5   :  { %v8826_v16 = vpop.f32.mrf.mxu0 }
 0xac6   :  { %v2619_v17 = vadd.f32 %v8826_v16, %v8316_v15 }
 0xac7   :  { %v2613_v18 = vpop.f32.mrf.mxu0 }
 0xac8   :  { %v2614_v19 = vadd.f32 %v8316_v15, %v2613_v18  ;;  %v2623_v20 = vadd.f32 %v2619_v17, %v2429_v53 }
 0xaca   :  { %v2627_v21 = vsel %vm857_vm3, %v2623_v20, 0.0  ;;  %v2622_v22 = vadd.f32 %v2614_v19, %v2428_v50  ;;  %v8319_v50 = vld [vmem:[#allocation10] ss:$0 sm:$0xff] }
 0xacb   :  { %2628 = vadd.xlane.f32.xlu0 %v2627_v21 }
 0xacc   :  { %v2624_v23 = vsel %vm857_vm3, %v2622_v22, 0.0 }
 0xacd   :  { %2625 = vadd.xlane.f32.xlu1 %v2624_v23 }
 0xb54   :  { %v2629_v24 = vpop.xlane.xlu0 %2628 }
 0xb55   :  { %v2631_v27 = vmul.f32 0.03125, %v2629_v24 }
 0xb56   :  { %v2626_v25 = vpop.xlane.xlu1 %2625 }
 0xb57   :  { %v2633_v26 = vsub.f32 %v2623_v20, %v2631_v27  ;;  %v2630_v28 = vmul.f32 0.03125, %v2626_v25 }
 0xb59   :  { %v2632_v29 = vsub.f32 %v2622_v22, %v2630_v28  ;;  %v2635_v32 = vmul.f32 %v2633_v26, %v2633_v26 }
 0xb5b   :  { %v2639_v34 = vsel %vm857_vm3, %v2635_v32, 0.0  ;;  %v2634_v35 = vmul.f32 %v2632_v29, %v2632_v29 }
 0xb5c   :  { %2640 = vadd.xlane.f32.xlu0 %v2639_v34 }
 0xb5d   :  { %v2636_v36 = vsel %vm857_vm3, %v2634_v35, 0.0 }
 0xb5e   :  { %2637 = vadd.xlane.f32.xlu1 %v2636_v36 }
 0xbe5   :  { %v2641_v41 = vpop.xlane.xlu0 %2640 }
 0xbe6   :  { %v2643_v44 = vmul.f32 0.03125, %v2641_v41 }
 0xbe7   :  { %v2638_v45 = vpop.xlane.xlu1 %2637 }
 0xbe8   :  { %v2645_v46 = vadd.f32 1e-05, %v2643_v44  ;;  %v2642_v47 = vmul.f32 0.03125, %v2638_v45 }
 0xbea   :  { %9329 = vrsqrt.f32 %v2645_v46  ;;  %v2644_v48 = vadd.f32 1e-05, %v2642_v47 }
 0xbec   :  { %9331 = vrsqrt.f32 %v2644_v48 }
 0xbf7   :  { %v9330_v49 = vpop.eup %9329 }
 0xbf8   :  { %v2649_v51 = vmul.f32 %v9330_v49, %v2633_v26 }
 0xbf9   :  { %v9332_v53 = vpop.eup %9331 }
 0xbfa   :  { %v2648_v54 = vmul.f32 %v9332_v53, %v2632_v29  ;;  %v2657_v55 = vmul.f32 %v8319_v50, %v2649_v51 }
 0xbfc   :  { %v2656_v57 = vmul.f32 %v8319_v50, %v2648_v54  ;;  %v10574_v59 = vadd.f32 %v8320_v56, %v2657_v55 }
 0xbfe   :  { %v10572_v58 = vadd.f32 %v8320_v56, %v2656_v57 }
 0xc00   :  { %8835 = vmatprep.mubr.msk.f32.mxu1 %vm857_vm3, %v10572_v58 }
 0xc01   :  { %8836 = vmatmul.mubr.msk.f32.vlgmr.msra.gmra.mxu1 %vm857_vm3, %v10574_v59 }
 0xc02   :  { %8845 = vmatprep.mubr.msk.f32.mxu1 %vm9967_vm4, %v9964_v33 }
 0xcc1   :  { %v8837_v60 = vpop.f32.mrf.mxu1 }
 0xcc2   :  { %v10588_v0 = vadd.f32 %v8837_v60, %v8321_v61 }
 0xcc3   :  { %v2768_v62 = vpop.f32.mrf.mxu1 }
 0xcc4   :  { %v10582_v63 = vadd.f32 %v8321_v61, %v2768_v62 }
 0xcc6   :  { %2780 = vrot.lane.b32.xlu0 %v10582_v63, %s9968_s30  ;;  %2778 = vrot.lane.b32.xlu1 %v10582_v63, %s9966_s2 }
 0xcca   :  { %2787 = vrot.lane.b32.xlu0 %v10588_v0, %s9968_s30  ;;  %2782 = vrot.lane.b32.xlu1 %v10582_v63, %s9965_s6 }
 0xcce   :  { %2791 = vrot.lane.b32.xlu0 %v10582_v63, %s9969_s7  ;;  %2785 = vrot.lane.b32.xlu1 %v10588_v0, %s9966_s2 }
 0xcd2   :  { %2789 = vrot.lane.b32.xlu1 %v10588_v0, %s9965_s6 }
 0xd38   :  { %v10600_v1 = vpop.permute.xlu0 %2780  ;;  %v10602_v2 = vpop.permute.xlu1 %2778 }
 0xd39   :  { %2943 = vrot.lane.b32.xlu0 %v10600_v1, %s9969_s7  ;;  %2867 = vrot.lane.b32.xlu1 %v10602_v2, %s9969_s7 }
 0xd3c   :  { %v10608_v3 = vpop.permute.xlu0 %2787  ;;  %v10610_v4 = vpop.permute.xlu1 %2782 }
 0xd3d   :  { %3095 = vrot.lane.b32.xlu0 %v10588_v0, %s9969_s7  ;;  %3019 = vrot.lane.b32.xlu1 %v10610_v4, %s9969_s7 }
 0xd40   :  { %v2792_v5 = vpop.permute.xlu0 %2791  ;;  %v10616_v6 = vpop.permute.xlu1 %2785 }
 0xd41   :  { %3247 = vrot.lane.b32.xlu0 %v10608_v3, %s9969_s7  ;;  %8839 = vmatpush3.xpose.msk.msra.mxu0 %vm955_vm5, %v2792_v5 }
 0xd42   :  { %3171 = vrot.lane.b32.xlu1 %v10616_v6, %s9969_s7  ;;  %8848 = vmatprep.subr.mxu0 %v9964_v33 }
 0xd44   :  { %8841 = vmatmul.mubr.msk.f32.vlgmr.msra.gmra.mxu0 %vm955_vm5, %v10582_v63  ;;  %v10626_v7 = vpop.permute.xlu1 %2789 }
 0xd45   :  { %8850 = vmatprep.mubr.msk.f32.mxu0 %vm9967_vm4, %v9964_v33 }
 0xd46   :  { %3323 = vrot.lane.b32.xlu1 %v10626_v7, %s9969_s7 }
 0xdab   :  { %v2944_v8 = vpop.permute.xlu0 %2943  ;;  %v2868_v9 = vpop.permute.xlu1 %2867 }
 0xdac   :  { %8844 = vmatpush3.xpose.msk.msra.mxu1 %vm955_vm5, %v2868_v9  ;;  %8849 = vmatpush3.xpose.msk.msra.mxu0 %vm955_vm5, %v2944_v8 }
 0xdad   :  { %8858 = vmatprep.subr.mxu0 %v9964_v33  ;;  %8853 = vmatprep.subr.mxu1 %v9964_v33 }
 0xdaf   :  { %8851 = vmatmul.mubr.msk.f32.vlgmr.msra.gmra.mxu0 %vm955_vm5, %v10600_v1  ;;  %v3096_v10 = vpop.permute.xlu0 %3095  ;;  %8846 = vmatmul.mubr.msk.f32.vlgmr.msra.gmra.mxu1 %vm955_vm5, %v10602_v2  ;;  %v3020_v11 = vpop.permute.xlu1 %3019 }
 0xdb0   :  { %8854 = vmatpush3.xpose.msk.msra.mxu1 %vm955_vm5, %v3020_v11  ;;  %8859 = vmatpush3.xpose.msk.msra.mxu0 %vm955_vm5, %v3096_v10 }
 0xdb1   :  { %8855 = vmatprep.mubr.msk.f32.mxu1 %vm9967_vm4, %v9964_v33  ;;  %8860 = vmatprep.mubr.msk.f32.mxu0 %vm9967_vm4, %v9964_v33 }
 0xdb2   :  { %8868 = vmatprep.subr.mxu0 %v9964_v33  ;;  %8863 = vmatprep.subr.mxu1 %v9964_v33 }
 0xdb3   :  { %8861 = vmatmul.mubr.msk.f32.vlgmr.msra.gmra.mxu0 %vm955_vm5, %v10588_v0  ;;  %v3248_v12 = vpop.permute.xlu0 %3247  ;;  %8856 = vmatmul.mubr.msk.f32.vlgmr.msra.gmra.mxu1 %vm955_vm5, %v10610_v4 }
 0xdb4   :  { %v3172_v43 = vpop.permute.xlu1 %3171  ;;  %8869 = vmatpush3.xpose.msk.msra.mxu0 %vm955_vm5, %v3248_v12  ;;  %8865 = vmatprep.mubr.msk.f32.mxu1 %vm9967_vm4, %v9964_v33 }
 0xdb5   :  { %8864 = vmatpush3.xpose.msk.msra.mxu1 %vm955_vm5, %v3172_v43  ;;  %8870 = vmatprep.mubr.msk.f32.mxu0 %vm9967_vm4, %v9964_v33 }
 0xdb6   :  { %8873 = vmatprep.subr.mxu1 %v9964_v33  ;;  %8878 = vmatprep.subr.mxu0 %v9964_v33 }
 0xdb7   :  { %8871 = vmatmul.mubr.msk.f32.vlgmr.msra.gmra.mxu0 %vm955_vm5, %v10608_v3 }
 0xdb8   :  { %8866 = vmatmul.mubr.msk.f32.vlgmr.msra.gmra.mxu1 %vm955_vm5, %v10616_v6  ;;  %v3324_v13 = vpop.permute.xlu1 %3323  ;;  %8880 = vmatprep.mubr.msk.f32.mxu0 %vm9967_vm4, %v9964_v33 }
 0xdb9   :  { %8874 = vmatpush3.xpose.msk.msra.mxu1 %vm955_vm5, %v3324_v13  ;;  %8875 = vmatprep.mubr.msk.f32.mxu1 %vm9967_vm4, %v9964_v33 }
 0xdba   :  { %8883 = vmatprep.subr.mxu1 %v9964_v33 }
 0xdbc   :  { %8876 = vmatmul.mubr.msk.f32.vlgmr.msra.gmra.mxu1 %vm955_vm5, %v10626_v7 }
 0xdbd   :  { %8885 = vmatprep.mubr.msk.f32.mxu1 %vm9967_vm4, %v9964_v33 }
 0xe04   :  { %v2863_v42 = vpop.f32.mrf.mxu0 }
 0xe05   :  { %v3399_v14 = vmul.f32 0.35355338, %v2863_v42 }
 0xe06   :  { %v8842_v15 = vpop.f32.mrf.mxu0 }
 0xe07   :  { %v3407_v16 = vsel %vm955_vm5, %v3399_v14, -inf }
 0xe08   :  { %3408 = vmax.xlane.f32.xlu0 %v3407_v16 }
 0xe6f   :  { %v2939_v17 = vpop.f32.mrf.mxu1  ;;  %v3015_v18 = vpop.f32.mrf.mxu0 }
 0xe70   :  { %v3400_v19 = vmul.f32 0.35355338, %v2939_v17  ;;  %v3401_v20 = vmul.f32 0.35355338, %v3015_v18 }
 0xe71   :  { %v8847_v21 = vpop.f32.mrf.mxu1  ;;  %v8852_v22 = vpop.f32.mrf.mxu0 }
 0xe72   :  { %v3413_v23 = vsel %vm955_vm5, %v3401_v20, -inf  ;;  %v3410_v24 = vsel %vm955_vm5, %v3400_v19, -inf }
 0xe73   :  { %3414 = vmax.xlane.f32.xlu0 %v3413_v23  ;;  %v3167_v27 = vpop.f32.mrf.mxu0  ;;  %3411 = vmax.xlane.f32.xlu1 %v3410_v24  ;;  %v3091_v25 = vpop.f32.mrf.mxu1 }
 0xe74   :  { %v3403_v26 = vmul.f32 0.35355338, %v3167_v27  ;;  %v3402_v28 = vmul.f32 0.35355338, %v3091_v25 }
 0xe75   :  { %v8857_v29 = vpop.f32.mrf.mxu1  ;;  %v8862_v32 = vpop.f32.mrf.mxu0 }
 0xe76   :  { %v3419_v34 = vsel %vm955_vm5, %v3403_v26, -inf  ;;  %v3416_v35 = vsel %vm955_vm5, %v3402_v28, -inf }
 0xe77   :  { %v3319_v36 = vpop.f32.mrf.mxu0  ;;  %3420 = vmax.xlane.f32.xlu1 %v3419_v34  ;;  %3417 = vmax.xlane.f32.xlu0 %v3416_v35 }
 0xe78   :  { %v3405_v38 = vmul.f32 0.35355338, %v3319_v36  ;;  %v3243_v39 = vpop.f32.mrf.mxu1 }
 0xe79   :  { %v3404_v37 = vmul.f32 0.35355338, %v3243_v39  ;;  %v8872_v40 = vpop.f32.mrf.mxu0 }
 0xe7a   :  { %v8867_v41 = vpop.f32.mrf.mxu1  ;;  %v3425_v44 = vsel %vm955_vm5, %v3405_v38, -inf }
 0xe7b   :  { %3426 = vmax.xlane.f32.xlu1 %v3425_v44  ;;  %v3422_v45 = vsel %vm955_vm5, %v3404_v37, -inf }
 0xe7c   :  { %3423 = vmax.xlane.f32.xlu0 %v3422_v45  ;;  %v3395_v46 = vpop.f32.mrf.mxu1 }
 0xe7d   :  { %v3406_v47 = vmul.f32 0.35355338, %v3395_v46 }
 0xe7e   :  { %v8877_v48 = vpop.f32.mrf.mxu1 }
 0xe7f   :  { %v3428_v49 = vsel %vm955_vm5, %v3406_v47, -inf }
 0xe80   :  { %3429 = vmax.xlane.f32.xlu0 %v3428_v49 }
 0xe8c   :  { %3495 = vrot.lane.b32.xlu1 %v10582_v63, %s9970_s25 }
 0xe90   :  { %3647 = vrot.lane.b32.xlu1 %v10600_v1, %s9970_s25 }
 0xe91   :  { %v3409_v50 = vpop.xlane.xlu0 %3408 }
 0xe92   :  { %v3431_v51 = vsub.f32 %v3399_v14, %v3409_v50 }
 0xe94   :  { %3723 = vrot.lane.b32.xlu1 %v10610_v4, %s9970_s25  ;;  %v3439_v53 = vmul.f32 1.442695, %v3431_v51 }
 0xe96   :  { %3571 = vrot.lane.b32.xlu0 %v10602_v2, %s9970_s25  ;;  %9333 = vpow2.f32 %v3439_v53 }
 0xe98   :  { %3875 = vrot.lane.b32.xlu1 %v10616_v6, %s9970_s25 }
 0xe9a   :  { %3799 = vrot.lane.b32.xlu0 %v10588_v0, %s9970_s25 }
 0xea3   :  { %v10694_v54 = vpop.eup %9333 }
 0xea4   :  { %v3455_v55 = vsel %vm955_vm5, %v10694_v54, 0.0 }
 0xebc   :  { %3456 = vadd.xlane.f32.xlu1 %v3455_v55 }
 0xefc   :  { %v3415_v56 = vpop.xlane.xlu0 %3414  ;;  %v3412_v57 = vpop.xlane.xlu1 %3411 }
 0xefd   :  { %v3433_v60 = vsub.f32 %v3401_v20, %v3415_v56  ;;  %v3432_v61 = vsub.f32 %v3400_v19, %v3412_v57 }
 0xeff   :  { %v3443_v62 = vmul.f32 1.442695, %v3433_v60  ;;  %v3441_v63 = vmul.f32 1.442695, %v3432_v61 }
 0xf00   :  { %v3418_v1 = vpop.xlane.xlu0 %3417  ;;  %v3421_v2 = vpop.xlane.xlu1 %3420 }
 0xf01   :  { %9335 = vpow2.f32 %v3443_v62  ;;  %v3434_v0 = vsub.f32 %v3402_v28, %v3418_v1  ;;  %v3435_v4 = vsub.f32 %v3403_v26, %v3421_v2 }
 0xf02   :  { %9337 = vpow2.f32 %v3441_v63 }
 0xf03   :  { %v3445_v5 = vmul.f32 1.442695, %v3434_v0  ;;  %v3447_v6 = vmul.f32 1.442695, %v3435_v4 }
 0xf04   :  { %v3427_v8 = vpop.xlane.xlu1 %3426 }
 0xf05   :  { %9339 = vpow2.f32 %v3445_v5  ;;  %v3424_v9 = vpop.xlane.xlu0 %3423  ;;  %v3437_v10 = vsub.f32 %v3405_v38, %v3427_v8  ;;  %v2673_v8 = vld [vmem:[%s11378_s3 + $0x10] sm:$0xff] }
 0xf06   :  { %9341 = vpow2.f32 %v3447_v6  ;;  %v3436_v11 = vsub.f32 %v3404_v37, %v3424_v9  ;;  %v2674_v6 = vld [vmem:[%s11378_s3 + $0x18] sm:$0xff]  ;;  %v2672_v9 = vld [vmem:[%s11378_s3 + $0x8] sm:$0xff] }
 0xf07   :  { %v3451_v12 = vmul.f32 1.442695, %v3437_v10 }
 0xf08   :  { %v3449_v43 = vmul.f32 1.442695, %v3436_v11  ;;  %v3496_v13 = vpop.permute.xlu1 %3495 }
 0xf09   :  { %9343 = vpow2.f32 %v3451_v12  ;;  %v3430_v42 = vpop.xlane.xlu0 %3429  ;;  %8879 = vmatpush3.msra.mxu0 %v3496_v13 }
 0xf0a   :  { %9345 = vpow2.f32 %v3449_v43  ;;  %v3438_v14 = vsub.f32 %v3406_v47, %v3430_v42  ;;  %8888 = vmatprep.subr.mxu0 %v9964_v33  ;;  %v2671_v43 = vld [vmem:[%s11378_s3] sm:$0xff] }
 0xf0c   :  { %v3453_v15 = vmul.f32 1.442695, %v3438_v14  ;;  %v3648_v34 = vpop.permute.xlu1 %3647 }
 0xf0d   :  { %v3572_v16 = vpop.permute.xlu0 %3571 }
 0xf0e   :  { %v9336_v17 = vpop.eup %9335  ;;  %9347 = vpow2.f32 %v3453_v15  ;;  %8884 = vmatpush3.msra.mxu1 %v3572_v16 }
 0xf0f   :  { %v9338_v18 = vpop.eup %9337  ;;  %v3461_v19 = vsel %vm955_vm5, %v9336_v17, 0.0  ;;  %8893 = vmatprep.subr.mxu1 %v9964_v33 }
 0xf10   :  { %3462 = vadd.xlane.f32.xlu1 %v3461_v19  ;;  %v3458_v20 = vsel %vm955_vm5, %v9338_v18, 0.0  ;;  %v3724_v35 = vpop.permute.xlu1 %3723 }
 0xf11   :  { %3459 = vadd.xlane.f32.xlu0 %v3458_v20 }
 0xf12   :  { %v9340_v21 = vpop.eup %9339 }
 0xf13   :  { %v9342_v22 = vpop.eup %9341  ;;  %v3464_v23 = vsel %vm955_vm5, %v9340_v21, 0.0 }
 0xf14   :  { %v3467_v24 = vsel %vm955_vm5, %v9342_v22, 0.0  ;;  %v3876_v36 = vpop.permute.xlu1 %3875 }
 0xf15   :  { %3465 = vadd.xlane.f32.xlu0 %v3464_v23  ;;  %3468 = vadd.xlane.f32.xlu1 %v3467_v24 }
 0xf16   :  { %v10704_v27 = vpop.eup %9343 }
 0xf17   :  { %v9346_v25 = vpop.eup %9345  ;;  %v3473_v26 = vsel %vm955_vm5, %v10704_v27, 0.0 }
 0xf18   :  { %v3470_v28 = vsel %vm955_vm5, %v9346_v25, 0.0 }
 0xf19   :  { %3471 = vadd.xlane.f32.xlu0 %v3470_v28  ;;  %3474 = vadd.xlane.f32.xlu1 %v3473_v26 }
 0xf1b   :  { %v10709_v29 = vpop.eup %9347 }
 0xf1c   :  { %v3476_v32 = vsel %vm955_vm5, %v10709_v29, 0.0 }
 0xf1d   :  { %3477 = vadd.xlane.f32.xlu0 %v3476_v32 }
 0xf2a   :  { %4027 = vrot.lane.b32.xlu1 %v10626_v7, %s9970_s25  ;;  %v3800_v7 = vpop.permute.xlu0 %3799 }
 0xf33   :  { %3951 = vrot.lane.b32.xlu0 %v10608_v3, %s9970_s25 }
 0xf45   :  { %v3457_v38 = vpop.xlane.xlu1 %3456 }
 0xf46   :  { %9349 = vrcp.f32 %v3457_v38 }
 0xf53   :  { %v9350_v39 = vpop.eup %9349 }
 0xf54   :  { %v3480_v37 = vmul.f32 %v9350_v39, %v10694_v54  ;;  %v8348_v39 = vld [vmem:[#allocation14] ss:$0 sm:$0xff] }
 0xf56   :  { %8881 = vmatmul.mubr.msk.f32.vlgmr.msra.gmra.mxu0 %vm955_vm5, %v3480_v37 }
 0xf57   :  { %8889 = vmatpush3.msra.mxu0 %v3648_v34  ;;  %8890 = vmatprep.mubr.msk.f32.mxu0 %vm9967_vm4, %v9964_v33 }
 0xf58   :  { %8898 = vmatprep.subr.mxu0 %v9964_v33 }
 0xf99   :  { %v3463_v40 = vpop.xlane.xlu1 %3462 }
 0xf9a   :  { %v3460_v41 = vpop.xlane.xlu0 %3459  ;;  %9351 = vrcp.f32 %v3463_v40 }
 0xf9b   :  { %9353 = vrcp.f32 %v3460_v41 }
 0xf9e   :  { %v3466_v3 = vpop.xlane.xlu0 %3465  ;;  %v3469_v44 = vpop.xlane.xlu1 %3468 }
 0xf9f   :  { %9355 = vrcp.f32 %v3466_v3 }
 0xfa0   :  { %9357 = vrcp.f32 %v3469_v44 }
 0xfa2   :  { %v3472_v45 = vpop.xlane.xlu0 %3471  ;;  %v3475_v46 = vpop.xlane.xlu1 %3474 }
 0xfa3   :  { %9359 = vrcp.f32 %v3472_v45 }
 0xfa4   :  { %9361 = vrcp.f32 %v3475_v46 }
 0xfa6   :  { %v3478_v47 = vpop.xlane.xlu0 %3477  ;;  %v4028_v1 = vpop.permute.xlu1 %4027 }
 0xfa7   :  { %v9352_v48 = vpop.eup %9351  ;;  %9363 = vrcp.f32 %v3478_v47 }
 0xfa8   :  { %v9354_v49 = vpop.eup %9353  ;;  %v3484_v50 = vmul.f32 %v9352_v48, %v9336_v17 }
 0xfa9   :  { %v3482_v51 = vmul.f32 %v9354_v49, %v9338_v18 }
 0xfaa   :  { %8891 = vmatmul.mubr.msk.f32.vlgmr.msra.gmra.mxu0 %vm955_vm5, %v3484_v50  ;;  %v3952_v60 = vpop.permute.xlu0 %3951 }
 0xfab   :  { %8886 = vmatmul.mubr.msk.f32.vlgmr.msra.gmra.mxu1 %vm955_vm5, %v3482_v51  ;;  %8899 = vmatpush3.msra.mxu0 %v3800_v7 }
 0xfac   :  { %v9356_v53 = vpop.eup %9355  ;;  %8894 = vmatpush3.msra.mxu1 %v3724_v35  ;;  %8895 = vmatprep.mubr.msk.f32.mxu1 %vm9967_vm4, %v9964_v33 }
 0xfad   :  { %v9358_v54 = vpop.eup %9357  ;;  %8900 = vmatprep.mubr.msk.f32.mxu0 %vm9967_vm4, %v9964_v33  ;;  %8903 = vmatprep.subr.mxu1 %v9964_v33  ;;  %v3486_v55 = vmul.f32 %v9356_v53, %v9340_v21 }
 0xfae   :  { %8908 = vmatprep.subr.mxu0 %v9964_v33  ;;  %v3488_v56 = vmul.f32 %v9358_v54, %v9342_v22 }
 0xfaf   :  { %8896 = vmatmul.mubr.msk.f32.vlgmr.msra.gmra.mxu1 %vm955_vm5, %v3486_v55 }
 0xfb0   :  { %v9360_v57 = vpop.eup %9359  ;;  %8901 = vmatmul.mubr.msk.f32.vlgmr.msra.gmra.mxu0 %vm955_vm5, %v3488_v56  ;;  %8904 = vmatpush3.msra.mxu1 %v3876_v36  ;;  %v2681_v56 = vld [vmem:[%s11379_s16 + $0x18] sm:$0xff] }
 0xfb1   :  { %v9362_v61 = vpop.eup %9361  ;;  %8909 = vmatpush3.msra.mxu0 %v3952_v60  ;;  %8905 = vmatprep.mubr.msk.f32.mxu1 %vm9967_vm4, %v9964_v33  ;;  %v3490_v62 = vmul.f32 %v9360_v57, %v9346_v25  ;;  %v2680_v57 = vld [vmem:[%s11379_s16 + $0x10] sm:$0xff]  ;;  %v2679_v60 = vld [vmem:[%s11379_s16 + $0x8] sm:$0xff] }
 0xfb2   :  { %8910 = vmatprep.mubr.msk.f32.mxu0 %vm9967_vm4, %v9964_v33  ;;  %8913 = vmatprep.subr.mxu1 %v9964_v33  ;;  %v3492_v63 = vmul.f32 %v9362_v61, %v10704_v27  ;;  %v2678_v61 = vld [vmem:[%s11379_s16] sm:$0xff] }
 0xfb3   :  { %8906 = vmatmul.mubr.msk.f32.vlgmr.msra.gmra.mxu1 %vm955_vm5, %v3490_v62  ;;  %8918 = vmatprep.subr.mxu0 %v2674_v6  ;;  %v4547_v62 = vld [vmem:[%s11380_s24 + $0x18] sm:$0xff] }
 0xfb4   :  { %v9364_v2 = vpop.eup %9363  ;;  %8911 = vmatmul.mubr.msk.f32.vlgmr.msra.gmra.mxu0 %vm955_vm5, %v3492_v63  ;;  %8914 = vmatpush3.msra.mxu1 %v4028_v1 }
 0xfb5   :  { %8915 = vmatprep.mubr.msk.f32.mxu1 %vm9967_vm4, %v9964_v33  ;;  %v3494_v0 = vmul.f32 %v9364_v2, %v10709_v29  ;;  %8919 = vmatpush3.msra.mxu0 %v2674_v6 }
 0xfb6   :  { %8920 = vmatprep.subr.mxu0 %v2673_v8  ;;  %8929 = vmatprep.subr.mxu1 %v2681_v56 }
 0xfb7   :  { %8916 = vmatmul.mubr.msk.f32.vlgmr.msra.gmra.mxu1 %vm955_vm5, %v3494_v0  ;;  %8921 = vmatpush3.msra.mxu0 %v2673_v8  ;;  %v8351_v8 = vld [vmem:[#allocation16] ss:$0 sm:$0xff] }
 0xfb8   :  { %8922 = vmatprep.subr.mxu0 %v2672_v9  ;;  %8930 = vmatpush3.msra.mxu1 %v2681_v56 }
 0xfb9   :  { %8923 = vmatpush3.msra.mxu0 %v2672_v9  ;;  %8931 = vmatprep.subr.mxu1 %v2680_v57 }
 0xfba   :  { %8924 = vmatprep.subr.mxu0 %v2671_v43  ;;  %8932 = vmatpush3.msra.mxu1 %v2680_v57 }
 0xfbb   :  { %8925 = vmatpush3.msra.mxu0 %v2671_v43  ;;  %8933 = vmatprep.subr.mxu1 %v2679_v60 }
 0xfbc   :  { %8934 = vmatpush3.msra.mxu1 %v2679_v60 }
 0xfbd   :  { %8935 = vmatprep.subr.mxu1 %v2678_v61 }
 0xfbe   :  { %8936 = vmatpush3.msra.mxu1 %v2678_v61 }
 0xfbf   :  { %8951 = vmatprep.subr.mxu1 %v4547_v62 }
0x1016   :  { %v3567_v4 = vpop.f32.mrf.mxu0 }
0x1018   :  { %v8882_v5 = vpop.f32.mrf.mxu0 }
0x106a   :  { %v3719_v10 = vpop.f32.mrf.mxu0 }
0x106b   :  { %v3643_v11 = vpop.f32.mrf.mxu1  ;;  %4108 = vrot.lane.b32.xlu1 %v3719_v10, %s9972_s9  ;;  %v8352_v10 = vld [vmem:[#allocation17] ss:$0 sm:$0xff] }
0x106c   :  { %4104 = vrot.lane.b32.xlu0 %v3643_v11, %s9971_s10  ;;  %v8892_v12 = vpop.f32.mrf.mxu0 }
0x106d   :  { %v8887_v13 = vpop.f32.mrf.mxu1 }
0x106f   :  { %v3795_v42 = vpop.f32.mrf.mxu1 }
0x1070   :  { %v3871_v14 = vpop.f32.mrf.mxu0  ;;  %4112 = vrot.lane.b32.xlu1 %v3795_v42, %s9973_s0  ;;  %v817_v42 = vadd.f32 %v10450_v52, %v10350_v31  ;;  %v4545_v31 = vld [vmem:[%s11380_s24 + $0x8] sm:$0xff] }
0x1071   :  { %v8897_v15 = vpop.f32.mrf.mxu1  ;;  %v477_v52 = vld [vmem:[%s11381_s18 + $0x8] sm:$0xff] }
0x1072   :  { %v8902_v16 = vpop.f32.mrf.mxu0 }
0x1073   :  { %v3947_v17 = vpop.f32.mrf.mxu1 }
0x1074   :  { %v4023_v18 = vpop.f32.mrf.mxu0  ;;  %4119 = vrot.lane.b32.xlu0 %v3947_v17, %s9971_s10 }
0x1075   :  { %v8907_v19 = vpop.f32.mrf.mxu1 }
0x1076   :  { %v8912_v20 = vpop.f32.mrf.mxu0  ;;  %v4544_v19 = vld [vmem:[%s11380_s24] sm:$0xff] }
0x1077   :  { %v4099_v21 = vpop.f32.mrf.mxu1  ;;  %v10793_v20 = vadd.f32 %v10348_v30, %v477_v52  ;;  %v8353_v30 = vld [vmem:[#allocation19] ss:$0 sm:$0xff] }
0x1078   :  { %4123 = vrot.lane.b32.xlu0 %v4023_v18, %s9972_s9  ;;  %4127 = vrot.lane.b32.xlu1 %v4099_v21, %s9973_s0  ;;  %v4546_v18 = vld [vmem:[%s11380_s24 + $0x10] sm:$0xff]  ;;  %v2686_v21 = vld [vmem:[%s11382_s22 + $0x18] sm:$0xff] }
0x1079   :  { %v8917_v22 = vpop.f32.mrf.mxu1  ;;  %8940 = vmatprep.subr.mxu0 %v2686_v21 }
0x107a   :  { %v2685_v22 = vld [vmem:[%s11382_s22 + $0x10] sm:$0xff] }
0x10dd   :  { %v4109_v23 = vpop.permute.xlu1 %4108 }
0x10de   :  { %v4105_v24 = vpop.permute.xlu0 %4104 }
0x10df   :  { %v4115_v27 = vsel %vm955_vm5, %v3567_v4, %v4105_v24  ;;  %v2683_v24 = vld [vmem:[%s11382_s22] sm:$0xff] }
0x10e0   :  { %v4116_v25 = vsel %vm2279_vm6, %v4115_v27, %v4109_v23  ;;  %v2684_v23 = vld [vmem:[%s11382_s22 + $0x8] sm:$0xff] }
0x10e2   :  { %v4113_v26 = vpop.permute.xlu1 %4112 }
0x10e3   :  { %v4117_v28 = vsel %vm2281_vm7, %v4116_v25, %v4113_v26 }
0x10e4   :  { %8926 = vmatprep.mubr.msk.f32.mxu0 %vm857_vm3, %v4117_v28 }
0x10e6   :  { %v4120_v29 = vpop.permute.xlu0 %4119 }
0x10e7   :  { %v4130_v32 = vsel %vm955_vm5, %v3871_v14, %v4120_v29  ;;  %v476_v14 = vld [vmem:[%s11381_s18] sm:$0xff] }
0x10e8   :  { %v10782_v17 = vadd.f32 %v817_v42, %v476_v14 }
0x10ea   :  { %v4124_v34 = vpop.permute.xlu0 %4123  ;;  %v4128_v35 = vpop.permute.xlu1 %4127 }
0x10eb   :  { %v4131_v36 = vsel %vm2279_vm6, %v4130_v32, %v4124_v34 }
0x10ec   :  { %v4132_v38 = vsel %vm2281_vm7, %v4131_v36, %v4128_v35 }
0x10ed   :  { %8927 = vmatmul.mubr.msk.f32.vlgmr.msra.gmra.mxu0 %vm857_vm3, %v4132_v38 }
0x10ee   :  { %8941 = vmatpush3.msra.mxu0 %v2686_v21 }
0x10ef   :  { %8942 = vmatprep.subr.mxu0 %v2685_v22 }
0x10f0   :  { %8943 = vmatpush3.msra.mxu0 %v2685_v22 }
0x10f1   :  { %8944 = vmatprep.subr.mxu0 %v2684_v23 }
0x10f2   :  { %8945 = vmatpush3.msra.mxu0 %v2684_v23 }
0x10f3   :  { %8946 = vmatprep.subr.mxu0 %v2683_v24 }
0x10f4   :  { %8947 = vmatpush3.msra.mxu0 %v2683_v24 }
0x10f5   :  { %8962 = vmatprep.subr.mxu0 %v9964_v33 }
0x11ad   :  { %v8928_v37 = vpop.f32.mrf.mxu0 }
0x11ae   :  { %v4217_v7 = vadd.f32 %v8928_v37, %v8348_v39 }
0x11af   :  { %v4211_v40 = vpop.f32.mrf.mxu0 }
0x11b0   :  { %v4212_v41 = vadd.f32 %v8348_v39, %v4211_v40  ;;  %v4221_v3 = vadd.f32 %v4217_v7, %v10574_v59  ;;  %v8363_v7 = vld [vmem:[%s11383_s13] ss:$0 sm:$0xff] }
0x11b2   :  { %v4225_v44 = vsel %vm857_vm3, %v4221_v3, 0.0  ;;  %v4220_v45 = vadd.f32 %v4212_v41, %v10572_v58 }
0x11b3   :  { %4226 = vadd.xlane.f32.xlu1 %v4225_v44 }
0x11b4   :  { %v4222_v46 = vsel %vm857_vm3, %v4220_v45, 0.0 }
0x11b5   :  { %4223 = vadd.xlane.f32.xlu0 %v4222_v46 }
0x123c   :  { %v4227_v47 = vpop.xlane.xlu1 %4226 }
0x123d   :  { %v4229_v48 = vmul.f32 0.03125, %v4227_v47 }
0x123e   :  { %v4224_v49 = vpop.xlane.xlu0 %4223 }
0x123f   :  { %v4228_v50 = vmul.f32 0.03125, %v4224_v49  ;;  %v4231_v51 = vsub.f32 %v4221_v3, %v4229_v48 }
0x1241   :  { %v4230_v53 = vsub.f32 %v4220_v45, %v4228_v50  ;;  %v4233_v55 = vmul.f32 %v4231_v51, %v4231_v51 }
0x1243   :  { %v4232_v54 = vmul.f32 %v4230_v53, %v4230_v53  ;;  %v4237_v58 = vsel %vm857_vm3, %v4233_v55, 0.0 }
0x1245   :  { %v4234_v59 = vsel %vm857_vm3, %v4232_v54, 0.0 }
0x1246   :  { %4235 = vadd.xlane.f32.xlu0 %v4234_v59 }
0x124a   :  { %4238 = vadd.xlane.f32.xlu0 %v4237_v58 }
0x12cf   :  { %v4236_v63 = vpop.xlane.xlu0 %4235 }
0x12d0   :  { %v4240_v1 = vmul.f32 0.03125, %v4236_v63 }
0x12d2   :  { %v4242_v2 = vadd.f32 1e-05, %v4240_v1 }
0x12d3   :  { %v4239_v0 = vpop.xlane.xlu0 %4238 }
0x12d4   :  { %9365 = vrsqrt.f32 %v4242_v2  ;;  %v4241_v4 = vmul.f32 0.03125, %v4239_v0 }
0x12d6   :  { %v4243_v5 = vadd.f32 1e-05, %v4241_v4 }
0x12d8   :  { %9367 = vrsqrt.f32 %v4243_v5 }
0x12e1   :  { %v9366_v6 = vpop.eup %9365 }
0x12e2   :  { %v4246_v9 = vmul.f32 %v9366_v6, %v4230_v53 }
0x12e4   :  { %v4254_v11 = vmul.f32 %v8351_v8, %v4246_v9 }
0x12e5   :  { %v9368_v12 = vpop.eup %9367 }
0x12e6   :  { %v4247_v43 = vmul.f32 %v9368_v12, %v4231_v51  ;;  %v10773_v13 = vadd.f32 %v8352_v10, %v4254_v11 }
0x12e8   :  { %v4255_v15 = vmul.f32 %v8351_v8, %v4247_v43  ;;  %8937 = vmatprep.mubr.msk.f32.mxu1 %vm857_vm3, %v10773_v13  ;;  %v5302_v8 = vlaneseq }
0x12ea   :  { %v10780_v16 = vadd.f32 %v8352_v10, %v4255_v15  ;;  %v5303_v10 = vshrl.u32 %v5302_v8, 7  ;;  %v5305_v11 = vand.u32 127, %v5302_v8 }
0x12ec   :  { %8938 = vmatmul.mubr.msk.f32.vlgmr.msra.gmra.mxu1 %vm857_vm3, %v10780_v16  ;;  %vm10906_vm8 = vcmp.gt.s32.totalorder %v5305_v11, %v5303_v10 }
0x12ed   :  { %8952 = vmatpush3.msra.mxu1 %v4547_v62  ;;  %8959 = vmatprep.mubr.msk.f32.mxu1 %vm857_vm3, %v10782_v17 }
0x12ee   :  { %8953 = vmatprep.subr.mxu1 %v4546_v18 }
0x12ef   :  { %8954 = vmatpush3.msra.mxu1 %v4546_v18 }
0x12f0   :  { %8955 = vmatprep.subr.mxu1 %v4545_v31 }
0x12f1   :  { %8956 = vmatpush3.msra.mxu1 %v4545_v31 }
0x12f2   :  { %8957 = vmatprep.subr.mxu1 %v4544_v19 }
0x12f3   :  { %8958 = vmatpush3.msra.mxu1 %v4544_v19 }
0x12f4   :  { %8960 = vmatmul.mubr.msk.f32.vlgmr.msra.gmra.mxu1 %vm857_vm3, %v10793_v20  ;;  %8967 = vmatprep.subr.mxu1 %v9964_v33 }
0x12f5   :  { %8969 = vmatprep.mubr.msk.f32.mxu1 %vm9967_vm4, %v9964_v33 }
0x13ac   :  { %v8939_v27 = vpop.f32.mrf.mxu1 }
0x13ad   :  { %v4348_v25 = vadd.f32 %v8939_v27, %v8353_v30 }
0x13ae   :  { %v4342_v26 = vpop.f32.mrf.mxu1 }
0x13af   :  { %v4354_v28 = vmul.f32 0.044715, %v4348_v25  ;;  %v4343_v29 = vadd.f32 %v8353_v30, %v4342_v26  ;;  %v4352_v53 = vmul.f32 0.5, %v4348_v25 }
0x13b1   :  { %v4356_v32 = vmul.f32 %v4354_v28, %v4348_v25  ;;  %v4353_v34 = vmul.f32 0.044715, %v4343_v29  ;;  %v4351_v50 = vmul.f32 0.5, %v4343_v29 }
0x13b3   :  { %v4358_v35 = vmul.f32 %v4356_v32, %v4348_v25  ;;  %v4355_v36 = vmul.f32 %v4353_v34, %v4343_v29 }
0x13b4   :  { %v8961_v38 = vpop.f32.mrf.mxu1 }
0x13b5   :  { %v4360_v39 = vadd.f32 %v4358_v35, %v4348_v25  ;;  %v4357_v37 = vmul.f32 %v4355_v36, %v4343_v29  ;;  %v10812_v46 = vadd.f32 %v8961_v38, %v8363_v7 }
0x13b6   :  { %v4663_v40 = vpop.f32.mrf.mxu1 }
0x13b7   :  { %v4362_v41 = vmul.f32 0.7978846, %v4360_v39  ;;  %v4359_v3 = vadd.f32 %v4357_v37, %v4343_v29  ;;  %v10806_v44 = vadd.f32 %v8363_v7, %v4663_v40 }
0x13b9   :  { %9369 = vtanh.f32 %v4362_v41  ;;  %4675 = vrot.lane.b32.xlu0 %v10806_v44, %s9968_s30  ;;  %4673 = vrot.lane.b32.xlu1 %v10806_v44, %s9966_s2  ;;  %v4361_v45 = vmul.f32 0.7978846, %v4359_v3 }
0x13bb   :  { %9371 = vtanh.f32 %v4361_v45 }
0x13bd   :  { %4682 = vrot.lane.b32.xlu0 %v10812_v46, %s9968_s30  ;;  %4677 = vrot.lane.b32.xlu1 %v10806_v44, %s9965_s6 }
0x13c1   :  { %4686 = vrot.lane.b32.xlu0 %v10806_v44, %s9969_s7  ;;  %4680 = vrot.lane.b32.xlu1 %v10812_v46, %s9966_s2 }
0x13c5   :  { %4684 = vrot.lane.b32.xlu1 %v10812_v46, %s9965_s6 }
0x13c6   :  { %v9370_v47 = vpop.eup %9369 }
0x13c7   :  { %v4366_v49 = vadd.f32 1.0, %v9370_v47 }
0x13c8   :  { %v9372_v48 = vpop.eup %9371 }
0x13c9   :  { %v4365_v51 = vadd.f32 1.0, %v9372_v48  ;;  %v4368_v59 = vmul.f32 %v4366_v49, %v4352_v53 }
0x13cb   :  { %v4367_v54 = vmul.f32 %v4365_v51, %v4351_v50 }
0x13cd   :  { %8948 = vmatprep.mubr.msk.f32.mxu0 %vm857_vm3, %v4367_v54 }
0x13ce   :  { %8949 = vmatmul.mubr.msk.f32.vlgmr.msra.gmra.mxu0 %vm857_vm3, %v4368_v59 }
0x13cf   :  { %8964 = vmatprep.mubr.msk.f32.mxu0 %vm9967_vm4, %v9964_v33 }
0x142b   :  { %v10828_v55 = vpop.permute.xlu0 %4675  ;;  %v10830_v58 = vpop.permute.xlu1 %4673 }
0x142c   :  { %4838 = vrot.lane.b32.xlu0 %v10828_v55, %s9969_s7  ;;  %4762 = vrot.lane.b32.xlu1 %v10830_v58, %s9969_s7 }
0x142f   :  { %v10836_v56 = vpop.permute.xlu0 %4682  ;;  %v10838_v57 = vpop.permute.xlu1 %4677 }
0x1430   :  { %4990 = vrot.lane.b32.xlu0 %v10812_v46, %s9969_s7  ;;  %4914 = vrot.lane.b32.xlu1 %v10838_v57, %s9969_s7 }
0x1433   :  { %v4687_v60 = vpop.permute.xlu0 %4686  ;;  %v10844_v61 = vpop.permute.xlu1 %4680 }
0x1434   :  { %5142 = vrot.lane.b32.xlu0 %v10836_v56, %s9969_s7  ;;  %5066 = vrot.lane.b32.xlu1 %v10844_v61, %s9969_s7 }
0x1435   :  { %8963 = vmatpush3.xpose.msk.msra.mxu0 %vm955_vm5, %v4687_v60 }
0x1436   :  { %8972 = vmatprep.subr.mxu0 %v9964_v33 }
0x1437   :  { %v10852_v62 = vpop.permute.xlu1 %4684 }
0x1438   :  { %8965 = vmatmul.mubr.msk.f32.vlgmr.msra.gmra.mxu0 %vm955_vm5, %v10806_v44  ;;  %5218 = vrot.lane.b32.xlu1 %v10852_v62, %s9969_s7 }
0x1439   :  { %8974 = vmatprep.mubr.msk.f32.mxu0 %vm9967_vm4, %v9964_v33 }
0x148e   :  { %v10902_v9 = vpop.f32.mrf.mxu0 }
0x1490   :  { %v10904_v12 = vpop.f32.mrf.mxu0 }
0x149e   :  { %v4839_v63 = vpop.permute.xlu0 %4838  ;;  %v4763_v1 = vpop.permute.xlu1 %4762 }
0x149f   :  { %8968 = vmatpush3.xpose.msk.msra.mxu1 %vm955_vm5, %v4763_v1  ;;  %8973 = vmatpush3.xpose.msk.msra.mxu0 %vm955_vm5, %v4839_v63 }
0x14a0   :  { %8977 = vmatprep.subr.mxu1 %v9964_v33  ;;  %8982 = vmatprep.subr.mxu0 %v9964_v33 }
0x14a2   :  { %v4991_v2 = vpop.permute.xlu0 %4990  ;;  %8970 = vmatmul.mubr.msk.f32.vlgmr.msra.gmra.mxu1 %vm955_vm5, %v10830_v58  ;;  %v4915_v0 = vpop.permute.xlu1 %4914  ;;  %8975 = vmatmul.mubr.msk.f32.vlgmr.msra.gmra.mxu0 %vm955_vm5, %v10828_v55 }
0x14a3   :  { %8978 = vmatpush3.xpose.msk.msra.mxu1 %vm955_vm5, %v4915_v0  ;;  %8983 = vmatpush3.xpose.msk.msra.mxu0 %vm955_vm5, %v4991_v2 }
0x14a4   :  { %8979 = vmatprep.mubr.msk.f32.mxu1 %vm9967_vm4, %v9964_v33  ;;  %8984 = vmatprep.mubr.msk.f32.mxu0 %vm9967_vm4, %v9964_v33 }
0x14a5   :  { %8987 = vmatprep.subr.mxu1 %v9964_v33  ;;  %8992 = vmatprep.subr.mxu0 %v9964_v33 }
0x14a6   :  { %v5143_v4 = vpop.permute.xlu0 %5142  ;;  %8980 = vmatmul.mubr.msk.f32.vlgmr.msra.gmra.mxu1 %vm955_vm5, %v10838_v57  ;;  %v5067_v5 = vpop.permute.xlu1 %5066  ;;  %8985 = vmatmul.mubr.msk.f32.vlgmr.msra.gmra.mxu0 %vm955_vm5, %v10812_v46 }
0x14a7   :  { %8988 = vmatpush3.xpose.msk.msra.mxu1 %vm955_vm5, %v5067_v5  ;;  %8993 = vmatpush3.xpose.msk.msra.mxu0 %vm955_vm5, %v5143_v4 }
0x14a8   :  { %8989 = vmatprep.mubr.msk.f32.mxu1 %vm9967_vm4, %v9964_v33  ;;  %8994 = vmatprep.mubr.msk.f32.mxu0 %vm9967_vm4, %v9964_v33 }
0x14a9   :  { %8997 = vmatprep.subr.mxu1 %v9964_v33  ;;  %9002 = vmatprep.subr.mxu0 %v9964_v33 }
0x14aa   :  { %8990 = vmatmul.mubr.msk.f32.vlgmr.msra.gmra.mxu1 %vm955_vm5, %v10844_v61  ;;  %v5219_v6 = vpop.permute.xlu1 %5218  ;;  %8995 = vmatmul.mubr.msk.f32.vlgmr.msra.gmra.mxu0 %vm955_vm5, %v10836_v56 }
0x14ab   :  { %8998 = vmatpush3.xpose.msk.msra.mxu1 %vm955_vm5, %v5219_v6  ;;  %8999 = vmatprep.mubr.msk.f32.mxu1 %vm9967_vm4, %v9964_v33 }
0x14ac   :  { %9007 = vmatprep.subr.mxu1 %v9964_v33  ;;  %9004 = vmatprep.mubr.msk.f32.mxu0 %vm9967_vm4, %v9964_v33 }
0x14ae   :  { %9000 = vmatmul.mubr.msk.f32.vlgmr.msra.gmra.mxu1 %vm955_vm5, %v10852_v62 }
0x14af   :  { %9009 = vmatprep.mubr.msk.f32.mxu1 %vm9967_vm4, %v9964_v33 }
0x14f8   :  { %v4758_v43 = vpop.f32.mrf.mxu0 }
0x14f9   :  { %v5294_v14 = vmul.f32 0.35355338, %v4758_v43 }
0x14fa   :  { %v8966_v15 = vpop.f32.mrf.mxu0 }
0x14fb   :  { %v5307_v18 = vsel %vm10906_vm8, -1e+30, %v5294_v14 }
0x14fc   :  { %v5315_v31 = vsel %vm955_vm5, %v5307_v18, -inf }
0x14fd   :  { %5316 = vmax.xlane.f32.xlu0 %v5315_v31 }
0x1562   :  { %v4834_v52 = vpop.f32.mrf.mxu1  ;;  %v4910_v19 = vpop.f32.mrf.mxu0 }
0x1563   :  { %v5295_v21 = vmul.f32 0.35355338, %v4834_v52  ;;  %v5296_v22 = vmul.f32 0.35355338, %v4910_v19 }
0x1564   :  { %v8971_v23 = vpop.f32.mrf.mxu1  ;;  %v8976_v24 = vpop.f32.mrf.mxu0 }
0x1565   :  { %v5308_v30 = vsel %vm10906_vm8, -1e+30, %v5295_v21  ;;  %v5309_v27 = vsel %vm10906_vm8, -1e+30, %v5296_v22 }
0x1566   :  { %v4986_v25 = vpop.f32.mrf.mxu1  ;;  %v5062_v26 = vpop.f32.mrf.mxu0  ;;  %v5318_v28 = vsel %vm955_vm5, %v5308_v30, -inf  ;;  %v5321_v29 = vsel %vm955_vm5, %v5309_v27, -inf }
0x1567   :  { %v5297_v32 = vmul.f32 0.35355338, %v4986_v25  ;;  %v5298_v34 = vmul.f32 0.35355338, %v5062_v26  ;;  %5319 = vmax.xlane.f32.xlu1 %v5318_v28  ;;  %5322 = vmax.xlane.f32.xlu0 %v5321_v29 }
0x1568   :  { %v8981_v35 = vpop.f32.mrf.mxu1  ;;  %v8986_v36 = vpop.f32.mrf.mxu0 }
0x1569   :  { %v5310_v38 = vsel %vm10906_vm8, -1e+30, %v5297_v32  ;;  %v5311_v39 = vsel %vm10906_vm8, -1e+30, %v5298_v34 }
0x156a   :  { %v5138_v37 = vpop.f32.mrf.mxu1  ;;  %v5214_v7 = vpop.f32.mrf.mxu0  ;;  %v5324_v40 = vsel %vm955_vm5, %v5310_v38, -inf  ;;  %v5327_v41 = vsel %vm955_vm5, %v5311_v39, -inf }
0x156b   :  { %v5299_v3 = vmul.f32 0.35355338, %v5138_v37  ;;  %v5300_v45 = vmul.f32 0.35355338, %v5214_v7  ;;  %5325 = vmax.xlane.f32.xlu0 %v5324_v40  ;;  %5328 = vmax.xlane.f32.xlu1 %v5327_v41 }
0x156c   :  { %v8991_v47 = vpop.f32.mrf.mxu1  ;;  %v8996_v48 = vpop.f32.mrf.mxu0 }
0x156d   :  { %v5312_v49 = vsel %vm10906_vm8, -1e+30, %v5299_v3  ;;  %v5313_v50 = vsel %vm10906_vm8, -1e+30, %v5300_v45 }
0x156e   :  { %v5290_v51 = vpop.f32.mrf.mxu1  ;;  %v5330_v53 = vsel %vm955_vm5, %v5312_v49, -inf  ;;  %v5333_v54 = vsel %vm955_vm5, %v5313_v50, -inf }
0x156f   :  { %v5301_v59 = vmul.f32 0.35355338, %v5290_v51  ;;  %5331 = vmax.xlane.f32.xlu0 %v5330_v53  ;;  %5334 = vmax.xlane.f32.xlu1 %v5333_v54 }
0x1570   :  { %v9001_v60 = vpop.f32.mrf.mxu1 }
0x1571   :  { %v5314_v63 = vsel %vm10906_vm8, -1e+30, %v5301_v59 }
0x1572   :  { %v5336_v1 = vsel %vm955_vm5, %v5314_v63, -inf }
0x1573   :  { %5337 = vmax.xlane.f32.xlu0 %v5336_v1 }
0x1580   :  { %5403 = vrot.lane.b32.xlu1 %v10806_v44, %s9970_s25 }
0x1584   :  { %5555 = vrot.lane.b32.xlu1 %v10828_v55, %s9970_s25 }
0x1586   :  { %v5317_v2 = vpop.xlane.xlu0 %5316 }
0x1587   :  { %v5339_v0 = vsub.f32 %v5307_v18, %v5317_v2 }
0x1588   :  { %5631 = vrot.lane.b32.xlu1 %v10838_v57, %s9970_s25 }
0x1589   :  { %5479 = vrot.lane.b32.xlu0 %v10830_v58, %s9970_s25  ;;  %v5347_v4 = vmul.f32 1.442695, %v5339_v0 }
0x158b   :  { %9373 = vpow2.f32 %v5347_v4 }
0x158c   :  { %5783 = vrot.lane.b32.xlu1 %v10844_v61, %s9970_s25 }
0x158d   :  { %5707 = vrot.lane.b32.xlu0 %v10812_v46, %s9970_s25 }
0x1598   :  { %v10946_v44 = vpop.eup %9373 }
0x1599   :  { %v5363_v55 = vsel %vm955_vm5, %v10946_v44, 0.0 }
0x15b0   :  { %5364 = vadd.xlane.f32.xlu1 %v5363_v55 }
0x15f0   :  { %v5320_v57 = vpop.xlane.xlu1 %5319  ;;  %v5323_v5 = vpop.xlane.xlu0 %5322 }
0x15f1   :  { %v5340_v6 = vsub.f32 %v5308_v30, %v5320_v57  ;;  %v5341_v58 = vsub.f32 %v5309_v27, %v5323_v5 }
0x15f3   :  { %v5349_v8 = vmul.f32 1.442695, %v5340_v6  ;;  %v5351_v10 = vmul.f32 1.442695, %v5341_v58 }
0x15f4   :  { %v5326_v61 = vpop.xlane.xlu0 %5325  ;;  %v5329_v11 = vpop.xlane.xlu1 %5328 }
0x15f5   :  { %9375 = vpow2.f32 %v5349_v8  ;;  %v5342_v46 = vsub.f32 %v5310_v38, %v5326_v61  ;;  %v5343_v43 = vsub.f32 %v5311_v39, %v5329_v11 }
0x15f6   :  { %9377 = vpow2.f32 %v5351_v10 }
0x15f7   :  { %v5353_v42 = vmul.f32 1.442695, %v5342_v46  ;;  %v5355_v14 = vmul.f32 1.442695, %v5343_v43 }
0x15f8   :  { %v5332_v15 = vpop.xlane.xlu0 %5331  ;;  %v5335_v18 = vpop.xlane.xlu1 %5334 }
0x15f9   :  { %9379 = vpow2.f32 %v5353_v42  ;;  %v5344_v31 = vsub.f32 %v5312_v49, %v5332_v15  ;;  %v5345_v52 = vsub.f32 %v5313_v50, %v5335_v18  ;;  %v4552_v15 = vld [vmem:[%s11386_s23 + $0x18] sm:$0xff]  ;;  %v4551_v18 = vld [vmem:[%s11386_s23 + $0x10] sm:$0xff] }
0x15fa   :  { %9381 = vpow2.f32 %v5355_v14 }
0x15fb   :  { %v5357_v19 = vmul.f32 1.442695, %v5344_v31  ;;  %v5359_v21 = vmul.f32 1.442695, %v5345_v52  ;;  %v4550_v31 = vld [vmem:[%s11386_s23 + $0x8] sm:$0xff] }
0x15fc   :  { %v5338_v22 = vpop.xlane.xlu0 %5337  ;;  %v5404_v23 = vpop.permute.xlu1 %5403 }
0x15fd   :  { %9383 = vpow2.f32 %v5357_v19  ;;  %v5346_v24 = vsub.f32 %v5314_v63, %v5338_v22  ;;  %9003 = vmatpush3.msra.mxu0 %v5404_v23 }
0x15fe   :  { %9385 = vpow2.f32 %v5359_v21  ;;  %9012 = vmatprep.subr.mxu0 %v9964_v33  ;;  %v4549_v21 = vld [vmem:[%s11386_s23] sm:$0xff] }
0x15ff   :  { %v5361_v30 = vmul.f32 1.442695, %v5346_v24 }
0x1600   :  { %v5480_v27 = vpop.permute.xlu0 %5479  ;;  %v5556_v3 = vpop.permute.xlu1 %5555 }
0x1601   :  { %9387 = vpow2.f32 %v5361_v30  ;;  %9008 = vmatpush3.msra.mxu1 %v5480_v27 }
0x1602   :  { %v9376_v25 = vpop.eup %9375  ;;  %9017 = vmatprep.subr.mxu1 %v9964_v33 }
0x1603   :  { %v9378_v26 = vpop.eup %9377  ;;  %v5366_v28 = vsel %vm955_vm5, %v9376_v25, 0.0 }
0x1604   :  { %5367 = vadd.xlane.f32.xlu0 %v5366_v28  ;;  %v5369_v29 = vsel %vm955_vm5, %v9378_v26, 0.0  ;;  %v5632_v45 = vpop.permute.xlu1 %5631 }
0x1605   :  { %5370 = vadd.xlane.f32.xlu1 %v5369_v29 }
0x1606   :  { %v9380_v32 = vpop.eup %9379 }
0x1607   :  { %v9382_v34 = vpop.eup %9381  ;;  %v5372_v35 = vsel %vm955_vm5, %v9380_v32, 0.0 }
0x1608   :  { %5373 = vadd.xlane.f32.xlu0 %v5372_v35  ;;  %v5375_v36 = vsel %vm955_vm5, %v9382_v34, 0.0  ;;  %v5784_v47 = vpop.permute.xlu1 %5783 }
0x1609   :  { %5376 = vadd.xlane.f32.xlu1 %v5375_v36  ;;  %v8356_v36 = vld [vmem:[#allocation20] ss:$0 sm:$0xff] }
0x160a   :  { %v9384_v38 = vpop.eup %9383 }
0x160b   :  { %v10956_v39 = vpop.eup %9385  ;;  %v5378_v37 = vsel %vm955_vm5, %v9384_v38, 0.0 }
0x160c   :  { %5379 = vadd.xlane.f32.xlu0 %v5378_v37  ;;  %v5381_v7 = vsel %vm955_vm5, %v10956_v39, 0.0  ;;  %v4453_v37 = vadd.f32 %v10902_v9, %v8356_v36 }
0x160d   :  { %5382 = vadd.xlane.f32.xlu1 %v5381_v7 }
0x160e   :  { %v10961_v40 = vpop.eup %9387 }
0x160f   :  { %v5384_v41 = vsel %vm955_vm5, %v10961_v40, 0.0 }
0x1610   :  { %5385 = vadd.xlane.f32.xlu0 %v5384_v41 }
0x161e   :  { %5935 = vrot.lane.b32.xlu1 %v10852_v62, %s9970_s25  ;;  %v5708_v62 = vpop.permute.xlu0 %5707 }
0x1626   :  { %5859 = vrot.lane.b32.xlu0 %v10836_v56, %s9970_s25  ;;  %s11399_s25 = sld [smem:[#allocation84_spill]] }
0x1639   :  { %v5365_v48 = vpop.xlane.xlu1 %5364 }
0x163a   :  { %9389 = vrcp.f32 %v5365_v48 }
0x1647   :  { %v9390_v49 = vpop.eup %9389 }
0x1648   :  { %v5388_v50 = vmul.f32 %v9390_v49, %v10946_v44 }
0x164a   :  { %9005 = vmatmul.mubr.msk.f32.vlgmr.msra.gmra.mxu0 %vm955_vm5, %v5388_v50 }
0x164b   :  { %9013 = vmatpush3.msra.mxu0 %v5556_v3  ;;  %9014 = vmatprep.mubr.msk.f32.mxu0 %vm9967_vm4, %v9964_v33 }
0x164c   :  { %9022 = vmatprep.subr.mxu0 %v9964_v33 }
0x168d   :  { %v5368_v51 = vpop.xlane.xlu0 %5367 }
0x168e   :  { %9391 = vrcp.f32 %v5368_v51  ;;  %v5371_v56 = vpop.xlane.xlu1 %5370 }
0x168f   :  { %9393 = vrcp.f32 %v5371_v56 }
0x1691   :  { %v5374_v53 = vpop.xlane.xlu0 %5373 }
0x1692   :  { %9395 = vrcp.f32 %v5374_v53  ;;  %v5377_v54 = vpop.xlane.xlu1 %5376 }
0x1693   :  { %9397 = vrcp.f32 %v5377_v54 }
0x1695   :  { %v5380_v59 = vpop.xlane.xlu0 %5379 }
0x1696   :  { %9399 = vrcp.f32 %v5380_v59  ;;  %v5383_v60 = vpop.xlane.xlu1 %5382 }
0x1697   :  { %9401 = vrcp.f32 %v5383_v60 }
0x1699   :  { %v5386_v63 = vpop.xlane.xlu0 %5385 }
0x169a   :  { %9403 = vrcp.f32 %v5386_v63  ;;  %v5936_v11 = vpop.permute.xlu1 %5935 }
0x169b   :  { %v9392_v1 = vpop.eup %9391 }
0x169c   :  { %v9394_v2 = vpop.eup %9393  ;;  %v5390_v0 = vmul.f32 %v9392_v1, %v9376_v25 }
0x169d   :  { %v5392_v4 = vmul.f32 %v9394_v2, %v9378_v26  ;;  %v5860_v58 = vpop.permute.xlu0 %5859 }
0x169e   :  { %9010 = vmatmul.mubr.msk.f32.vlgmr.msra.gmra.mxu1 %vm955_vm5, %v5390_v0 }
0x169f   :  { %v9396_v44 = vpop.eup %9395  ;;  %9015 = vmatmul.mubr.msk.f32.vlgmr.msra.gmra.mxu0 %vm955_vm5, %v5392_v4  ;;  %9018 = vmatpush3.msra.mxu1 %v5632_v45 }
0x16a0   :  { %v9398_v55 = vpop.eup %9397  ;;  %9023 = vmatpush3.msra.mxu0 %v5708_v62  ;;  %9019 = vmatprep.mubr.msk.f32.mxu1 %vm9967_vm4, %v9964_v33  ;;  %v5394_v57 = vmul.f32 %v9396_v44, %v9380_v32 }
0x16a1   :  { %9024 = vmatprep.mubr.msk.f32.mxu0 %vm9967_vm4, %v9964_v33  ;;  %9027 = vmatprep.subr.mxu1 %v9964_v33  ;;  %v5396_v5 = vmul.f32 %v9398_v55, %v9382_v34 }
0x16a2   :  { %9032 = vmatprep.subr.mxu0 %v9964_v33  ;;  %9020 = vmatmul.mubr.msk.f32.vlgmr.msra.gmra.mxu1 %vm955_vm5, %v5394_v57 }
0x16a3   :  { %v9400_v6 = vpop.eup %9399  ;;  %9025 = vmatmul.mubr.msk.f32.vlgmr.msra.gmra.mxu0 %vm955_vm5, %v5396_v5  ;;  %9028 = vmatpush3.msra.mxu1 %v5784_v47 }
0x16a4   :  { %v9402_v8 = vpop.eup %9401  ;;  %9033 = vmatpush3.msra.mxu0 %v5860_v58  ;;  %9029 = vmatprep.mubr.msk.f32.mxu1 %vm9967_vm4, %v9964_v33  ;;  %v5398_v10 = vmul.f32 %v9400_v6, %v9384_v38  ;;  %v4448_v38 = vadd.f32 %v8356_v36, %v10904_v12 }
0x16a5   :  { %9034 = vmatprep.mubr.msk.f32.mxu0 %vm9967_vm4, %v9964_v33  ;;  %9037 = vmatprep.subr.mxu1 %v9964_v33  ;;  %v5400_v61 = vmul.f32 %v9402_v8, %v10956_v39 }
0x16a6   :  { %9030 = vmatmul.mubr.msk.f32.vlgmr.msra.gmra.mxu1 %vm955_vm5, %v5398_v10  ;;  %9042 = vmatprep.subr.mxu0 %v4552_v15  ;;  %v4456_v39 = vadd.f32 %v4448_v38, %v10773_v13 }
0x16a7   :  { %v9404_v46 = vpop.eup %9403  ;;  %9035 = vmatmul.mubr.msk.f32.vlgmr.msra.gmra.mxu0 %vm955_vm5, %v5400_v61  ;;  %9038 = vmatpush3.msra.mxu1 %v5936_v11  ;;  %v8359_v11 = vld [vmem:[#allocation22] ss:$0 sm:$0xff] }
0x16a8   :  { %9039 = vmatprep.mubr.msk.f32.mxu1 %vm9967_vm4, %v9964_v33  ;;  %v5402_v43 = vmul.f32 %v9404_v46, %v10961_v40  ;;  %9043 = vmatpush3.msra.mxu0 %v4552_v15  ;;  %v4458_v7 = vsel %vm857_vm3, %v4456_v39, 0.0  ;;  %v4457_v40 = vadd.f32 %v4453_v37, %v10780_v16 }
0x16a9   :  { %9044 = vmatprep.subr.mxu0 %v4551_v18 }
0x16aa   :  { %9040 = vmatmul.mubr.msk.f32.vlgmr.msra.gmra.mxu1 %vm955_vm5, %v5402_v43  ;;  %9045 = vmatpush3.msra.mxu0 %v4551_v18  ;;  %v4461_v41 = vsel %vm857_vm3, %v4457_v40, 0.0  ;;  %v8390_v43 = vld [vmem:[%s11387_s26] ss:$0 sm:$0xff] }
0x16ab   :  { %9046 = vmatprep.subr.mxu0 %v4550_v31 }
0x16ac   :  { %9047 = vmatpush3.msra.mxu0 %v4550_v31 }
0x16ad   :  { %9048 = vmatprep.subr.mxu0 %v4549_v21 }
0x16ae   :  { %9049 = vmatpush3.msra.mxu0 %v4549_v21 }
0x170a   :  { %v5475_v42 = vpop.f32.mrf.mxu0 }
0x170c   :  { %v9006_v14 = vpop.f32.mrf.mxu0 }
0x175e   :  { %v5551_v52 = vpop.f32.mrf.mxu1 }
0x175f   :  { %v5627_v19 = vpop.f32.mrf.mxu0  ;;  %6012 = vrot.lane.b32.xlu0 %v5551_v52, %s9971_s10 }
0x1760   :  { %6016 = vrot.lane.b32.xlu1 %v5627_v19, %s9972_s9  ;;  %v9011_v22 = vpop.f32.mrf.mxu1 }
0x1761   :  { %v9016_v23 = vpop.f32.mrf.mxu0 }
0x1762   :  { %v5703_v24 = vpop.f32.mrf.mxu1 }
0x1763   :  { %v5779_v30 = vpop.f32.mrf.mxu0 }
0x1764   :  { %6020 = vrot.lane.b32.xlu1 %v5703_v24, %s9973_s0  ;;  %v9021_v27 = vpop.f32.mrf.mxu1 }
0x1765   :  { %v9026_v25 = vpop.f32.mrf.mxu0 }
0x1766   :  { %v5855_v26 = vpop.f32.mrf.mxu1 }
0x1767   :  { %v5931_v28 = vpop.f32.mrf.mxu0  ;;  %6027 = vrot.lane.b32.xlu0 %v5855_v26, %s9971_s10 }
0x1768   :  { %v9031_v29 = vpop.f32.mrf.mxu1 }
0x1769   :  { %v9036_v32 = vpop.f32.mrf.mxu0 }
0x176a   :  { %v6007_v34 = vpop.f32.mrf.mxu1 }
0x176b   :  { %6035 = vrot.lane.b32.xlu1 %v6007_v34, %s9973_s0  ;;  %6031 = vrot.lane.b32.xlu0 %v5931_v28, %s9972_s9 }
0x176c   :  { %v9041_v35 = vpop.f32.mrf.mxu1 }
0x178a   :  { %4459 = vadd.xlane.f32.xlu0 %v4458_v7 }
0x178f   :  { %4462 = vadd.xlane.f32.xlu1 %v4461_v41 }
0x17d1   :  { %v6013_v3 = vpop.permute.xlu0 %6012 }
0x17d2   :  { %v6017_v45 = vpop.permute.xlu1 %6016  ;;  %v6023_v47 = vsel %vm955_vm5, %v5475_v42, %v6013_v3  ;;  %v8360_v42 = vld [vmem:[#allocation23] ss:$0 sm:$0xff] }
0x17d3   :  { %v6024_v48 = vsel %vm2279_vm6, %v6023_v47, %v6017_v45 }
0x17d6   :  { %v6021_v49 = vpop.permute.xlu1 %6020 }
0x17d7   :  { %v6025_v12 = vsel %vm2281_vm7, %v6024_v48, %v6021_v49 }
0x17d8   :  { %9050 = vmatprep.mubr.msk.f32.mxu0 %vm857_vm3, %v6025_v12 }
0x17d9   :  { %v6028_v13 = vpop.permute.xlu0 %6027 }
0x17da   :  { %v6038_v9 = vsel %vm955_vm5, %v5779_v30, %v6028_v13  ;;  %v4562_v13 = vld [vmem:[%s11388_s17 + $0x18] sm:$0xff] }
0x17db   :  { %9064 = vmatprep.subr.mxu0 %v4562_v13 }
0x17dd   :  { %v6036_v50 = vpop.permute.xlu1 %6035  ;;  %v6032_v16 = vpop.permute.xlu0 %6031 }
0x17de   :  { %v6039_v62 = vsel %vm2279_vm6, %v6038_v9, %v6032_v16  ;;  %v4561_v9 = vld [vmem:[%s11388_s17 + $0x10] sm:$0xff]  ;;  %v4560_v16 = vld [vmem:[%s11388_s17 + $0x8] sm:$0xff] }
0x17df   :  { %v6040_v51 = vsel %vm2281_vm7, %v6039_v62, %v6036_v50  ;;  %v4557_v50 = vld [vmem:[%s11389_s20 + $0x18] sm:$0xff]  ;;  %v4556_v62 = vld [vmem:[%s11389_s20 + $0x10] sm:$0xff] }
0x17e0   :  { %9051 = vmatmul.mubr.msk.f32.vlgmr.msra.gmra.mxu0 %vm857_vm3, %v6040_v51  ;;  %9053 = vmatprep.subr.mxu1 %v4557_v50  ;;  %v4559_v51 = vld [vmem:[%s11388_s17] sm:$0xff] }
0x17e1   :  { %9065 = vmatpush3.msra.mxu0 %v4562_v13  ;;  %9054 = vmatpush3.msra.mxu1 %v4557_v50 }
0x17e2   :  { %9066 = vmatprep.subr.mxu0 %v4561_v9  ;;  %9055 = vmatprep.subr.mxu1 %v4556_v62 }
0x17e3   :  { %9067 = vmatpush3.msra.mxu0 %v4561_v9  ;;  %9056 = vmatpush3.msra.mxu1 %v4556_v62 }
0x17e4   :  { %9068 = vmatprep.subr.mxu0 %v4560_v16 }
0x17e5   :  { %9069 = vmatpush3.msra.mxu0 %v4560_v16 }
0x17e6   :  { %9070 = vmatprep.subr.mxu0 %v4559_v51 }
0x17e7   :  { %9071 = vmatpush3.msra.mxu0 %v4559_v51 }
0x17e8   :  { %9085 = vmatprep.subr.mxu0 %v9964_v33 }
0x1813   :  { %v4460_v56 = vpop.xlane.xlu0 %4459 }
0x1814   :  { %v4464_v53 = vmul.f32 0.03125, %v4460_v56  ;;  %v4555_v56 = vld [vmem:[%s11389_s20 + $0x8] sm:$0xff] }
0x1815   :  { %9057 = vmatprep.subr.mxu1 %v4555_v56 }
0x1816   :  { %v4466_v54 = vsub.f32 %v4456_v39, %v4464_v53  ;;  %v4554_v53 = vld [vmem:[%s11389_s20] sm:$0xff]  ;;  %9058 = vmatpush3.msra.mxu1 %v4555_v56 }
0x1817   :  { %9059 = vmatprep.subr.mxu1 %v4554_v53 }
0x1818   :  { %v4463_v59 = vpop.xlane.xlu1 %4462  ;;  %v4468_v60 = vmul.f32 %v4466_v54, %v4466_v54  ;;  %9060 = vmatpush3.msra.mxu1 %v4554_v53 }
0x1819   :  { %v4465_v63 = vmul.f32 0.03125, %v4463_v59  ;;  %9075 = vmatprep.subr.mxu1 %v9964_v33 }
0x181a   :  { %v4470_v1 = vsel %vm857_vm3, %v4468_v60, 0.0 }
0x181b   :  { %v4467_v2 = vsub.f32 %v4457_v40, %v4465_v63  ;;  %4471 = vadd.xlane.f32.xlu0 %v4470_v1 }
0x181d   :  { %v4469_v0 = vmul.f32 %v4467_v2, %v4467_v2 }
0x181f   :  { %v4473_v4 = vsel %vm857_vm3, %v4469_v0, 0.0 }
0x1820   :  { %4474 = vadd.xlane.f32.xlu0 %v4473_v4 }
0x18a0   :  { %v9052_v8 = vpop.f32.mrf.mxu0 }
0x18a1   :  { %v6125_v22 = vadd.f32 %v9052_v8, %v8390_v43 }
0x18a2   :  { %v6119_v61 = vpop.f32.mrf.mxu0 }
0x18a3   :  { %v6120_v14 = vadd.f32 %v8390_v43, %v6119_v61  ;;  %v6129_v27 = vadd.f32 %v6125_v22, %v10793_v20 }
0x18a4   :  { %v4472_v44 = vpop.xlane.xlu0 %4471 }
0x18a5   :  { %v4476_v55 = vmul.f32 0.03125, %v4472_v44  ;;  %v6128_v19 = vadd.f32 %v6120_v14, %v10782_v17  ;;  %v6133_v26 = vsel %vm857_vm3, %v6129_v27, 0.0 }
0x18a7   :  { %v4478_v57 = vadd.f32 1e-05, %v4476_v55  ;;  %v6130_v30 = vsel %vm857_vm3, %v6128_v19, 0.0 }
0x18a9   :  { %9405 = vrsqrt.f32 %v4478_v57  ;;  %v4475_v5 = vpop.xlane.xlu0 %4474 }
0x18aa   :  { %v4477_v6 = vmul.f32 0.03125, %v4475_v5 }
0x18ac   :  { %v4479_v58 = vadd.f32 1e-05, %v4477_v6 }
0x18ae   :  { %9407 = vrsqrt.f32 %v4479_v58  ;;  %v8361_v58 = vld [vmem:[#allocation25] ss:$0 sm:$0xff] }
0x18b6   :  { %v9406_v10 = vpop.eup %9405 }
0x18b7   :  { %v4482_v46 = vmul.f32 %v9406_v10, %v4466_v54  ;;  %v8362_v10 = vld [vmem:[#allocation26] ss:$0 sm:$0xff] }
0x18b9   :  { %v4490_v15 = vmul.f32 %v8359_v11, %v4482_v46  ;;  %v8393_v46 = vld [vmem:[%s11390_s28] ss:$0 sm:$0xff] }
0x18bb   :  { %v9408_v18 = vpop.eup %9407  ;;  %v4498_v31 = vadd.f32 %v8360_v42, %v4490_v15 }
0x18bc   :  { %v4483_v52 = vmul.f32 %v9408_v18, %v4467_v2  ;;  %v8394_v18 = vld [vmem:[%s11391_s27] ss:$0 sm:$0xff] }
0x18bd   :  { %v4502_v21 = vsel %vm857_vm3, %v4498_v31, 0.0 }
0x18be   :  { %4503 = vadd.xlane.f32.xlu1 %v4502_v21  ;;  %v4491_v23 = vmul.f32 %v8359_v11, %v4483_v52 }
0x18c0   :  { %v4499_v24 = vadd.f32 %v8360_v42, %v4491_v23 }
0x18c2   :  { %6131 = vadd.xlane.f32.xlu1 %v6130_v30  ;;  %v4505_v25 = vsel %vm857_vm3, %v4499_v24, 0.0 }
0x18c3   :  { %4506 = vadd.xlane.f32.xlu0 %v4505_v25 }
0x18c7   :  { %6134 = vadd.xlane.f32.xlu0 %v6133_v26 }
0x1947   :  { %v4504_v28 = vpop.xlane.xlu1 %4503 }
0x1948   :  { %v4508_v29 = vmul.f32 0.03125, %v4504_v28 }
0x194a   :  { %v11029_v17 = vsub.f32 %v4498_v31, %v4508_v29 }
0x194b   :  { %v6132_v32 = vpop.xlane.xlu1 %6131 }
0x194c   :  { %v6136_v34 = vmul.f32 0.03125, %v6132_v32  ;;  %v4507_v35 = vpop.xlane.xlu0 %4506  ;;  %v4512_v36 = vmul.f32 %v11029_v17, %v11029_v17  ;;  %v8395_v32 = vld [vmem:[%s11393_s12] ss:$0 sm:$0xff] }
0x194d   :  { %v4509_v38 = vmul.f32 0.03125, %v4507_v35 }
0x194e   :  { %v11033_v39 = vsub.f32 %v6128_v19, %v6136_v34  ;;  %v4514_v20 = vsel %vm857_vm3, %v4512_v36, 0.0 }
0x194f   :  { %v11036_v37 = vsub.f32 %v4499_v24, %v4509_v38  ;;  %4515 = vadd.xlane.f32.xlu1 %v4514_v20 }
0x1950   :  { %v6135_v7 = vpop.xlane.xlu0 %6134  ;;  %v6140_v40 = vmul.f32 %v11033_v39, %v11033_v39 }
0x1951   :  { %v6137_v41 = vmul.f32 0.03125, %v6135_v7  ;;  %v4513_v3 = vmul.f32 %v11036_v37, %v11036_v37 }
0x1952   :  { %v6142_v45 = vsel %vm857_vm3, %v6140_v40, 0.0 }
0x1953   :  { %v11043_v47 = vsub.f32 %v6129_v27, %v6137_v41  ;;  %6143 = vadd.xlane.f32.xlu1 %v6142_v45  ;;  %v4517_v48 = vsel %vm857_vm3, %v4513_v3, 0.0  ;;  %v8398_v27 = vld [vmem:[%s11392_s14] ss:$0 sm:$0xff] }
0x1954   :  { %4518 = vadd.xlane.f32.xlu0 %v4517_v48 }
0x1955   :  { %v6141_v49 = vmul.f32 %v11043_v47, %v11043_v47 }
0x1957   :  { %v6145_v12 = vsel %vm857_vm3, %v6141_v49, 0.0 }
0x1958   :  { %6146 = vadd.xlane.f32.xlu0 %v6145_v12 }
0x19d8   :  { %v4516_v54 = vpop.xlane.xlu1 %4515 }
0x19d9   :  { %v4520_v59 = vmul.f32 0.03125, %v4516_v54 }
0x19db   :  { %v4522_v60 = vadd.f32 1e-05, %v4520_v59 }
0x19dc   :  { %v6144_v63 = vpop.xlane.xlu1 %6143 }
0x19dd   :  { %9409 = vrsqrt.f32 %v4522_v60  ;;  %v6148_v1 = vmul.f32 0.03125, %v6144_v63  ;;  %v4519_v2 = vpop.xlane.xlu0 %4518 }
0x19de   :  { %v4521_v0 = vmul.f32 0.03125, %v4519_v2 }
0x19df   :  { %v6150_v4 = vadd.f32 1e-05, %v6148_v1 }
0x19e0   :  { %v4523_v44 = vadd.f32 1e-05, %v4521_v0 }
0x19e1   :  { %9411 = vrsqrt.f32 %v6150_v4  ;;  %v6147_v55 = vpop.xlane.xlu0 %6146 }
0x19e2   :  { %9413 = vrsqrt.f32 %v4523_v44  ;;  %v6149_v57 = vmul.f32 0.03125, %v6147_v55 }
0x19e4   :  { %v6151_v5 = vadd.f32 1e-05, %v6149_v57 }
0x19e6   :  { %9415 = vrsqrt.f32 %v6151_v5 }
0x19ea   :  { %v9410_v6 = vpop.eup %9409 }
0x19eb   :  { %v4526_v8 = vmul.f32 %v9410_v6, %v11029_v17 }
0x19ed   :  { %v4534_v61 = vmul.f32 %v8361_v58, %v4526_v8 }
0x19ee   :  { %v9412_v11 = vpop.eup %9411 }
0x19ef   :  { %v9414_v43 = vpop.eup %9413  ;;  %v4542_v42 = vadd.f32 %v8362_v10, %v4534_v61  ;;  %v6154_v14 = vmul.f32 %v9412_v11, %v11033_v39 }
0x19f0   :  { %v4527_v15 = vmul.f32 %v9414_v43, %v11036_v37 }
0x19f1   :  { %9072 = vmatprep.mubr.msk.f32.mxu0 %vm857_vm3, %v4542_v42  ;;  %v6162_v31 = vmul.f32 %v8393_v46, %v6154_v14 }
0x19f2   :  { %v4535_v52 = vmul.f32 %v8361_v58, %v4527_v15 }
0x19f3   :  { %v9416_v19 = vpop.eup %9415  ;;  %v11065_v21 = vadd.f32 %v8394_v18, %v6162_v31 }
0x19f4   :  { %v4543_v22 = vadd.f32 %v8362_v10, %v4535_v52  ;;  %v6155_v23 = vmul.f32 %v9416_v19, %v11043_v47 }
0x19f5   :  { %9061 = vmatprep.mubr.msk.f32.mxu1 %vm857_vm3, %v11065_v21 }
0x19f6   :  { %v6163_v24 = vmul.f32 %v8393_v46, %v6155_v23  ;;  %9073 = vmatmul.mubr.msk.f32.vlgmr.msra.gmra.mxu0 %vm857_vm3, %v4543_v22 }
0x19f7   :  { %9087 = vmatprep.mubr.msk.f32.mxu0 %vm9967_vm4, %v9964_v33 }
0x19f8   :  { %v11073_v30 = vadd.f32 %v8394_v18, %v6163_v24 }
0x19fa   :  { %9062 = vmatmul.mubr.msk.f32.vlgmr.msra.gmra.mxu1 %vm857_vm3, %v11073_v30 }
0x19fb   :  { %9077 = vmatprep.mubr.msk.f32.mxu1 %vm9967_vm4, %v9964_v33 }
0x1ab6   :  { %v9074_v25 = vpop.f32.mrf.mxu0 }
0x1ab7   :  { %v11080_v26 = vadd.f32 %v9074_v25, %v8398_v27 }
0x1ab8   :  { %v6337_v28 = vpop.f32.mrf.mxu0 }
0x1ab9   :  { %v11082_v29 = vadd.f32 %v8398_v27, %v6337_v28  ;;  %6368 = vrot.lane.b32.xlu0 %v11080_v26, %s9966_s2 }
0x1aba   :  { %v9063_v17 = vpop.f32.mrf.mxu1 }
0x1abb   :  { %6361 = vrot.lane.b32.xlu1 %v11082_v29, %s9966_s2  ;;  %9076 = vmatpush3.xpose.msk.msra.mxu1 %vm955_vm5, %v11082_v29  ;;  %v6256_v36 = vadd.f32 %v9063_v17, %v8395_v32 }
0x1abc   :  { %v6250_v34 = vpop.f32.mrf.mxu1  ;;  %9080 = vmatprep.subr.mxu1 %v9964_v33 }
0x1abd   :  { %v6251_v35 = vadd.f32 %v8395_v32, %v6250_v34 }
0x1abf   :  { %6363 = vrot.lane.b32.xlu1 %v11082_v29, %s9968_s30  ;;  %6347 = vrot.lane.b32.xlu0 %v6251_v35, %s9966_s2 }
0x1ac0   :  { %9078 = vmatmul.mubr.msk.f32.vlgmr.msra.gmra.mxu1 %vm955_vm5, %v6251_v35 }
0x1ac1   :  { %9082 = vmatprep.mubr.msk.f32.mxu1 %vm9967_vm4, %v9964_v33 }
0x1ac3   :  { %6365 = vrot.lane.b32.xlu1 %v11082_v29, %s9965_s6  ;;  %6349 = vrot.lane.b32.xlu0 %v6251_v35, %s9968_s30 }
0x1ac7   :  { %6354 = vrot.lane.b32.xlu1 %v6256_v36, %s9966_s2  ;;  %6370 = vrot.lane.b32.xlu0 %v11080_v26, %s9968_s30  ;;  %s11396_s2 = sld [smem:[#allocation82_spill]] }
0x1acb   :  { %6351 = vrot.lane.b32.xlu1 %v6251_v35, %s9965_s6  ;;  %6356 = vrot.lane.b32.xlu0 %v6256_v36, %s9968_s30  ;;  %s11397_s30 = sld [smem:[#allocation78_spill]] }
0x1acf   :  { %6372 = vrot.lane.b32.xlu1 %v11080_v26, %s9965_s6 }
0x1ad3   :  { %6358 = vrot.lane.b32.xlu1 %v6256_v36, %s9965_s6  ;;  %s11395_s6 = sld [smem:[#allocation75_spill]] }
0x1b2b   :  { %v11109_v38 = vpop.permute.xlu0 %6368 }
0x1b2d   :  { %v11111_v39 = vpop.permute.xlu1 %6361 }
0x1b2e   :  { %9081 = vmatpush3.xpose.msk.msra.mxu1 %vm955_vm5, %v11111_v39 }
0x1b2f   :  { %9090 = vmatprep.subr.mxu1 %v9964_v33 }
0x1b31   :  { %v11116_v20 = vpop.permute.xlu1 %6363  ;;  %v6348_v37 = vpop.permute.xlu0 %6347 }
0x1b32   :  { %9083 = vmatmul.mubr.msk.f32.vlgmr.msra.gmra.mxu1 %vm955_vm5, %v6348_v37  ;;  %9086 = vmatpush3.xpose.msk.msra.mxu0 %vm955_vm5, %v11116_v20 }
0x1b33   :  { %9095 = vmatprep.subr.mxu0 %v9964_v33  ;;  %9092 = vmatprep.mubr.msk.f32.mxu1 %vm9967_vm4, %v9964_v33 }
0x1b35   :  { %v11124_v7 = vpop.permute.xlu1 %6365  ;;  %v6350_v40 = vpop.permute.xlu0 %6349 }
0x1b36   :  { %9088 = vmatmul.mubr.msk.f32.vlgmr.msra.gmra.mxu0 %vm955_vm5, %v6350_v40  ;;  %9091 = vmatpush3.xpose.msk.msra.mxu1 %vm955_vm5, %v11124_v7 }
0x1b37   :  { %9096 = vmatpush3.xpose.msk.msra.mxu0 %vm955_vm5, %v11080_v26  ;;  %9097 = vmatprep.mubr.msk.f32.mxu0 %vm9967_vm4, %v9964_v33 }
0x1b38   :  { %9105 = vmatprep.subr.mxu0 %v9964_v33  ;;  %9100 = vmatprep.subr.mxu1 %v9964_v33 }
0x1b39   :  { %v6355_v41 = vpop.permute.xlu1 %6354  ;;  %v11135_v3 = vpop.permute.xlu0 %6370 }
0x1b3a   :  { %9098 = vmatmul.mubr.msk.f32.vlgmr.msra.gmra.mxu0 %vm955_vm5, %v6256_v36 }
0x1b3b   :  { %9106 = vmatpush3.xpose.msk.msra.mxu0 %vm955_vm5, %v11135_v3  ;;  %9107 = vmatprep.mubr.msk.f32.mxu0 %vm9967_vm4, %v9964_v33 }
0x1b3c   :  { %9115 = vmatprep.subr.mxu0 %v9964_v33 }
0x1b3d   :  { %v6352_v45 = vpop.permute.xlu1 %6351  ;;  %v6357_v47 = vpop.permute.xlu0 %6356 }
0x1b3e   :  { %9093 = vmatmul.mubr.msk.f32.vlgmr.msra.gmra.mxu1 %vm955_vm5, %v6352_v45  ;;  %9108 = vmatmul.mubr.msk.f32.vlgmr.msra.gmra.mxu0 %vm955_vm5, %v6357_v47 }
0x1b3f   :  { %9101 = vmatpush3.xpose.msk.msra.mxu1 %vm955_vm5, %v11109_v38  ;;  %9102 = vmatprep.mubr.msk.f32.mxu1 %vm9967_vm4, %v9964_v33 }
0x1b40   :  { %9110 = vmatprep.subr.mxu1 %v9964_v33  ;;  %9117 = vmatprep.mubr.msk.f32.mxu0 %vm9967_vm4, %v9964_v33 }
0x1b41   :  { %v11152_v48 = vpop.permute.xlu1 %6372 }
0x1b42   :  { %9103 = vmatmul.mubr.msk.f32.vlgmr.msra.gmra.mxu1 %vm955_vm5, %v6355_v41 }
0x1b43   :  { %9111 = vmatpush3.xpose.msk.msra.mxu1 %vm955_vm5, %v11152_v48  ;;  %9112 = vmatprep.mubr.msk.f32.mxu1 %vm9967_vm4, %v9964_v33 }
0x1b44   :  { %9120 = vmatprep.subr.mxu1 %v9964_v33 }
0x1b45   :  { %v6359_v49 = vpop.permute.xlu1 %6358 }
0x1b46   :  { %9113 = vmatmul.mubr.msk.f32.vlgmr.msra.gmra.mxu1 %vm955_vm5, %v6359_v49 }
0x1b47   :  { %9122 = vmatprep.mubr.msk.f32.mxu1 %vm9967_vm4, %v9964_v33 }
0x1b80   :  { %v6444_v12 = vpop.f32.mrf.mxu1 }
0x1b81   :  { %v6966_v13 = vmul.f32 0.35355338, %v6444_v12 }
0x1b82   :  { %v9079_v9 = vpop.f32.mrf.mxu1 }
0x1b83   :  { %v6974_v50 = vsel %vm955_vm5, %v6966_v13, -inf }
0x1b84   :  { %6975 = vmax.xlane.f32.xlu0 %v6974_v50 }
0x1bf2   :  { %v6518_v16 = vpop.f32.mrf.mxu1 }
0x1bf3   :  { %v6967_v62 = vmul.f32 0.35355338, %v6518_v16 }
0x1bf4   :  { %v9084_v51 = vpop.f32.mrf.mxu1 }
0x1bf5   :  { %v6977_v56 = vsel %vm955_vm5, %v6967_v62, -inf }
0x1bf6   :  { %6978 = vmax.xlane.f32.xlu1 %v6977_v56  ;;  %v6592_v53 = vpop.f32.mrf.mxu0 }
0x1bf7   :  { %v6968_v54 = vmul.f32 0.35355338, %v6592_v53 }
0x1bf8   :  { %v9089_v59 = vpop.f32.mrf.mxu0 }
0x1bf9   :  { %v6980_v60 = vsel %vm955_vm5, %v6968_v54, -inf }
0x1bfa   :  { %6981 = vmax.xlane.f32.xlu0 %v6980_v60  ;;  %v6740_v63 = vpop.f32.mrf.mxu0 }
0x1bfb   :  { %v6970_v1 = vmul.f32 0.35355338, %v6740_v63 }
0x1bfc   :  { %v9099_v2 = vpop.f32.mrf.mxu0 }
0x1bfd   :  { %v6986_v0 = vsel %vm955_vm5, %v6970_v1, -inf }
0x1bfe   :  { %v6666_v4 = vpop.f32.mrf.mxu1  ;;  %6987 = vmax.xlane.f32.xlu1 %v6986_v0  ;;  %v6888_v44 = vpop.f32.mrf.mxu0 }
0x1bff   :  { %v6969_v55 = vmul.f32 0.35355338, %v6666_v4  ;;  %v6972_v57 = vmul.f32 0.35355338, %v6888_v44 }
0x1c00   :  { %v9094_v5 = vpop.f32.mrf.mxu1  ;;  %v9109_v6 = vpop.f32.mrf.mxu0 }
0x1c01   :  { %v6983_v58 = vsel %vm955_vm5, %v6969_v55, -inf  ;;  %v6992_v8 = vsel %vm955_vm5, %v6972_v57, -inf }
0x1c02   :  { %v6814_v10 = vpop.f32.mrf.mxu1  ;;  %6984 = vmax.xlane.f32.xlu0 %v6983_v58  ;;  %6993 = vmax.xlane.f32.xlu1 %v6992_v8 }
0x1c03   :  { %v6971_v61 = vmul.f32 0.35355338, %v6814_v10 }
0x1c04   :  { %v9104_v11 = vpop.f32.mrf.mxu1 }
0x1c05   :  { %v6989_v46 = vsel %vm955_vm5, %v6971_v61, -inf }
0x1c06   :  { %v6962_v43 = vpop.f32.mrf.mxu1  ;;  %6990 = vmax.xlane.f32.xlu0 %v6989_v46 }
0x1c07   :  { %v6973_v42 = vmul.f32 0.35355338, %v6962_v43 }
0x1c08   :  { %v9114_v14 = vpop.f32.mrf.mxu1 }
0x1c09   :  { %v6995_v15 = vsel %vm955_vm5, %v6973_v42, -inf }
0x1c0a   :  { %6996 = vmax.xlane.f32.xlu0 %v6995_v15 }
0x1c0d   :  { %v6976_v18 = vpop.xlane.xlu0 %6975 }
0x1c0e   :  { %v6998_v31 = vsub.f32 %v6966_v13, %v6976_v18 }
0x1c10   :  { %v7006_v52 = vmul.f32 1.442695, %v6998_v31 }
0x1c12   :  { %9417 = vpow2.f32 %v7006_v52 }
0x1c13   :  { %7062 = vrot.lane.b32.xlu1 %v11082_v29, %s9969_s7 }
0x1c17   :  { %7214 = vrot.lane.b32.xlu1 %v11116_v20, %s9969_s7 }
0x1c1b   :  { %7290 = vrot.lane.b32.xlu1 %v11124_v7, %s9969_s7 }
0x1c1f   :  { %7442 = vrot.lane.b32.xlu1 %v11109_v38, %s9969_s7  ;;  %v11183_v19 = vpop.eup %9417 }
0x1c20   :  { %7138 = vrot.lane.b32.xlu0 %v11111_v39, %s9969_s7  ;;  %v7022_v22 = vsel %vm955_vm5, %v11183_v19, 0.0 }
0x1c24   :  { %7366 = vrot.lane.b32.xlu0 %v11080_v26, %s9969_s7 }
0x1c43   :  { %7023 = vadd.xlane.f32.xlu1 %v7022_v22 }
0x1c7f   :  { %v6979_v23 = vpop.xlane.xlu1 %6978 }
0x1c80   :  { %v6999_v24 = vsub.f32 %v6967_v62, %v6979_v23 }
0x1c82   :  { %v7008_v27 = vmul.f32 1.442695, %v6999_v24 }
0x1c83   :  { %v6982_v25 = vpop.xlane.xlu0 %6981 }
0x1c84   :  { %9419 = vpow2.f32 %v7008_v27  ;;  %v7000_v28 = vsub.f32 %v6968_v54, %v6982_v25 }
0x1c86   :  { %v7010_v29 = vmul.f32 1.442695, %v7000_v28 }
0x1c87   :  { %v6988_v17 = vpop.xlane.xlu1 %6987 }
0x1c88   :  { %9421 = vpow2.f32 %v7010_v29  ;;  %v7002_v26 = vsub.f32 %v6970_v1, %v6988_v17 }
0x1c8a   :  { %v7014_v32 = vmul.f32 1.442695, %v7002_v26 }
0x1c8b   :  { %v6994_v34 = vpop.xlane.xlu1 %6993  ;;  %v6985_v35 = vpop.xlane.xlu0 %6984 }
0x1c8c   :  { %9423 = vpow2.f32 %v7014_v32  ;;  %v7004_v36 = vsub.f32 %v6972_v57, %v6994_v34  ;;  %v7001_v38 = vsub.f32 %v6969_v55, %v6985_v35  ;;  %v4567_v35 = vld [vmem:[%s11394_s1 + $0x18] sm:$0xff] }
0x1c8e   :  { %v7018_v39 = vmul.f32 1.442695, %v7004_v36  ;;  %v7012_v20 = vmul.f32 1.442695, %v7001_v38  ;;  %v4566_v38 = vld [vmem:[%s11394_s1 + $0x10] sm:$0xff] }
0x1c8f   :  { %v7063_v37 = vpop.permute.xlu1 %7062  ;;  %v6991_v7 = vpop.xlane.xlu0 %6990 }
0x1c90   :  { %9425 = vpow2.f32 %v7018_v39  ;;  %v7003_v40 = vsub.f32 %v6971_v61, %v6991_v7  ;;  %9116 = vmatpush3.msra.mxu0 %v7063_v37  ;;  %v4565_v39 = vld [vmem:[%s11394_s1 + $0x8] sm:$0xff]  ;;  %v4564_v7 = vld [vmem:[%s11394_s1] sm:$0xff] }
0x1c91   :  { %v9420_v41 = vpop.eup %9419  ;;  %9427 = vpow2.f32 %v7012_v20  ;;  %9125 = vmatprep.subr.mxu0 %v9964_v33 }
0x1c92   :  { %v7016_v45 = vmul.f32 1.442695, %v7003_v40  ;;  %v7025_v47 = vsel %vm955_vm5, %v9420_v41, 0.0 }
0x1c93   :  { %7026 = vadd.xlane.f32.xlu0 %v7025_v47  ;;  %v6997_v49 = vpop.xlane.xlu0 %6996  ;;  %v7215_v0 = vpop.permute.xlu1 %7214 }
0x1c94   :  { %9429 = vpow2.f32 %v7016_v45  ;;  %v7005_v12 = vsub.f32 %v6973_v42, %v6997_v49 }
0x1c95   :  { %v9422_v13 = vpop.eup %9421 }
0x1c96   :  { %v7020_v9 = vmul.f32 1.442695, %v7005_v12  ;;  %v7028_v50 = vsel %vm955_vm5, %v9422_v13, 0.0 }
0x1c97   :  { %7029 = vadd.xlane.f32.xlu1 %v7028_v50  ;;  %v7139_v16 = vpop.permute.xlu0 %7138  ;;  %v7291_v4 = vpop.permute.xlu1 %7290 }
0x1c98   :  { %9431 = vpow2.f32 %v7020_v9  ;;  %9121 = vmatpush3.msra.mxu1 %v7139_v16 }
0x1c99   :  { %v9424_v62 = vpop.eup %9423  ;;  %9130 = vmatprep.subr.mxu1 %v9964_v33 }
0x1c9a   :  { %v7034_v51 = vsel %vm955_vm5, %v9424_v62, 0.0 }
0x1c9b   :  { %7035 = vadd.xlane.f32.xlu1 %v7034_v51  ;;  %v7443_v44 = vpop.permute.xlu1 %7442 }
0x1c9d   :  { %v9426_v56 = vpop.eup %9425 }
0x1c9e   :  { %v9428_v53 = vpop.eup %9427  ;;  %v7040_v54 = vsel %vm955_vm5, %v9426_v56, 0.0 }
0x1c9f   :  { %7041 = vadd.xlane.f32.xlu1 %v7040_v54  ;;  %v7031_v59 = vsel %vm955_vm5, %v9428_v53, 0.0 }
0x1ca0   :  { %7032 = vadd.xlane.f32.xlu0 %v7031_v59 }
0x1ca1   :  { %v9430_v60 = vpop.eup %9429 }
0x1ca2   :  { %v7037_v63 = vsel %vm955_vm5, %v9430_v60, 0.0 }
0x1ca4   :  { %7038 = vadd.xlane.f32.xlu0 %v7037_v63 }
0x1ca5   :  { %v11195_v1 = vpop.eup %9431 }
0x1ca6   :  { %v7043_v2 = vsel %vm955_vm5, %v11195_v1, 0.0 }
0x1ca8   :  { %7044 = vadd.xlane.f32.xlu0 %v7043_v2 }
0x1cb0   :  { %7594 = vrot.lane.b32.xlu1 %v11152_v48, %s9969_s7  ;;  %v7367_v48 = vpop.permute.xlu0 %7366 }
0x1cbe   :  { %7518 = vrot.lane.b32.xlu0 %v11135_v3, %s9969_s7  ;;  %s11398_s7 = sld [smem:[#allocation79_spill]] }
0x1ccc   :  { %v7024_v55 = vpop.xlane.xlu1 %7023 }
0x1ccd   :  { %9433 = vrcp.f32 %v7024_v55 }
0x1cda   :  { %v9434_v57 = vpop.eup %9433 }
0x1cdb   :  { %v7047_v5 = vmul.f32 %v9434_v57, %v11183_v19 }
0x1cdd   :  { %9118 = vmatmul.mubr.msk.f32.vlgmr.msra.gmra.mxu0 %vm955_vm5, %v7047_v5 }
0x1cde   :  { %9126 = vmatpush3.msra.mxu0 %v7215_v0  ;;  %9127 = vmatprep.mubr.msk.f32.mxu0 %vm9967_vm4, %v9964_v33 }
0x1cdf   :  { %9135 = vmatprep.subr.mxu0 %v9964_v33 }
0x1d1c   :  { %v7027_v6 = vpop.xlane.xlu0 %7026 }
0x1d1d   :  { %9435 = vrcp.f32 %v7027_v6 }
0x1d20   :  { %v7030_v58 = vpop.xlane.xlu1 %7029 }
0x1d21   :  { %9437 = vrcp.f32 %v7030_v58 }
0x1d24   :  { %v7036_v3 = vpop.xlane.xlu1 %7035 }
0x1d25   :  { %9439 = vrcp.f32 %v7036_v3 }
0x1d28   :  { %v7042_v8 = vpop.xlane.xlu1 %7041 }
0x1d29   :  { %9441 = vrcp.f32 %v7042_v8  ;;  %v7033_v10 = vpop.xlane.xlu0 %7032 }
0x1d2a   :  { %v9436_v61 = vpop.eup %9435  ;;  %9443 = vrcp.f32 %v7033_v10 }
0x1d2b   :  { %v7049_v11 = vmul.f32 %v9436_v61, %v9420_v41 }
0x1d2c   :  { %v7595_v25 = vpop.permute.xlu1 %7594 }
0x1d2d   :  { %v7039_v46 = vpop.xlane.xlu0 %7038  ;;  %9123 = vmatmul.mubr.msk.f32.vlgmr.msra.gmra.mxu1 %vm955_vm5, %v7049_v11 }
0x1d2e   :  { %v9438_v43 = vpop.eup %9437  ;;  %9445 = vrcp.f32 %v7039_v46  ;;  %9131 = vmatpush3.msra.mxu1 %v7291_v4  ;;  %9132 = vmatprep.mubr.msk.f32.mxu1 %vm9967_vm4, %v9964_v33  ;;  %v8425_v4 = vld [vmem:[%s11395_s6] ss:$0 sm:$0xff] }
0x1d2f   :  { %v7051_v42 = vmul.f32 %v9438_v43, %v9422_v13  ;;  %9140 = vmatprep.subr.mxu1 %v9964_v33 }
0x1d31   :  { %v7045_v14 = vpop.xlane.xlu0 %7044  ;;  %9128 = vmatmul.mubr.msk.f32.vlgmr.msra.gmra.mxu0 %vm955_vm5, %v7051_v42 }
0x1d32   :  { %v9440_v15 = vpop.eup %9439  ;;  %9447 = vrcp.f32 %v7045_v14  ;;  %9136 = vmatpush3.msra.mxu0 %v7367_v48  ;;  %9137 = vmatprep.mubr.msk.f32.mxu0 %vm9967_vm4, %v9964_v33 }
0x1d33   :  { %9145 = vmatprep.subr.mxu0 %v9964_v33  ;;  %v7055_v18 = vmul.f32 %v9440_v15, %v9424_v62  ;;  %v4578_v15 = vld [vmem:[%s11396_s2 + $0x18] sm:$0xff] }
0x1d35   :  { %v7519_v31 = vpop.permute.xlu0 %7518  ;;  %9138 = vmatmul.mubr.msk.f32.vlgmr.msra.gmra.mxu0 %vm955_vm5, %v7055_v18  ;;  %v4577_v18 = vld [vmem:[%s11396_s2 + $0x10] sm:$0xff] }
0x1d36   :  { %v9442_v52 = vpop.eup %9441  ;;  %9146 = vmatpush3.msra.mxu0 %v7519_v31  ;;  %9147 = vmatprep.mubr.msk.f32.mxu0 %vm9967_vm4, %v9964_v33  ;;  %v4576_v31 = vld [vmem:[%s11396_s2 + $0x8] sm:$0xff] }
0x1d37   :  { %v9444_v19 = vpop.eup %9443  ;;  %v7059_v22 = vmul.f32 %v9442_v52, %v9426_v56  ;;  %9155 = vmatprep.subr.mxu0 %v4567_v35  ;;  %v4575_v52 = vld [vmem:[%s11396_s2] sm:$0xff] }
0x1d38   :  { %v7053_v23 = vmul.f32 %v9444_v19, %v9428_v53 }
0x1d39   :  { %9148 = vmatmul.mubr.msk.f32.vlgmr.msra.gmra.mxu0 %vm955_vm5, %v7059_v22 }
0x1d3a   :  { %9133 = vmatmul.mubr.msk.f32.vlgmr.msra.gmra.mxu1 %vm955_vm5, %v7053_v23  ;;  %9156 = vmatpush3.msra.mxu0 %v4567_v35 }
0x1d3b   :  { %v9446_v24 = vpop.eup %9445  ;;  %9141 = vmatpush3.msra.mxu1 %v7443_v44  ;;  %9142 = vmatprep.mubr.msk.f32.mxu1 %vm9967_vm4, %v9964_v33 }
0x1d3c   :  { %9150 = vmatprep.subr.mxu1 %v9964_v33  ;;  %v7057_v27 = vmul.f32 %v9446_v24, %v9430_v60  ;;  %9157 = vmatprep.subr.mxu0 %v4566_v38 }
0x1d3d   :  { %9158 = vmatpush3.msra.mxu0 %v4566_v38 }
0x1d3e   :  { %9143 = vmatmul.mubr.msk.f32.vlgmr.msra.gmra.mxu1 %vm955_vm5, %v7057_v27  ;;  %9159 = vmatprep.subr.mxu0 %v4565_v39 }
0x1d3f   :  { %v9448_v28 = vpop.eup %9447  ;;  %9151 = vmatpush3.msra.mxu1 %v7595_v25  ;;  %9152 = vmatprep.mubr.msk.f32.mxu1 %vm9967_vm4, %v9964_v33 }
0x1d40   :  { %v7061_v29 = vmul.f32 %v9448_v28, %v11195_v1  ;;  %9160 = vmatpush3.msra.mxu0 %v4565_v39  ;;  %9166 = vmatprep.subr.mxu1 %v4578_v15 }
0x1d41   :  { %9161 = vmatprep.subr.mxu0 %v4564_v7 }
0x1d42   :  { %9153 = vmatmul.mubr.msk.f32.vlgmr.msra.gmra.mxu1 %vm955_vm5, %v7061_v29  ;;  %9162 = vmatpush3.msra.mxu0 %v4564_v7  ;;  %v8428_v29 = vld [vmem:[%s11397_s30] ss:$0 sm:$0xff]  ;;  %v4581_v7 = vld [vmem:[%s11399_s25 + $0x8] sm:$0xff] }
0x1d43   :  { %9167 = vmatpush3.msra.mxu1 %v4578_v15 }
0x1d44   :  { %9168 = vmatprep.subr.mxu1 %v4577_v18 }
0x1d45   :  { %9169 = vmatpush3.msra.mxu1 %v4577_v18 }
0x1d46   :  { %9170 = vmatprep.subr.mxu1 %v4576_v31 }
0x1d47   :  { %9171 = vmatpush3.msra.mxu1 %v4576_v31 }
0x1d48   :  { %9172 = vmatprep.subr.mxu1 %v4575_v52 }
0x1d49   :  { %9173 = vmatpush3.msra.mxu1 %v4575_v52 }
0x1d4a   :  { %9188 = vmatprep.subr.mxu1 %v9964_v33 }
0x1d9d   :  { %v7134_v17 = vpop.f32.mrf.mxu0 }
0x1d9f   :  { %v9119_v26 = vpop.f32.mrf.mxu0 }
0x1da0   :  { %v8429_v26 = vld [vmem:[%s11398_s7] ss:$0 sm:$0xff] }
0x1ded   :  { %v7210_v32 = vpop.f32.mrf.mxu1 }
0x1dee   :  { %7671 = vrot.lane.b32.xlu0 %v7210_v32, %s9971_s10 }
0x1def   :  { %v9124_v34 = vpop.f32.mrf.mxu1 }
0x1df1   :  { %v7286_v36 = vpop.f32.mrf.mxu0 }
0x1df2   :  { %7675 = vrot.lane.b32.xlu1 %v7286_v36, %s9972_s9 }
0x1df3   :  { %v9129_v20 = vpop.f32.mrf.mxu0 }
0x1df4   :  { %v4583_v20 = vld [vmem:[%s11399_s25 + $0x18] sm:$0xff] }
0x1df5   :  { %v7438_v37 = vpop.f32.mrf.mxu0  ;;  %9177 = vmatprep.subr.mxu0 %v4583_v20 }
0x1df7   :  { %v9139_v40 = vpop.f32.mrf.mxu0 }
0x1df8   :  { %v4580_v40 = vld [vmem:[%s11399_s25] sm:$0xff] }
0x1df9   :  { %v7590_v41 = vpop.f32.mrf.mxu0 }
0x1dfa   :  { %v7362_v45 = vpop.f32.mrf.mxu1 }
0x1dfb   :  { %7679 = vrot.lane.b32.xlu1 %v7362_v45, %s9973_s0  ;;  %v9149_v47 = vpop.f32.mrf.mxu0 }
0x1dfc   :  { %v9134_v49 = vpop.f32.mrf.mxu1 }
0x1dfe   :  { %v7514_v12 = vpop.f32.mrf.mxu1 }
0x1dff   :  { %7686 = vrot.lane.b32.xlu0 %v7514_v12, %s9971_s10  ;;  %s11401_s10 = sld [smem:[#allocation85_spill]] }
0x1e00   :  { %v9144_v13 = vpop.f32.mrf.mxu1 }
0x1e02   :  { %v7666_v9 = vpop.f32.mrf.mxu1 }
0x1e03   :  { %7694 = vrot.lane.b32.xlu1 %v7666_v9, %s9973_s0  ;;  %7690 = vrot.lane.b32.xlu0 %v7590_v41, %s9972_s9  ;;  %v8430_v41 = vld [vmem:[%s11400_s5] ss:$0 sm:$0xff]  ;;  %s11402_s9 = sld [smem:[#allocation80_spill]] }
0x1e04   :  { %v9154_v50 = vpop.f32.mrf.mxu1  ;;  %s11403_s0 = sld [smem:[#allocation81_spill]] }
0x1e60   :  { %v7672_v16 = vpop.permute.xlu0 %7671 }
0x1e61   :  { %v7682_v51 = vsel %vm955_vm5, %v7134_v17, %v7672_v16 }
0x1e64   :  { %v7676_v62 = vpop.permute.xlu1 %7675 }
0x1e65   :  { %v7683_v56 = vsel %vm2279_vm6, %v7682_v51, %v7676_v62 }
0x1e6d   :  { %v7680_v53 = vpop.permute.xlu1 %7679 }
0x1e6e   :  { %v7684_v54 = vsel %vm2281_vm7, %v7683_v56, %v7680_v53 }
0x1e6f   :  { %9163 = vmatprep.mubr.msk.f32.mxu0 %vm857_vm3, %v7684_v54 }
0x1e71   :  { %v7687_v59 = vpop.permute.xlu0 %7686 }
0x1e72   :  { %v7697_v60 = vsel %vm955_vm5, %v7438_v37, %v7687_v59  ;;  %v4582_v37 = vld [vmem:[%s11399_s25 + $0x10] sm:$0xff] }
0x1e75   :  { %v7695_v63 = vpop.permute.xlu1 %7694  ;;  %v7691_v1 = vpop.permute.xlu0 %7690 }
0x1e76   :  { %v7698_v2 = vsel %vm2279_vm6, %v7697_v60, %v7691_v1 }
0x1e77   :  { %v7699_v0 = vsel %vm2281_vm7, %v7698_v2, %v7695_v63 }
0x1e78   :  { %9164 = vmatmul.mubr.msk.f32.vlgmr.msra.gmra.mxu0 %vm857_vm3, %v7699_v0 }
0x1e79   :  { %9178 = vmatpush3.msra.mxu0 %v4583_v20 }
0x1e7a   :  { %9179 = vmatprep.subr.mxu0 %v4582_v37 }
0x1e7b   :  { %9180 = vmatpush3.msra.mxu0 %v4582_v37 }
0x1e7c   :  { %9181 = vmatprep.subr.mxu0 %v4581_v7 }
0x1e7d   :  { %9182 = vmatpush3.msra.mxu0 %v4581_v7 }
0x1e7e   :  { %9183 = vmatprep.subr.mxu0 %v4580_v40 }
0x1e7f   :  { %9184 = vmatpush3.msra.mxu0 %v4580_v40 }
0x1f38   :  { %v9165_v44 = vpop.f32.mrf.mxu0 }
0x1f39   :  { %v7784_v55 = vadd.f32 %v9165_v44, %v8425_v4 }
0x1f3a   :  { %v7778_v57 = vpop.f32.mrf.mxu0 }
0x1f3b   :  { %v7788_v5 = vadd.f32 %v7784_v55, %v11073_v30  ;;  %v7779_v48 = vadd.f32 %v8425_v4, %v7778_v57  ;;  %v8433_v57 = vld [vmem:[%s11401_s10] ss:$0 sm:$0xff] }
0x1f3d   :  { %v7787_v6 = vadd.f32 %v7779_v48, %v11065_v21  ;;  %v7792_v58 = vsel %vm857_vm3, %v7788_v5, 0.0 }
0x1f3e   :  { %7793 = vadd.xlane.f32.xlu1 %v7792_v58 }
0x1f3f   :  { %v7789_v3 = vsel %vm857_vm3, %v7787_v6, 0.0 }
0x1f40   :  { %7790 = vadd.xlane.f32.xlu0 %v7789_v3 }
0x1fc7   :  { %v7794_v8 = vpop.xlane.xlu1 %7793 }
0x1fc8   :  { %v7796_v10 = vmul.f32 0.03125, %v7794_v8 }
0x1fc9   :  { %v7791_v61 = vpop.xlane.xlu0 %7790 }
0x1fca   :  { %v7795_v11 = vmul.f32 0.03125, %v7791_v61  ;;  %v7798_v46 = vsub.f32 %v7788_v5, %v7796_v10 }
0x1fcc   :  { %v7797_v43 = vsub.f32 %v7787_v6, %v7795_v11  ;;  %v7800_v21 = vmul.f32 %v7798_v46, %v7798_v46 }
0x1fce   :  { %v7799_v30 = vmul.f32 %v7797_v43, %v7797_v43  ;;  %v7804_v14 = vsel %vm857_vm3, %v7800_v21, 0.0 }
0x1fd0   :  { %v7801_v42 = vsel %vm857_vm3, %v7799_v30, 0.0 }
0x1fd1   :  { %7802 = vadd.xlane.f32.xlu0 %v7801_v42 }
0x1fd5   :  { %7805 = vadd.xlane.f32.xlu0 %v7804_v14 }
0x205a   :  { %v7803_v19 = vpop.xlane.xlu0 %7802 }
0x205b   :  { %v7807_v22 = vmul.f32 0.03125, %v7803_v19 }
0x205d   :  { %v7809_v23 = vadd.f32 1e-05, %v7807_v22 }
0x205e   :  { %v7806_v24 = vpop.xlane.xlu0 %7805 }
0x205f   :  { %9449 = vrsqrt.f32 %v7809_v23  ;;  %v7808_v27 = vmul.f32 0.03125, %v7806_v24 }
0x2061   :  { %v7810_v25 = vadd.f32 1e-05, %v7808_v27 }
0x2063   :  { %9451 = vrsqrt.f32 %v7810_v25 }
0x206c   :  { %v9450_v28 = vpop.eup %9449 }
0x206d   :  { %v7813_v17 = vmul.f32 %v9450_v28, %v7797_v43 }
0x206f   :  { %v7821_v32 = vmul.f32 %v8428_v29, %v7813_v17  ;;  %v8436_v17 = vld [vmem:[%s11402_s9] ss:$0 sm:$0xff] }
0x2070   :  { %v9452_v34 = vpop.eup %9451 }
0x2071   :  { %v7814_v35 = vmul.f32 %v9452_v34, %v7798_v46  ;;  %v7829_v36 = vadd.f32 %v8429_v26, %v7821_v32 }
0x2073   :  { %v7822_v38 = vmul.f32 %v8428_v29, %v7814_v35  ;;  %9174 = vmatprep.mubr.msk.f32.mxu1 %vm857_vm3, %v7829_v36  ;;  %v8437_v35 = vld [vmem:[%s11403_s0] ss:$0 sm:$0xff] }
0x2075   :  { %v7830_v39 = vadd.f32 %v8429_v26, %v7822_v38 }
0x2077   :  { %9175 = vmatmul.mubr.msk.f32.vlgmr.msra.gmra.mxu1 %vm857_vm3, %v7830_v39 }
0x2078   :  { %9196 = vmatprep.mubr.msk.f32.mxu1 %vm9967_vm4, %v9964_v33 }
0x2137   :  { %v9176_v45 = vpop.f32.mrf.mxu1 }
0x2138   :  { %v7915_v47 = vadd.f32 %v9176_v45, %v8430_v41 }
0x2139   :  { %v7909_v49 = vpop.f32.mrf.mxu1 }
0x213a   :  { %v7921_v12 = vmul.f32 0.044715, %v7915_v47  ;;  %v7910_v13 = vadd.f32 %v8430_v41, %v7909_v49  ;;  %v7919_v4 = vmul.f32 0.5, %v7915_v47  ;;  %v8072_v49 = vld [vmem:[%s10273_s8 + $0x18] sm:$0xff] }
0x213b   :  { %9189 = vmatpush3.msra.mxu1 %v8072_v49 }
0x213c   :  { %v7923_v9 = vmul.f32 %v7921_v12, %v7915_v47  ;;  %v7920_v50 = vmul.f32 0.044715, %v7910_v13  ;;  %v7918_v2 = vmul.f32 0.5, %v7910_v13  ;;  %v8071_v12 = vld [vmem:[%s10273_s8 + $0x10] sm:$0xff]  ;;  %9190 = vmatprep.subr.mxu1 %v9964_v33 }
0x213d   :  { %9191 = vmatpush3.msra.mxu1 %v8071_v12 }
0x213e   :  { %v7925_v16 = vmul.f32 %v7923_v9, %v7915_v47  ;;  %v7922_v62 = vmul.f32 %v7920_v50, %v7910_v13  ;;  %9192 = vmatprep.subr.mxu1 %v9964_v33  ;;  %v8069_v9 = vld [vmem:[%s10273_s8] sm:$0xff] }
0x2140   :  { %v7927_v51 = vadd.f32 %v7925_v16, %v7915_v47  ;;  %v7924_v56 = vmul.f32 %v7922_v62, %v7910_v13 }
0x2142   :  { %v7929_v53 = vmul.f32 0.7978846, %v7927_v51  ;;  %v7926_v54 = vadd.f32 %v7924_v56, %v7910_v13  ;;  %v8070_v13 = vld [vmem:[%s10273_s8 + $0x8] sm:$0xff]  ;;  %v8438_v56 = vld [vmem:[#allocation28] ss:$0 sm:$0xff]  ;;  %s9843_s8 = scalar_lea.vmem %s8192_s4, 128 }
0x2143   :  { %9193 = vmatpush3.msra.mxu1 %v8070_v13  ;;  %p9844_p11 = scmp.ne.s32.totalorder %s8192_s4, %s9843_s8  ;;  %p9849_p13 = scmp.lt.s32.totalorder %s9843_s8, %s9843_s8 }
0x2144   :  { %9453 = vtanh.f32 %v7929_v53  ;;  %v7928_v59 = vmul.f32 0.7978846, %v7926_v54  ;;  %9194 = vmatprep.subr.mxu1 %v9964_v33  ;;  %v8439_v54 = vld [vmem:[#allocation29] ss:$0 sm:$0xff] }
0x2145   :  { %9195 = vmatpush3.msra.mxu1 %v8069_v9  ;;  %p9850_p0 = por %p9849_p13, %p9848_p12 }
0x2146   :  { %9455 = vtanh.f32 %v7928_v59 }
0x2147   :  { %p9851_p1 = pnand %p9850_p0, %p9844_p11 }
0x2151   :  { %v9454_v60 = vpop.eup %9453 }
0x2152   :  { %v7933_v1 = vadd.f32 1.0, %v9454_v60 }
0x2153   :  { %v9456_v63 = vpop.eup %9455 }
0x2154   :  { %v7932_v0 = vadd.f32 1.0, %v9456_v63  ;;  %v7935_v55 = vmul.f32 %v7933_v1, %v7919_v4  ;;  %v8440_v63 = vld [vmem:[#allocation31] ss:$0 sm:$0xff] }
0x2156   :  { %v7934_v44 = vmul.f32 %v7932_v0, %v7918_v2 }
0x2158   :  { %9185 = vmatprep.mubr.msk.f32.mxu0 %vm857_vm3, %v7934_v44 }
0x2159   :  { %9186 = vmatmul.mubr.msk.f32.vlgmr.msra.gmra.mxu0 %vm857_vm3, %v7935_v55 }
0x2219   :  { %v9187_v5 = vpop.f32.mrf.mxu0 }
0x221a   :  { %v8020_v48 = vadd.f32 %v9187_v5, %v8433_v57 }
0x221b   :  { %v8014_v6 = vpop.f32.mrf.mxu0 }
0x221c   :  { %v8024_v58 = vadd.f32 %v8020_v48, %v7830_v39  ;;  %v8015_v3 = vadd.f32 %v8433_v57, %v8014_v6 }
0x221e   :  { %v8023_v8 = vadd.f32 %v8015_v3, %v7829_v36  ;;  %v8028_v10 = vsel %vm857_vm3, %v8024_v58, 0.0 }
0x221f   :  { %8029 = vadd.xlane.f32.xlu0 %v8028_v10 }
0x2220   :  { %v8025_v61 = vsel %vm857_vm3, %v8023_v8, 0.0 }
0x2221   :  { %8026 = vadd.xlane.f32.xlu1 %v8025_v61 }
0x22a8   :  { %v8030_v11 = vpop.xlane.xlu0 %8029 }
0x22a9   :  { %v8032_v46 = vmul.f32 0.03125, %v8030_v11 }
0x22aa   :  { %v8027_v43 = vpop.xlane.xlu1 %8026 }
0x22ab   :  { %v8034_v30 = vsub.f32 %v8024_v58, %v8032_v46  ;;  %v8031_v42 = vmul.f32 0.03125, %v8027_v43 }
0x22ad   :  { %v8033_v21 = vsub.f32 %v8023_v8, %v8031_v42  ;;  %v8036_v14 = vmul.f32 %v8034_v30, %v8034_v30 }
0x22af   :  { %v8040_v15 = vsel %vm857_vm3, %v8036_v14, 0.0  ;;  %v8035_v18 = vmul.f32 %v8033_v21, %v8033_v21 }
0x22b0   :  { %8041 = vadd.xlane.f32.xlu0 %v8040_v15 }
0x22b1   :  { %v8037_v31 = vsel %vm857_vm3, %v8035_v18, 0.0 }
0x22b2   :  { %8038 = vadd.xlane.f32.xlu1 %v8037_v31 }
0x2339   :  { %v8042_v52 = vpop.xlane.xlu0 %8041 }
0x233a   :  { %v8044_v19 = vmul.f32 0.03125, %v8042_v52 }
0x233b   :  { %v8039_v22 = vpop.xlane.xlu1 %8038 }
0x233c   :  { %v8046_v23 = vadd.f32 1e-05, %v8044_v19  ;;  %v8043_v24 = vmul.f32 0.03125, %v8039_v22 }
0x233e   :  { %9457 = vrsqrt.f32 %v8046_v23  ;;  %v8045_v27 = vadd.f32 1e-05, %v8043_v24 }
0x2340   :  { %9459 = vrsqrt.f32 %v8045_v27 }
0x234b   :  { %v9458_v25 = vpop.eup %9457 }
0x234c   :  { %v8050_v28 = vmul.f32 %v9458_v25, %v8034_v30 }
0x234d   :  { %v9460_v29 = vpop.eup %9459 }
0x234e   :  { %v8049_v26 = vmul.f32 %v9460_v29, %v8033_v21  ;;  %v8058_v34 = vmul.f32 %v8436_v17, %v8050_v28 }
0x2350   :  { %v8057_v32 = vmul.f32 %v8436_v17, %v8049_v26  ;;  %v8066_v38 = vadd.f32 %v8437_v35, %v8058_v34 }
0x2352   :  { %v8065_v36 = vadd.f32 %v8437_v35, %v8057_v32 }
0x2354   :  { %v8075_v39 = vrot.slane %v8065_v36, 4 }
0x2356   :  { %v8077_v20 = vsel %vm491_vm0, %v8075_v39, %v8066_v38 }
0x2357   :  { %v8078_v37 = vsel %vm857_vm3, %v8077_v20, 0.0 }
0x2358   :  { %8079 = vadd.xlane.f32.xlu1 %v8078_v37 }
0x23e1   :  { %v8080_v7 = vpop.xlane.xlu1 %8079 }
0x23e2   :  { %v8081_v40 = vmul.f32 0.03125, %v8080_v7 }
0x23e4   :  { %v8082_v41 = vsub.f32 %v8077_v20, %v8081_v40 }
0x23e6   :  { %v8083_v45 = vmul.f32 %v8082_v41, %v8082_v41 }
0x23e8   :  { %v8084_v47 = vsel %vm857_vm3, %v8083_v45, 0.0 }
0x23e9   :  { %8085 = vadd.xlane.f32.xlu0 %v8084_v47 }
0x2472   :  { %v8086_v50 = vpop.xlane.xlu0 %8085 }
0x2473   :  { %v8087_v16 = vmul.f32 0.03125, %v8086_v50 }
0x2475   :  { %v8088_v62 = vadd.f32 1e-05, %v8087_v16 }
0x2477   :  { %9461 = vrsqrt.f32 %v8088_v62 }
0x2484   :  { %v9462_v51 = vpop.eup %9461 }
0x2485   :  { %v8090_v53 = vmul.f32 %v9462_v51, %v8082_v41 }
0x2487   :  { %v8097_v59 = vmul.f32 %v8438_v56, %v8090_v53 }
0x2489   :  { %v8104_v60 = vadd.f32 %v8439_v54, %v8097_v59 }
0x248b   :  { %9197 = vmatmul.mubr.msk.f32.vlgmr.msra.gmra.mxu1 %vm857_vm3, %v8104_v60 }
0x254b   :  { %v8180_v1 = vpop.f32.mrf.mxu1 }
0x254c   :  { %v8181_v2 = vadd.f32 %v8440_v63, %v8180_v1 }
0x254d   :  { %v9198_v33 = vpop.f32.mrf.mxu1 }
0x254e   :  { %8184 = vst.msk [vmem:[#allocation32] sm:$0xff] %vm484_vm1, %v8181_v2 }
0x254f   :  { %9854 = shalt.err (!%p9851_p1)
}
0x2550   :  { %8194 = dma.vmem_to_hbm [thread:$0]  %s8192_s4, 128, %s10283_s29, [#allocation4]  }
0x2551   :  { %9883 = dma.done.wait [#allocation4], 128  }
0x2552   :  { %9884 = vsyncadd [#allocation4], 4294967168 }
0x2553   :  { %8198 = vsyncpa [#allocation3], 1 }
0x2554   :  { %8199 = vsyncpa [#allocation6], 1 }
0x2555   :  { %8200 = vsyncpa [#allocation9], 1 }
0x2556   :  { %8201 = vsyncpa [#allocation12], 1 }
0x2557   :  { %8202 = vsyncpa [#allocation15], 1 }
0x2558   :  { %8203 = vsyncpa [#allocation18], 1 }
0x2559   :  { %8204 = vsyncpa [#allocation21], 1 }
0x255a   :  { %8205 = vsyncpa [#allocation24], 1 }
0x255b   :  { %8206 = vsyncpa [#allocation27], 1 }
0x255c   :  { %8207 = vsyncpa [#allocation30], 1 }
0x255d   :  { %8208 = vsyncpa [#allocation4], 1 }

</bundles_post_ra>
